<compile_context>
chip_gen: v5e
topology: v5e:2x2
jax: 0.10.0
libtpu: 0.0.40
codegen_flags: <defaults>
</compile_context>

<pallas_src>
import jax
import jax.numpy as jnp
from jax.experimental import pallas as pl
from jax.experimental.pallas import tpu as pltpu


def _row_copy(tab_ref, idx, emb_buf, row, sem):
    """DMA descriptor: one (1, D) embedding-table row (HBM) -> VMEM gather buffer."""
    return pltpu.make_async_copy(
        tab_ref.at[pl.ds(idx, 1)], emb_buf.at[pl.ds(row, 1)], sem)


def _cla_loss_kernel(users_ref, items_ref,                  # scalar prefetch (SMEM)
                     user_tab, id_tab, img_tab, txt_tab,    # HBM tables (pl.ANY)
                     proto_ref, gamma_ref,                  # VMEM (D,K) / SMEM (1,1)
                     out_ref,                               # SMEM (1,1) scalar out
                     emb_buf, copy_sem):                    # scratch: VMEM (4B,D), DMA sems (4,)
    nB4, D = emb_buf.shape
    B = nB4 // 4
    K = proto_ref.shape[1]
    Bf = float(B)

    # ---- fused gather: DMA the selected rows of all four tables into one
    #      stacked (4*B, D) VMEM buffer (slab order: user, id, image, text).
    #      Issue ALL starts first so the per-row DMAs run concurrently. ----
    tabs = (user_tab, id_tab, img_tab, txt_tab)
    idxs = (users_ref, items_ref, items_ref, items_ref)
    for m in range(4):
        for b in range(B):
            _row_copy(tabs[m], idxs[m][b], emb_buf, m * B + b,
                      copy_sem.at[m]).start()

    # Work that does not depend on the gathered rows is hoisted BEFORE the DMA
    # waits so it overlaps with the gather, and so the SMEM scalar read (gamma)
    # happens before any .wait() (wait breaks SMEM sst->sld forwarding).
    inv_gamma = 1.0 / gamma_ref[0, 0]
    protos = proto_ref[...].astype(jnp.bfloat16)                   # (D, K)

    for m in range(4):
        for b in range(B):
            _row_copy(tabs[m], idxs[m][b], emb_buf, m * B + b,
                      copy_sem.at[m]).wait()

    # ---- one l2-normalize + ONE MXU matmul for all four modalities ----
    x = emb_buf[...].astype(jnp.float32)                           # (4B, D)
    # NOTE: eps added to the squared sum (torch F.normalize clamps the norm;
    # negligible numerical difference).
    inv_norm = jax.lax.rsqrt(jnp.sum(x * x, axis=-1, keepdims=True) + 1e-12)
    z = (x * inv_norm).astype(jnp.bfloat16)        # unit-norm rows -> bf16 is safe
    codes = jnp.dot(z, protos, preferred_element_type=jnp.float32)  # (4B, K) f32
    codes3 = codes.reshape(4, B, K)   # [0]=user, [1]=id(=id_ii), [2]=image_ii, [3]=text_ii

    # ---- vectorized sinkhorn over the 4 stacked code tables (was 5 sequential
    #      sinkhorns in torch; q_id_ii == q_id so the redundant pass is gone) ----
    # Matches torch: Q = exp(out/0.05).t(); Q /= sum(Q);
    #   3x { rows(/=per-prototype sum); /=K; cols(/=per-sample sum); /=B }; Q *= B
    def sinkhorn(out):                                             # (4, B, K)
        m = jnp.max(out, axis=-1, keepdims=True)
        m = jnp.max(m, axis=-2, keepdims=True)                     # per-table max
        # max shift cancels exactly in the global normalization; prevents
        # f32 overflow of exp(out / 0.05).
        Q = jnp.exp((out - m) * 20.0)                              # 1/0.05 = 20
        s = jnp.sum(Q, axis=-1, keepdims=True)
        s = jnp.sum(s, axis=-2, keepdims=True)                     # per-table total
        Q = Q * pl.reciprocal(s, approx=True)
        for _ in range(3):                                         # sinkhorn_iterations = 3
            r = jnp.sum(Q, axis=-2, keepdims=True)                 # per prototype (4,1,K)
            Q = Q * (pl.reciprocal(r, approx=True) * (1.0 / K))
            c = jnp.sum(Q, axis=-1, keepdims=True)                 # per sample (4,B,1)
            Q = Q * (pl.reciprocal(c, approx=True) * (1.0 / Bf))
        return Q * Bf

    q3 = sinkhorn(codes3)        # q3[1] serves as both q_id and q_id_ii (dedup)

    # ---- ONE vectorized log_softmax over the 4 stacked logit tables (was 8
    #      per-call log_softmaxes); divide-by-gamma hoisted to one reciprocal ----
    logits = codes3 * inv_gamma
    y = logits - jnp.max(logits, axis=-1, keepdims=True)
    ls3 = y - jnp.log(jnp.sum(jnp.exp(y), axis=-1, keepdims=True))  # (4, B, K)

    # ---- cross-entropy terms:  -mean_B(sum_K(q * log_softmax)) = -sum(q*ls)/B
    inv_B = 1.0 / Bf
    # loss: q_user <-> log_softmax(code_id),  q_id <-> log_softmax(code_user)
    loss = -(jnp.sum(q3[0] * ls3[1]) + jnp.sum(q3[1] * ls3[0])) * inv_B
    # align_loss = sum over ordered pairs (a, b), a != b, a, b in {id, image, text}
    #            = sum_{a,b} q[a]*ls[b]  -  sum_{a==b} q[a]*ls[a]   (vectorized)
    qa = q3[1] + q3[2] + q3[3]
    la = ls3[1] + ls3[2] + ls3[3]
    align = -(jnp.sum(qa * la) - jnp.sum(q3[1:] * ls3[1:])) * inv_B

    out_ref[0, 0] = loss * 0.5 + align * (1.0 / 6.0)


@jax.jit
def cla_loss(user_emb, id_emb, image_emb, text_emb, users, items, protos,
             gamma):
    """Whole loss (gather + codes + sinkhorn + CE) in a single pallas_call."""
    B = users.shape[0]
    D, K = protos.shape
    users = users.astype(jnp.int32)
    items = items.astype(jnp.int32)
    gamma2d = jnp.reshape(gamma.astype(jnp.float32), (1, 1))

    grid_spec = pltpu.PrefetchScalarGridSpec(
        num_scalar_prefetch=2,          # users, items -> SMEM, drive the DMA gather
        grid=(1,),
        in_specs=[
            pl.BlockSpec(memory_space=pl.ANY),                    # user_emb  (HBM)
            pl.BlockSpec(memory_space=pl.ANY),                    # id_emb    (HBM)
            pl.BlockSpec(memory_space=pl.ANY),                    # image_emb (HBM)
            pl.BlockSpec(memory_space=pl.ANY),                    # text_emb  (HBM)
            pl.BlockSpec((D, K), lambda i, u_idx, i_idx: (0, 0)),  # protos -> VMEM
            pl.BlockSpec(memory_space=pltpu.MemorySpace.SMEM),    # gamma (1, 1)
        ],
        out_specs=pl.BlockSpec(memory_space=pltpu.MemorySpace.SMEM),  # scalar out
        scratch_shapes=[
            pltpu.VMEM((4 * B, D), jnp.float32),   # stacked gathered embeddings
            pltpu.SemaphoreType.DMA((4,)),         # one DMA semaphore per modality
        ],
    )

    out = pl.pallas_call(
        _cla_loss_kernel,
        out_shape=jax.ShapeDtypeStruct((1, 1), jnp.float32),
        grid_spec=grid_spec,
        compiler_params=pltpu.CompilerParams(
            dimension_semantics=("arbitrary",),
            # Explicit scoped-VMEM budget (demo shapes need only a few KiB).
            # TODO(synk): production shapes (B~4096, D~1024) need a B-grid with a
            #             two-pass sinkhorn instead of one whole-batch block.
            vmem_limit_bytes=32 * 1024 * 1024,
        ),
    )(users, items, user_emb, id_emb, image_emb, text_emb, protos, gamma2d)
    return out[0, 0]


if __name__ == "__main__":
    # Small synthetic shapes consistent with the module.
    K = 16          # number of prototypes
    D = 32          # prototype / embedding dim
    GAMMA0 = 0.1    # temperature init (nn.Parameter(ones([]) * gamma))
    NUM_USERS = 32
    NUM_ITEMS = 32
    B = 8           # batch of (user, item) pairs

    key = jax.random.PRNGKey(0)
    k_u, k_i, k_im, k_tx, k_p, k_us, k_it = jax.random.split(key, 7)

    user_emb = jax.random.normal(k_u, (NUM_USERS, D), dtype=jnp.float32)
    id_emb = jax.random.normal(k_i, (NUM_ITEMS, D), dtype=jnp.float32)
    image_emb = jax.random.normal(k_im, (NUM_ITEMS, D), dtype=jnp.float32)
    text_emb = jax.random.normal(k_tx, (NUM_ITEMS, D), dtype=jnp.float32)

    # Deterministic parameter init: L2-normalized prototype columns + gamma.
    protos = jax.random.normal(k_p, (D, K), dtype=jnp.float32)
    protos = protos / jnp.linalg.norm(protos, axis=0, keepdims=True)
    gamma = jnp.array(GAMMA0, dtype=jnp.float32)

    users = jax.random.randint(k_us, (B,), 0, NUM_USERS)
    items = jax.random.randint(k_it, (B,), 0, NUM_ITEMS)

    loss = cla_loss(user_emb, id_emb, image_emb, text_emb, users, items,
                    protos, gamma)
    loss = jax.block_until_ready(loss)
    assert jnp.isfinite(loss), loss
    print("KERNEL_OK")
</pallas_src>

<mosaic_0001>
module attributes {stable_mosaic.version = 11 : i64} {
  func.func @_cla_loss_kernel(%arg0: i32, %arg1: memref<8xi32, #tpu.memory_space<smem>>, %arg2: memref<8xi32, #tpu.memory_space<smem>>, %arg3: memref<32x32xf32, #tpu.memory_space<any>>, %arg4: memref<32x32xf32, #tpu.memory_space<any>>, %arg5: memref<32x32xf32, #tpu.memory_space<any>>, %arg6: memref<32x32xf32, #tpu.memory_space<any>>, %arg7: memref<32x16xf32, #tpu.memory_space<vmem>>, %arg8: memref<1x1xf32, #tpu.memory_space<smem>>, %arg9: memref<1x1xf32, #tpu.memory_space<smem>>, %arg10: memref<32x32xf32, #tpu.memory_space<vmem>>, %arg11: memref<4x!tpu.dma_semaphore, #tpu.memory_space<semaphore_mem>>) attributes {dimension_semantics = [#tpu.dimension_semantics<arbitrary>], iteration_bounds = array<i64: 1>, scalar_prefetch = 2 : i64, scratch_operands = 2 : i64, tpu.core_type = #tpu.core_type<tc>, window_params = [{}, {}, {}, {}, {pipeline_mode = #tpu.pipeline_mode<synchronous>, transform_indices = @transform_4, window_bounds = array<i64: 32, 16>}, {transform_indices = @transform_5, window_bounds = array<i64: 1, 1>}, {transform_indices = @transform_6, window_bounds = array<i64: 1, 1>}]} {
    %c0 = arith.constant 0 : index
    %0 = memref.load %arg1[%c0] : memref<8xi32, #tpu.memory_space<smem>>
    %c0_i32 = arith.constant 0 : i32
    %c0_i32_0 = arith.constant 0 : i32
    %1 = tpu.memref_slice %arg3[%0, %c0_i32_0] : memref<32x32xf32, #tpu.memory_space<any>> -> memref<1x32xf32, #tpu.memory_space<any>>
    %c0_i32_1 = arith.constant 0 : i32
    %c0_i32_2 = arith.constant 0 : i32
    %2 = tpu.memref_slice %arg10[%c0_i32_1, %c0_i32_2] : memref<32x32xf32, #tpu.memory_space<vmem>> -> memref<1x32xf32, #tpu.memory_space<vmem>>
    %3 = tpu.memref_slice %arg11[%c0_i32] : memref<4x!tpu.dma_semaphore, #tpu.memory_space<semaphore_mem>> -> memref<1x!tpu.dma_semaphore, #tpu.memory_space<semaphore_mem>>
    %4 = tpu.memref_squeeze %3 : memref<1x!tpu.dma_semaphore, #tpu.memory_space<semaphore_mem>> -> memref<!tpu.dma_semaphore, #tpu.memory_space<semaphore_mem>>
    tpu.enqueue_dma source(%1 : memref<1x32xf32, #tpu.memory_space<any>>) target(%2 : memref<1x32xf32, #tpu.memory_space<vmem>>) target_semaphore(%4 : memref<!tpu.dma_semaphore, #tpu.memory_space<semaphore_mem>>)
    %c1 = arith.constant 1 : index
    %5 = memref.load %arg1[%c1] : memref<8xi32, #tpu.memory_space<smem>>
    %c0_i32_3 = arith.constant 0 : i32
    %c0_i32_4 = arith.constant 0 : i32
    %6 = tpu.memref_slice %arg3[%5, %c0_i32_4] : memref<32x32xf32, #tpu.memory_space<any>> -> memref<1x32xf32, #tpu.memory_space<any>>
    %c1_i32 = arith.constant 1 : i32
    %c0_i32_5 = arith.constant 0 : i32
    %7 = tpu.memref_slice %arg10[%c1_i32, %c0_i32_5] : memref<32x32xf32, #tpu.memory_space<vmem>> -> memref<1x32xf32, #tpu.memory_space<vmem>>
    %8 = tpu.memref_slice %arg11[%c0_i32_3] : memref<4x!tpu.dma_semaphore, #tpu.memory_space<semaphore_mem>> -> memref<1x!tpu.dma_semaphore, #tpu.memory_space<semaphore_mem>>
    %9 = tpu.memref_squeeze %8 : memref<1x!tpu.dma_semaphore, #tpu.memory_space<semaphore_mem>> -> memref<!tpu.dma_semaphore, #tpu.memory_space<semaphore_mem>>
    tpu.enqueue_dma source(%6 : memref<1x32xf32, #tpu.memory_space<any>>) target(%7 : memref<1x32xf32, #tpu.memory_space<vmem>>) target_semaphore(%9 : memref<!tpu.dma_semaphore, #tpu.memory_space<semaphore_mem>>)
    %c2 = arith.constant 2 : index
    %10 = memref.load %arg1[%c2] : memref<8xi32, #tpu.memory_space<smem>>
    %c0_i32_6 = arith.constant 0 : i32
    %c0_i32_7 = arith.constant 0 : i32
    %11 = tpu.memref_slice %arg3[%10, %c0_i32_7] : memref<32x32xf32, #tpu.memory_space<any>> -> memref<1x32xf32, #tpu.memory_space<any>>
    %c2_i32 = arith.constant 2 : i32
    %c0_i32_8 = arith.constant 0 : i32
    %12 = tpu.memref_slice %arg10[%c2_i32, %c0_i32_8] : memref<32x32xf32, #tpu.memory_space<vmem>> -> memref<1x32xf32, #tpu.memory_space<vmem>>
    %13 = tpu.memref_slice %arg11[%c0_i32_6] : memref<4x!tpu.dma_semaphore, #tpu.memory_space<semaphore_mem>> -> memref<1x!tpu.dma_semaphore, #tpu.memory_space<semaphore_mem>>
    %14 = tpu.memref_squeeze %13 : memref<1x!tpu.dma_semaphore, #tpu.memory_space<semaphore_mem>> -> memref<!tpu.dma_semaphore, #tpu.memory_space<semaphore_mem>>
    tpu.enqueue_dma source(%11 : memref<1x32xf32, #tpu.memory_space<any>>) target(%12 : memref<1x32xf32, #tpu.memory_space<vmem>>) target_semaphore(%14 : memref<!tpu.dma_semaphore, #tpu.memory_space<semaphore_mem>>)
    %c3 = arith.constant 3 : index
    %15 = memref.load %arg1[%c3] : memref<8xi32, #tpu.memory_space<smem>>
    %c0_i32_9 = arith.constant 0 : i32
    %c0_i32_10 = arith.constant 0 : i32
    %16 = tpu.memref_slice %arg3[%15, %c0_i32_10] : memref<32x32xf32, #tpu.memory_space<any>> -> memref<1x32xf32, #tpu.memory_space<any>>
    %c3_i32 = arith.constant 3 : i32
    %c0_i32_11 = arith.constant 0 : i32
    %17 = tpu.memref_slice %arg10[%c3_i32, %c0_i32_11] : memref<32x32xf32, #tpu.memory_space<vmem>> -> memref<1x32xf32, #tpu.memory_space<vmem>>
    %18 = tpu.memref_slice %arg11[%c0_i32_9] : memref<4x!tpu.dma_semaphore, #tpu.memory_space<semaphore_mem>> -> memref<1x!tpu.dma_semaphore, #tpu.memory_space<semaphore_mem>>
    %19 = tpu.memref_squeeze %18 : memref<1x!tpu.dma_semaphore, #tpu.memory_space<semaphore_mem>> -> memref<!tpu.dma_semaphore, #tpu.memory_space<semaphore_mem>>
    tpu.enqueue_dma source(%16 : memref<1x32xf32, #tpu.memory_space<any>>) target(%17 : memref<1x32xf32, #tpu.memory_space<vmem>>) target_semaphore(%19 : memref<!tpu.dma_semaphore, #tpu.memory_space<semaphore_mem>>)
    %c4 = arith.constant 4 : index
    %20 = memref.load %arg1[%c4] : memref<8xi32, #tpu.memory_space<smem>>
    %c0_i32_12 = arith.constant 0 : i32
    %c0_i32_13 = arith.constant 0 : i32
    %21 = tpu.memref_slice %arg3[%20, %c0_i32_13] : memref<32x32xf32, #tpu.memory_space<any>> -> memref<1x32xf32, #tpu.memory_space<any>>
    %c4_i32 = arith.constant 4 : i32
    %c0_i32_14 = arith.constant 0 : i32
    %22 = tpu.memref_slice %arg10[%c4_i32, %c0_i32_14] : memref<32x32xf32, #tpu.memory_space<vmem>> -> memref<1x32xf32, #tpu.memory_space<vmem>>
    %23 = tpu.memref_slice %arg11[%c0_i32_12] : memref<4x!tpu.dma_semaphore, #tpu.memory_space<semaphore_mem>> -> memref<1x!tpu.dma_semaphore, #tpu.memory_space<semaphore_mem>>
    %24 = tpu.memref_squeeze %23 : memref<1x!tpu.dma_semaphore, #tpu.memory_space<semaphore_mem>> -> memref<!tpu.dma_semaphore, #tpu.memory_space<semaphore_mem>>
    tpu.enqueue_dma source(%21 : memref<1x32xf32, #tpu.memory_space<any>>) target(%22 : memref<1x32xf32, #tpu.memory_space<vmem>>) target_semaphore(%24 : memref<!tpu.dma_semaphore, #tpu.memory_space<semaphore_mem>>)
    %c5 = arith.constant 5 : index
    %25 = memref.load %arg1[%c5] : memref<8xi32, #tpu.memory_space<smem>>
    %c0_i32_15 = arith.constant 0 : i32
    %c0_i32_16 = arith.constant 0 : i32
    %26 = tpu.memref_slice %arg3[%25, %c0_i32_16] : memref<32x32xf32, #tpu.memory_space<any>> -> memref<1x32xf32, #tpu.memory_space<any>>
    %c5_i32 = arith.constant 5 : i32
    %c0_i32_17 = arith.constant 0 : i32
    %27 = tpu.memref_slice %arg10[%c5_i32, %c0_i32_17] : memref<32x32xf32, #tpu.memory_space<vmem>> -> memref<1x32xf32, #tpu.memory_space<vmem>>
    %28 = tpu.memref_slice %arg11[%c0_i32_15] : memref<4x!tpu.dma_semaphore, #tpu.memory_space<semaphore_mem>> -> memref<1x!tpu.dma_semaphore, #tpu.memory_space<semaphore_mem>>
    %29 = tpu.memref_squeeze %28 : memref<1x!tpu.dma_semaphore, #tpu.memory_space<semaphore_mem>> -> memref<!tpu.dma_semaphore, #tpu.memory_space<semaphore_mem>>
    tpu.enqueue_dma source(%26 : memref<1x32xf32, #tpu.memory_space<any>>) target(%27 : memref<1x32xf32, #tpu.memory_space<vmem>>) target_semaphore(%29 : memref<!tpu.dma_semaphore, #tpu.memory_space<semaphore_mem>>)
    %c6 = arith.constant 6 : index
    %30 = memref.load %arg1[%c6] : memref<8xi32, #tpu.memory_space<smem>>
    %c0_i32_18 = arith.constant 0 : i32
    %c0_i32_19 = arith.constant 0 : i32
    %31 = tpu.memref_slice %arg3[%30, %c0_i32_19] : memref<32x32xf32, #tpu.memory_space<any>> -> memref<1x32xf32, #tpu.memory_space<any>>
    %c6_i32 = arith.constant 6 : i32
    %c0_i32_20 = arith.constant 0 : i32
    %32 = tpu.memref_slice %arg10[%c6_i32, %c0_i32_20] : memref<32x32xf32, #tpu.memory_space<vmem>> -> memref<1x32xf32, #tpu.memory_space<vmem>>
    %33 = tpu.memref_slice %arg11[%c0_i32_18] : memref<4x!tpu.dma_semaphore, #tpu.memory_space<semaphore_mem>> -> memref<1x!tpu.dma_semaphore, #tpu.memory_space<semaphore_mem>>
    %34 = tpu.memref_squeeze %33 : memref<1x!tpu.dma_semaphore, #tpu.memory_space<semaphore_mem>> -> memref<!tpu.dma_semaphore, #tpu.memory_space<semaphore_mem>>
    tpu.enqueue_dma source(%31 : memref<1x32xf32, #tpu.memory_space<any>>) target(%32 : memref<1x32xf32, #tpu.memory_space<vmem>>) target_semaphore(%34 : memref<!tpu.dma_semaphore, #tpu.memory_space<semaphore_mem>>)
    %c7 = arith.constant 7 : index
    %35 = memref.load %arg1[%c7] : memref<8xi32, #tpu.memory_space<smem>>
    %c0_i32_21 = arith.constant 0 : i32
    %c0_i32_22 = arith.constant 0 : i32
    %36 = tpu.memref_slice %arg3[%35, %c0_i32_22] : memref<32x32xf32, #tpu.memory_space<any>> -> memref<1x32xf32, #tpu.memory_space<any>>
    %c7_i32 = arith.constant 7 : i32
    %c0_i32_23 = arith.constant 0 : i32
    %37 = tpu.memref_slice %arg10[%c7_i32, %c0_i32_23] : memref<32x32xf32, #tpu.memory_space<vmem>> -> memref<1x32xf32, #tpu.memory_space<vmem>>
    %38 = tpu.memref_slice %arg11[%c0_i32_21] : memref<4x!tpu.dma_semaphore, #tpu.memory_space<semaphore_mem>> -> memref<1x!tpu.dma_semaphore, #tpu.memory_space<semaphore_mem>>
    %39 = tpu.memref_squeeze %38 : memref<1x!tpu.dma_semaphore, #tpu.memory_space<semaphore_mem>> -> memref<!tpu.dma_semaphore, #tpu.memory_space<semaphore_mem>>
    tpu.enqueue_dma source(%36 : memref<1x32xf32, #tpu.memory_space<any>>) target(%37 : memref<1x32xf32, #tpu.memory_space<vmem>>) target_semaphore(%39 : memref<!tpu.dma_semaphore, #tpu.memory_space<semaphore_mem>>)
    %c0_24 = arith.constant 0 : index
    %40 = memref.load %arg2[%c0_24] : memref<8xi32, #tpu.memory_space<smem>>
    %c1_i32_25 = arith.constant 1 : i32
    %c0_i32_26 = arith.constant 0 : i32
    %41 = tpu.memref_slice %arg4[%40, %c0_i32_26] : memref<32x32xf32, #tpu.memory_space<any>> -> memref<1x32xf32, #tpu.memory_space<any>>
    %c8_i32 = arith.constant 8 : i32
    %c0_i32_27 = arith.constant 0 : i32
    %42 = tpu.memref_slice %arg10[%c8_i32, %c0_i32_27] : memref<32x32xf32, #tpu.memory_space<vmem>> -> memref<1x32xf32, #tpu.memory_space<vmem>>
    %43 = tpu.memref_slice %arg11[%c1_i32_25] : memref<4x!tpu.dma_semaphore, #tpu.memory_space<semaphore_mem>> -> memref<1x!tpu.dma_semaphore, #tpu.memory_space<semaphore_mem>>
    %44 = tpu.memref_squeeze %43 : memref<1x!tpu.dma_semaphore, #tpu.memory_space<semaphore_mem>> -> memref<!tpu.dma_semaphore, #tpu.memory_space<semaphore_mem>>
    tpu.enqueue_dma source(%41 : memref<1x32xf32, #tpu.memory_space<any>>) target(%42 : memref<1x32xf32, #tpu.memory_space<vmem>>) target_semaphore(%44 : memref<!tpu.dma_semaphore, #tpu.memory_space<semaphore_mem>>)
    %c1_28 = arith.constant 1 : index
    %45 = memref.load %arg2[%c1_28] : memref<8xi32, #tpu.memory_space<smem>>
    %c1_i32_29 = arith.constant 1 : i32
    %c0_i32_30 = arith.constant 0 : i32
    %46 = tpu.memref_slice %arg4[%45, %c0_i32_30] : memref<32x32xf32, #tpu.memory_space<any>> -> memref<1x32xf32, #tpu.memory_space<any>>
    %c9_i32 = arith.constant 9 : i32
    %c0_i32_31 = arith.constant 0 : i32
    %47 = tpu.memref_slice %arg10[%c9_i32, %c0_i32_31] : memref<32x32xf32, #tpu.memory_space<vmem>> -> memref<1x32xf32, #tpu.memory_space<vmem>>
    %48 = tpu.memref_slice %arg11[%c1_i32_29] : memref<4x!tpu.dma_semaphore, #tpu.memory_space<semaphore_mem>> -> memref<1x!tpu.dma_semaphore, #tpu.memory_space<semaphore_mem>>
    %49 = tpu.memref_squeeze %48 : memref<1x!tpu.dma_semaphore, #tpu.memory_space<semaphore_mem>> -> memref<!tpu.dma_semaphore, #tpu.memory_space<semaphore_mem>>
    tpu.enqueue_dma source(%46 : memref<1x32xf32, #tpu.memory_space<any>>) target(%47 : memref<1x32xf32, #tpu.memory_space<vmem>>) target_semaphore(%49 : memref<!tpu.dma_semaphore, #tpu.memory_space<semaphore_mem>>)
    %c2_32 = arith.constant 2 : index
    %50 = memref.load %arg2[%c2_32] : memref<8xi32, #tpu.memory_space<smem>>
    %c1_i32_33 = arith.constant 1 : i32
    %c0_i32_34 = arith.constant 0 : i32
    %51 = tpu.memref_slice %arg4[%50, %c0_i32_34] : memref<32x32xf32, #tpu.memory_space<any>> -> memref<1x32xf32, #tpu.memory_space<any>>
    %c10_i32 = arith.constant 10 : i32
    %c0_i32_35 = arith.constant 0 : i32
    %52 = tpu.memref_slice %arg10[%c10_i32, %c0_i32_35] : memref<32x32xf32, #tpu.memory_space<vmem>> -> memref<1x32xf32, #tpu.memory_space<vmem>>
    %53 = tpu.memref_slice %arg11[%c1_i32_33] : memref<4x!tpu.dma_semaphore, #tpu.memory_space<semaphore_mem>> -> memref<1x!tpu.dma_semaphore, #tpu.memory_space<semaphore_mem>>
    %54 = tpu.memref_squeeze %53 : memref<1x!tpu.dma_semaphore, #tpu.memory_space<semaphore_mem>> -> memref<!tpu.dma_semaphore, #tpu.memory_space<semaphore_mem>>
    tpu.enqueue_dma source(%51 : memref<1x32xf32, #tpu.memory_space<any>>) target(%52 : memref<1x32xf32, #tpu.memory_space<vmem>>) target_semaphore(%54 : memref<!tpu.dma_semaphore, #tpu.memory_space<semaphore_mem>>)
    %c3_36 = arith.constant 3 : index
    %55 = memref.load %arg2[%c3_36] : memref<8xi32, #tpu.memory_space<smem>>
    %c1_i32_37 = arith.constant 1 : i32
    %c0_i32_38 = arith.constant 0 : i32
    %56 = tpu.memref_slice %arg4[%55, %c0_i32_38] : memref<32x32xf32, #tpu.memory_space<any>> -> memref<1x32xf32, #tpu.memory_space<any>>
    %c11_i32 = arith.constant 11 : i32
    %c0_i32_39 = arith.constant 0 : i32
    %57 = tpu.memref_slice %arg10[%c11_i32, %c0_i32_39] : memref<32x32xf32, #tpu.memory_space<vmem>> -> memref<1x32xf32, #tpu.memory_space<vmem>>
    %58 = tpu.memref_slice %arg11[%c1_i32_37] : memref<4x!tpu.dma_semaphore, #tpu.memory_space<semaphore_mem>> -> memref<1x!tpu.dma_semaphore, #tpu.memory_space<semaphore_mem>>
    %59 = tpu.memref_squeeze %58 : memref<1x!tpu.dma_semaphore, #tpu.memory_space<semaphore_mem>> -> memref<!tpu.dma_semaphore, #tpu.memory_space<semaphore_mem>>
    tpu.enqueue_dma source(%56 : memref<1x32xf32, #tpu.memory_space<any>>) target(%57 : memref<1x32xf32, #tpu.memory_space<vmem>>) target_semaphore(%59 : memref<!tpu.dma_semaphore, #tpu.memory_space<semaphore_mem>>)
    %c4_40 = arith.constant 4 : index
    %60 = memref.load %arg2[%c4_40] : memref<8xi32, #tpu.memory_space<smem>>
    %c1_i32_41 = arith.constant 1 : i32
    %c0_i32_42 = arith.constant 0 : i32
    %61 = tpu.memref_slice %arg4[%60, %c0_i32_42] : memref<32x32xf32, #tpu.memory_space<any>> -> memref<1x32xf32, #tpu.memory_space<any>>
    %c12_i32 = arith.constant 12 : i32
    %c0_i32_43 = arith.constant 0 : i32
    %62 = tpu.memref_slice %arg10[%c12_i32, %c0_i32_43] : memref<32x32xf32, #tpu.memory_space<vmem>> -> memref<1x32xf32, #tpu.memory_space<vmem>>
    %63 = tpu.memref_slice %arg11[%c1_i32_41] : memref<4x!tpu.dma_semaphore, #tpu.memory_space<semaphore_mem>> -> memref<1x!tpu.dma_semaphore, #tpu.memory_space<semaphore_mem>>
    %64 = tpu.memref_squeeze %63 : memref<1x!tpu.dma_semaphore, #tpu.memory_space<semaphore_mem>> -> memref<!tpu.dma_semaphore, #tpu.memory_space<semaphore_mem>>
    tpu.enqueue_dma source(%61 : memref<1x32xf32, #tpu.memory_space<any>>) target(%62 : memref<1x32xf32, #tpu.memory_space<vmem>>) target_semaphore(%64 : memref<!tpu.dma_semaphore, #tpu.memory_space<semaphore_mem>>)
    %c5_44 = arith.constant 5 : index
    %65 = memref.load %arg2[%c5_44] : memref<8xi32, #tpu.memory_space<smem>>
    %c1_i32_45 = arith.constant 1 : i32
    %c0_i32_46 = arith.constant 0 : i32
    %66 = tpu.memref_slice %arg4[%65, %c0_i32_46] : memref<32x32xf32, #tpu.memory_space<any>> -> memref<1x32xf32, #tpu.memory_space<any>>
    %c13_i32 = arith.constant 13 : i32
    %c0_i32_47 = arith.constant 0 : i32
    %67 = tpu.memref_slice %arg10[%c13_i32, %c0_i32_47] : memref<32x32xf32, #tpu.memory_space<vmem>> -> memref<1x32xf32, #tpu.memory_space<vmem>>
    %68 = tpu.memref_slice %arg11[%c1_i32_45] : memref<4x!tpu.dma_semaphore, #tpu.memory_space<semaphore_mem>> -> memref<1x!tpu.dma_semaphore, #tpu.memory_space<semaphore_mem>>
    %69 = tpu.memref_squeeze %68 : memref<1x!tpu.dma_semaphore, #tpu.memory_space<semaphore_mem>> -> memref<!tpu.dma_semaphore, #tpu.memory_space<semaphore_mem>>
    tpu.enqueue_dma source(%66 : memref<1x32xf32, #tpu.memory_space<any>>) target(%67 : memref<1x32xf32, #tpu.memory_space<vmem>>) target_semaphore(%69 : memref<!tpu.dma_semaphore, #tpu.memory_space<semaphore_mem>>)
    %c6_48 = arith.constant 6 : index
    %70 = memref.load %arg2[%c6_48] : memref<8xi32, #tpu.memory_space<smem>>
    %c1_i32_49 = arith.constant 1 : i32
    %c0_i32_50 = arith.constant 0 : i32
    %71 = tpu.memref_slice %arg4[%70, %c0_i32_50] : memref<32x32xf32, #tpu.memory_space<any>> -> memref<1x32xf32, #tpu.memory_space<any>>
    %c14_i32 = arith.constant 14 : i32
    %c0_i32_51 = arith.constant 0 : i32
    %72 = tpu.memref_slice %arg10[%c14_i32, %c0_i32_51] : memref<32x32xf32, #tpu.memory_space<vmem>> -> memref<1x32xf32, #tpu.memory_space<vmem>>
    %73 = tpu.memref_slice %arg11[%c1_i32_49] : memref<4x!tpu.dma_semaphore, #tpu.memory_space<semaphore_mem>> -> memref<1x!tpu.dma_semaphore, #tpu.memory_space<semaphore_mem>>
    %74 = tpu.memref_squeeze %73 : memref<1x!tpu.dma_semaphore, #tpu.memory_space<semaphore_mem>> -> memref<!tpu.dma_semaphore, #tpu.memory_space<semaphore_mem>>
    tpu.enqueue_dma source(%71 : memref<1x32xf32, #tpu.memory_space<any>>) target(%72 : memref<1x32xf32, #tpu.memory_space<vmem>>) target_semaphore(%74 : memref<!tpu.dma_semaphore, #tpu.memory_space<semaphore_mem>>)
    %c7_52 = arith.constant 7 : index
    %75 = memref.load %arg2[%c7_52] : memref<8xi32, #tpu.memory_space<smem>>
    %c1_i32_53 = arith.constant 1 : i32
    %c0_i32_54 = arith.constant 0 : i32
    %76 = tpu.memref_slice %arg4[%75, %c0_i32_54] : memref<32x32xf32, #tpu.memory_space<any>> -> memref<1x32xf32, #tpu.memory_space<any>>
    %c15_i32 = arith.constant 15 : i32
    %c0_i32_55 = arith.constant 0 : i32
    %77 = tpu.memref_slice %arg10[%c15_i32, %c0_i32_55] : memref<32x32xf32, #tpu.memory_space<vmem>> -> memref<1x32xf32, #tpu.memory_space<vmem>>
    %78 = tpu.memref_slice %arg11[%c1_i32_53] : memref<4x!tpu.dma_semaphore, #tpu.memory_space<semaphore_mem>> -> memref<1x!tpu.dma_semaphore, #tpu.memory_space<semaphore_mem>>
    %79 = tpu.memref_squeeze %78 : memref<1x!tpu.dma_semaphore, #tpu.memory_space<semaphore_mem>> -> memref<!tpu.dma_semaphore, #tpu.memory_space<semaphore_mem>>
    tpu.enqueue_dma source(%76 : memref<1x32xf32, #tpu.memory_space<any>>) target(%77 : memref<1x32xf32, #tpu.memory_space<vmem>>) target_semaphore(%79 : memref<!tpu.dma_semaphore, #tpu.memory_space<semaphore_mem>>)
    %c0_56 = arith.constant 0 : index
    %80 = memref.load %arg2[%c0_56] : memref<8xi32, #tpu.memory_space<smem>>
    %c2_i32_57 = arith.constant 2 : i32
    %c0_i32_58 = arith.constant 0 : i32
    %81 = tpu.memref_slice %arg5[%80, %c0_i32_58] : memref<32x32xf32, #tpu.memory_space<any>> -> memref<1x32xf32, #tpu.memory_space<any>>
    %c16_i32 = arith.constant 16 : i32
    %c0_i32_59 = arith.constant 0 : i32
    %82 = tpu.memref_slice %arg10[%c16_i32, %c0_i32_59] : memref<32x32xf32, #tpu.memory_space<vmem>> -> memref<1x32xf32, #tpu.memory_space<vmem>>
    %83 = tpu.memref_slice %arg11[%c2_i32_57] : memref<4x!tpu.dma_semaphore, #tpu.memory_space<semaphore_mem>> -> memref<1x!tpu.dma_semaphore, #tpu.memory_space<semaphore_mem>>
    %84 = tpu.memref_squeeze %83 : memref<1x!tpu.dma_semaphore, #tpu.memory_space<semaphore_mem>> -> memref<!tpu.dma_semaphore, #tpu.memory_space<semaphore_mem>>
    tpu.enqueue_dma source(%81 : memref<1x32xf32, #tpu.memory_space<any>>) target(%82 : memref<1x32xf32, #tpu.memory_space<vmem>>) target_semaphore(%84 : memref<!tpu.dma_semaphore, #tpu.memory_space<semaphore_mem>>)
    %c1_60 = arith.constant 1 : index
    %85 = memref.load %arg2[%c1_60] : memref<8xi32, #tpu.memory_space<smem>>
    %c2_i32_61 = arith.constant 2 : i32
    %c0_i32_62 = arith.constant 0 : i32
    %86 = tpu.memref_slice %arg5[%85, %c0_i32_62] : memref<32x32xf32, #tpu.memory_space<any>> -> memref<1x32xf32, #tpu.memory_space<any>>
    %c17_i32 = arith.constant 17 : i32
    %c0_i32_63 = arith.constant 0 : i32
    %87 = tpu.memref_slice %arg10[%c17_i32, %c0_i32_63] : memref<32x32xf32, #tpu.memory_space<vmem>> -> memref<1x32xf32, #tpu.memory_space<vmem>>
    %88 = tpu.memref_slice %arg11[%c2_i32_61] : memref<4x!tpu.dma_semaphore, #tpu.memory_space<semaphore_mem>> -> memref<1x!tpu.dma_semaphore, #tpu.memory_space<semaphore_mem>>
    %89 = tpu.memref_squeeze %88 : memref<1x!tpu.dma_semaphore, #tpu.memory_space<semaphore_mem>> -> memref<!tpu.dma_semaphore, #tpu.memory_space<semaphore_mem>>
    tpu.enqueue_dma source(%86 : memref<1x32xf32, #tpu.memory_space<any>>) target(%87 : memref<1x32xf32, #tpu.memory_space<vmem>>) target_semaphore(%89 : memref<!tpu.dma_semaphore, #tpu.memory_space<semaphore_mem>>)
    %c2_64 = arith.constant 2 : index
    %90 = memref.load %arg2[%c2_64] : memref<8xi32, #tpu.memory_space<smem>>
    %c2_i32_65 = arith.constant 2 : i32
    %c0_i32_66 = arith.constant 0 : i32
    %91 = tpu.memref_slice %arg5[%90, %c0_i32_66] : memref<32x32xf32, #tpu.memory_space<any>> -> memref<1x32xf32, #tpu.memory_space<any>>
    %c18_i32 = arith.constant 18 : i32
    %c0_i32_67 = arith.constant 0 : i32
    %92 = tpu.memref_slice %arg10[%c18_i32, %c0_i32_67] : memref<32x32xf32, #tpu.memory_space<vmem>> -> memref<1x32xf32, #tpu.memory_space<vmem>>
    %93 = tpu.memref_slice %arg11[%c2_i32_65] : memref<4x!tpu.dma_semaphore, #tpu.memory_space<semaphore_mem>> -> memref<1x!tpu.dma_semaphore, #tpu.memory_space<semaphore_mem>>
    %94 = tpu.memref_squeeze %93 : memref<1x!tpu.dma_semaphore, #tpu.memory_space<semaphore_mem>> -> memref<!tpu.dma_semaphore, #tpu.memory_space<semaphore_mem>>
    tpu.enqueue_dma source(%91 : memref<1x32xf32, #tpu.memory_space<any>>) target(%92 : memref<1x32xf32, #tpu.memory_space<vmem>>) target_semaphore(%94 : memref<!tpu.dma_semaphore, #tpu.memory_space<semaphore_mem>>)
    %c3_68 = arith.constant 3 : index
    %95 = memref.load %arg2[%c3_68] : memref<8xi32, #tpu.memory_space<smem>>
    %c2_i32_69 = arith.constant 2 : i32
    %c0_i32_70 = arith.constant 0 : i32
    %96 = tpu.memref_slice %arg5[%95, %c0_i32_70] : memref<32x32xf32, #tpu.memory_space<any>> -> memref<1x32xf32, #tpu.memory_space<any>>
    %c19_i32 = arith.constant 19 : i32
    %c0_i32_71 = arith.constant 0 : i32
    %97 = tpu.memref_slice %arg10[%c19_i32, %c0_i32_71] : memref<32x32xf32, #tpu.memory_space<vmem>> -> memref<1x32xf32, #tpu.memory_space<vmem>>
    %98 = tpu.memref_slice %arg11[%c2_i32_69] : memref<4x!tpu.dma_semaphore, #tpu.memory_space<semaphore_mem>> -> memref<1x!tpu.dma_semaphore, #tpu.memory_space<semaphore_mem>>
    %99 = tpu.memref_squeeze %98 : memref<1x!tpu.dma_semaphore, #tpu.memory_space<semaphore_mem>> -> memref<!tpu.dma_semaphore, #tpu.memory_space<semaphore_mem>>
    tpu.enqueue_dma source(%96 : memref<1x32xf32, #tpu.memory_space<any>>) target(%97 : memref<1x32xf32, #tpu.memory_space<vmem>>) target_semaphore(%99 : memref<!tpu.dma_semaphore, #tpu.memory_space<semaphore_mem>>)
    %c4_72 = arith.constant 4 : index
    %100 = memref.load %arg2[%c4_72] : memref<8xi32, #tpu.memory_space<smem>>
    %c2_i32_73 = arith.constant 2 : i32
    %c0_i32_74 = arith.constant 0 : i32
    %101 = tpu.memref_slice %arg5[%100, %c0_i32_74] : memref<32x32xf32, #tpu.memory_space<any>> -> memref<1x32xf32, #tpu.memory_space<any>>
    %c20_i32 = arith.constant 20 : i32
    %c0_i32_75 = arith.constant 0 : i32
    %102 = tpu.memref_slice %arg10[%c20_i32, %c0_i32_75] : memref<32x32xf32, #tpu.memory_space<vmem>> -> memref<1x32xf32, #tpu.memory_space<vmem>>
    %103 = tpu.memref_slice %arg11[%c2_i32_73] : memref<4x!tpu.dma_semaphore, #tpu.memory_space<semaphore_mem>> -> memref<1x!tpu.dma_semaphore, #tpu.memory_space<semaphore_mem>>
    %104 = tpu.memref_squeeze %103 : memref<1x!tpu.dma_semaphore, #tpu.memory_space<semaphore_mem>> -> memref<!tpu.dma_semaphore, #tpu.memory_space<semaphore_mem>>
    tpu.enqueue_dma source(%101 : memref<1x32xf32, #tpu.memory_space<any>>) target(%102 : memref<1x32xf32, #tpu.memory_space<vmem>>) target_semaphore(%104 : memref<!tpu.dma_semaphore, #tpu.memory_space<semaphore_mem>>)
    %c5_76 = arith.constant 5 : index
    %105 = memref.load %arg2[%c5_76] : memref<8xi32, #tpu.memory_space<smem>>
    %c2_i32_77 = arith.constant 2 : i32
    %c0_i32_78 = arith.constant 0 : i32
    %106 = tpu.memref_slice %arg5[%105, %c0_i32_78] : memref<32x32xf32, #tpu.memory_space<any>> -> memref<1x32xf32, #tpu.memory_space<any>>
    %c21_i32 = arith.constant 21 : i32
    %c0_i32_79 = arith.constant 0 : i32
    %107 = tpu.memref_slice %arg10[%c21_i32, %c0_i32_79] : memref<32x32xf32, #tpu.memory_space<vmem>> -> memref<1x32xf32, #tpu.memory_space<vmem>>
    %108 = tpu.memref_slice %arg11[%c2_i32_77] : memref<4x!tpu.dma_semaphore, #tpu.memory_space<semaphore_mem>> -> memref<1x!tpu.dma_semaphore, #tpu.memory_space<semaphore_mem>>
    %109 = tpu.memref_squeeze %108 : memref<1x!tpu.dma_semaphore, #tpu.memory_space<semaphore_mem>> -> memref<!tpu.dma_semaphore, #tpu.memory_space<semaphore_mem>>
    tpu.enqueue_dma source(%106 : memref<1x32xf32, #tpu.memory_space<any>>) target(%107 : memref<1x32xf32, #tpu.memory_space<vmem>>) target_semaphore(%109 : memref<!tpu.dma_semaphore, #tpu.memory_space<semaphore_mem>>)
    %c6_80 = arith.constant 6 : index
    %110 = memref.load %arg2[%c6_80] : memref<8xi32, #tpu.memory_space<smem>>
    %c2_i32_81 = arith.constant 2 : i32
    %c0_i32_82 = arith.constant 0 : i32
    %111 = tpu.memref_slice %arg5[%110, %c0_i32_82] : memref<32x32xf32, #tpu.memory_space<any>> -> memref<1x32xf32, #tpu.memory_space<any>>
    %c22_i32 = arith.constant 22 : i32
    %c0_i32_83 = arith.constant 0 : i32
    %112 = tpu.memref_slice %arg10[%c22_i32, %c0_i32_83] : memref<32x32xf32, #tpu.memory_space<vmem>> -> memref<1x32xf32, #tpu.memory_space<vmem>>
    %113 = tpu.memref_slice %arg11[%c2_i32_81] : memref<4x!tpu.dma_semaphore, #tpu.memory_space<semaphore_mem>> -> memref<1x!tpu.dma_semaphore, #tpu.memory_space<semaphore_mem>>
    %114 = tpu.memref_squeeze %113 : memref<1x!tpu.dma_semaphore, #tpu.memory_space<semaphore_mem>> -> memref<!tpu.dma_semaphore, #tpu.memory_space<semaphore_mem>>
    tpu.enqueue_dma source(%111 : memref<1x32xf32, #tpu.memory_space<any>>) target(%112 : memref<1x32xf32, #tpu.memory_space<vmem>>) target_semaphore(%114 : memref<!tpu.dma_semaphore, #tpu.memory_space<semaphore_mem>>)
    %c7_84 = arith.constant 7 : index
    %115 = memref.load %arg2[%c7_84] : memref<8xi32, #tpu.memory_space<smem>>
    %c2_i32_85 = arith.constant 2 : i32
    %c0_i32_86 = arith.constant 0 : i32
    %116 = tpu.memref_slice %arg5[%115, %c0_i32_86] : memref<32x32xf32, #tpu.memory_space<any>> -> memref<1x32xf32, #tpu.memory_space<any>>
    %c23_i32 = arith.constant 23 : i32
    %c0_i32_87 = arith.constant 0 : i32
    %117 = tpu.memref_slice %arg10[%c23_i32, %c0_i32_87] : memref<32x32xf32, #tpu.memory_space<vmem>> -> memref<1x32xf32, #tpu.memory_space<vmem>>
    %118 = tpu.memref_slice %arg11[%c2_i32_85] : memref<4x!tpu.dma_semaphore, #tpu.memory_space<semaphore_mem>> -> memref<1x!tpu.dma_semaphore, #tpu.memory_space<semaphore_mem>>
    %119 = tpu.memref_squeeze %118 : memref<1x!tpu.dma_semaphore, #tpu.memory_space<semaphore_mem>> -> memref<!tpu.dma_semaphore, #tpu.memory_space<semaphore_mem>>
    tpu.enqueue_dma source(%116 : memref<1x32xf32, #tpu.memory_space<any>>) target(%117 : memref<1x32xf32, #tpu.memory_space<vmem>>) target_semaphore(%119 : memref<!tpu.dma_semaphore, #tpu.memory_space<semaphore_mem>>)
    %c0_88 = arith.constant 0 : index
    %120 = memref.load %arg2[%c0_88] : memref<8xi32, #tpu.memory_space<smem>>
    %c3_i32_89 = arith.constant 3 : i32
    %c0_i32_90 = arith.constant 0 : i32
    %121 = tpu.memref_slice %arg6[%120, %c0_i32_90] : memref<32x32xf32, #tpu.memory_space<any>> -> memref<1x32xf32, #tpu.memory_space<any>>
    %c24_i32 = arith.constant 24 : i32
    %c0_i32_91 = arith.constant 0 : i32
    %122 = tpu.memref_slice %arg10[%c24_i32, %c0_i32_91] : memref<32x32xf32, #tpu.memory_space<vmem>> -> memref<1x32xf32, #tpu.memory_space<vmem>>
    %123 = tpu.memref_slice %arg11[%c3_i32_89] : memref<4x!tpu.dma_semaphore, #tpu.memory_space<semaphore_mem>> -> memref<1x!tpu.dma_semaphore, #tpu.memory_space<semaphore_mem>>
    %124 = tpu.memref_squeeze %123 : memref<1x!tpu.dma_semaphore, #tpu.memory_space<semaphore_mem>> -> memref<!tpu.dma_semaphore, #tpu.memory_space<semaphore_mem>>
    tpu.enqueue_dma source(%121 : memref<1x32xf32, #tpu.memory_space<any>>) target(%122 : memref<1x32xf32, #tpu.memory_space<vmem>>) target_semaphore(%124 : memref<!tpu.dma_semaphore, #tpu.memory_space<semaphore_mem>>)
    %c1_92 = arith.constant 1 : index
    %125 = memref.load %arg2[%c1_92] : memref<8xi32, #tpu.memory_space<smem>>
    %c3_i32_93 = arith.constant 3 : i32
    %c0_i32_94 = arith.constant 0 : i32
    %126 = tpu.memref_slice %arg6[%125, %c0_i32_94] : memref<32x32xf32, #tpu.memory_space<any>> -> memref<1x32xf32, #tpu.memory_space<any>>
    %c25_i32 = arith.constant 25 : i32
    %c0_i32_95 = arith.constant 0 : i32
    %127 = tpu.memref_slice %arg10[%c25_i32, %c0_i32_95] : memref<32x32xf32, #tpu.memory_space<vmem>> -> memref<1x32xf32, #tpu.memory_space<vmem>>
    %128 = tpu.memref_slice %arg11[%c3_i32_93] : memref<4x!tpu.dma_semaphore, #tpu.memory_space<semaphore_mem>> -> memref<1x!tpu.dma_semaphore, #tpu.memory_space<semaphore_mem>>
    %129 = tpu.memref_squeeze %128 : memref<1x!tpu.dma_semaphore, #tpu.memory_space<semaphore_mem>> -> memref<!tpu.dma_semaphore, #tpu.memory_space<semaphore_mem>>
    tpu.enqueue_dma source(%126 : memref<1x32xf32, #tpu.memory_space<any>>) target(%127 : memref<1x32xf32, #tpu.memory_space<vmem>>) target_semaphore(%129 : memref<!tpu.dma_semaphore, #tpu.memory_space<semaphore_mem>>)
    %c2_96 = arith.constant 2 : index
    %130 = memref.load %arg2[%c2_96] : memref<8xi32, #tpu.memory_space<smem>>
    %c3_i32_97 = arith.constant 3 : i32
    %c0_i32_98 = arith.constant 0 : i32
    %131 = tpu.memref_slice %arg6[%130, %c0_i32_98] : memref<32x32xf32, #tpu.memory_space<any>> -> memref<1x32xf32, #tpu.memory_space<any>>
    %c26_i32 = arith.constant 26 : i32
    %c0_i32_99 = arith.constant 0 : i32
    %132 = tpu.memref_slice %arg10[%c26_i32, %c0_i32_99] : memref<32x32xf32, #tpu.memory_space<vmem>> -> memref<1x32xf32, #tpu.memory_space<vmem>>
    %133 = tpu.memref_slice %arg11[%c3_i32_97] : memref<4x!tpu.dma_semaphore, #tpu.memory_space<semaphore_mem>> -> memref<1x!tpu.dma_semaphore, #tpu.memory_space<semaphore_mem>>
    %134 = tpu.memref_squeeze %133 : memref<1x!tpu.dma_semaphore, #tpu.memory_space<semaphore_mem>> -> memref<!tpu.dma_semaphore, #tpu.memory_space<semaphore_mem>>
    tpu.enqueue_dma source(%131 : memref<1x32xf32, #tpu.memory_space<any>>) target(%132 : memref<1x32xf32, #tpu.memory_space<vmem>>) target_semaphore(%134 : memref<!tpu.dma_semaphore, #tpu.memory_space<semaphore_mem>>)
    %c3_100 = arith.constant 3 : index
    %135 = memref.load %arg2[%c3_100] : memref<8xi32, #tpu.memory_space<smem>>
    %c3_i32_101 = arith.constant 3 : i32
    %c0_i32_102 = arith.constant 0 : i32
    %136 = tpu.memref_slice %arg6[%135, %c0_i32_102] : memref<32x32xf32, #tpu.memory_space<any>> -> memref<1x32xf32, #tpu.memory_space<any>>
    %c27_i32 = arith.constant 27 : i32
    %c0_i32_103 = arith.constant 0 : i32
    %137 = tpu.memref_slice %arg10[%c27_i32, %c0_i32_103] : memref<32x32xf32, #tpu.memory_space<vmem>> -> memref<1x32xf32, #tpu.memory_space<vmem>>
    %138 = tpu.memref_slice %arg11[%c3_i32_101] : memref<4x!tpu.dma_semaphore, #tpu.memory_space<semaphore_mem>> -> memref<1x!tpu.dma_semaphore, #tpu.memory_space<semaphore_mem>>
    %139 = tpu.memref_squeeze %138 : memref<1x!tpu.dma_semaphore, #tpu.memory_space<semaphore_mem>> -> memref<!tpu.dma_semaphore, #tpu.memory_space<semaphore_mem>>
    tpu.enqueue_dma source(%136 : memref<1x32xf32, #tpu.memory_space<any>>) target(%137 : memref<1x32xf32, #tpu.memory_space<vmem>>) target_semaphore(%139 : memref<!tpu.dma_semaphore, #tpu.memory_space<semaphore_mem>>)
    %c4_104 = arith.constant 4 : index
    %140 = memref.load %arg2[%c4_104] : memref<8xi32, #tpu.memory_space<smem>>
    %c3_i32_105 = arith.constant 3 : i32
    %c0_i32_106 = arith.constant 0 : i32
    %141 = tpu.memref_slice %arg6[%140, %c0_i32_106] : memref<32x32xf32, #tpu.memory_space<any>> -> memref<1x32xf32, #tpu.memory_space<any>>
    %c28_i32 = arith.constant 28 : i32
    %c0_i32_107 = arith.constant 0 : i32
    %142 = tpu.memref_slice %arg10[%c28_i32, %c0_i32_107] : memref<32x32xf32, #tpu.memory_space<vmem>> -> memref<1x32xf32, #tpu.memory_space<vmem>>
    %143 = tpu.memref_slice %arg11[%c3_i32_105] : memref<4x!tpu.dma_semaphore, #tpu.memory_space<semaphore_mem>> -> memref<1x!tpu.dma_semaphore, #tpu.memory_space<semaphore_mem>>
    %144 = tpu.memref_squeeze %143 : memref<1x!tpu.dma_semaphore, #tpu.memory_space<semaphore_mem>> -> memref<!tpu.dma_semaphore, #tpu.memory_space<semaphore_mem>>
    tpu.enqueue_dma source(%141 : memref<1x32xf32, #tpu.memory_space<any>>) target(%142 : memref<1x32xf32, #tpu.memory_space<vmem>>) target_semaphore(%144 : memref<!tpu.dma_semaphore, #tpu.memory_space<semaphore_mem>>)
    %c5_108 = arith.constant 5 : index
    %145 = memref.load %arg2[%c5_108] : memref<8xi32, #tpu.memory_space<smem>>
    %c3_i32_109 = arith.constant 3 : i32
    %c0_i32_110 = arith.constant 0 : i32
    %146 = tpu.memref_slice %arg6[%145, %c0_i32_110] : memref<32x32xf32, #tpu.memory_space<any>> -> memref<1x32xf32, #tpu.memory_space<any>>
    %c29_i32 = arith.constant 29 : i32
    %c0_i32_111 = arith.constant 0 : i32
    %147 = tpu.memref_slice %arg10[%c29_i32, %c0_i32_111] : memref<32x32xf32, #tpu.memory_space<vmem>> -> memref<1x32xf32, #tpu.memory_space<vmem>>
    %148 = tpu.memref_slice %arg11[%c3_i32_109] : memref<4x!tpu.dma_semaphore, #tpu.memory_space<semaphore_mem>> -> memref<1x!tpu.dma_semaphore, #tpu.memory_space<semaphore_mem>>
    %149 = tpu.memref_squeeze %148 : memref<1x!tpu.dma_semaphore, #tpu.memory_space<semaphore_mem>> -> memref<!tpu.dma_semaphore, #tpu.memory_space<semaphore_mem>>
    tpu.enqueue_dma source(%146 : memref<1x32xf32, #tpu.memory_space<any>>) target(%147 : memref<1x32xf32, #tpu.memory_space<vmem>>) target_semaphore(%149 : memref<!tpu.dma_semaphore, #tpu.memory_space<semaphore_mem>>)
    %c6_112 = arith.constant 6 : index
    %150 = memref.load %arg2[%c6_112] : memref<8xi32, #tpu.memory_space<smem>>
    %c3_i32_113 = arith.constant 3 : i32
    %c0_i32_114 = arith.constant 0 : i32
    %151 = tpu.memref_slice %arg6[%150, %c0_i32_114] : memref<32x32xf32, #tpu.memory_space<any>> -> memref<1x32xf32, #tpu.memory_space<any>>
    %c30_i32 = arith.constant 30 : i32
    %c0_i32_115 = arith.constant 0 : i32
    %152 = tpu.memref_slice %arg10[%c30_i32, %c0_i32_115] : memref<32x32xf32, #tpu.memory_space<vmem>> -> memref<1x32xf32, #tpu.memory_space<vmem>>
    %153 = tpu.memref_slice %arg11[%c3_i32_113] : memref<4x!tpu.dma_semaphore, #tpu.memory_space<semaphore_mem>> -> memref<1x!tpu.dma_semaphore, #tpu.memory_space<semaphore_mem>>
    %154 = tpu.memref_squeeze %153 : memref<1x!tpu.dma_semaphore, #tpu.memory_space<semaphore_mem>> -> memref<!tpu.dma_semaphore, #tpu.memory_space<semaphore_mem>>
    tpu.enqueue_dma source(%151 : memref<1x32xf32, #tpu.memory_space<any>>) target(%152 : memref<1x32xf32, #tpu.memory_space<vmem>>) target_semaphore(%154 : memref<!tpu.dma_semaphore, #tpu.memory_space<semaphore_mem>>)
    %c7_116 = arith.constant 7 : index
    %155 = memref.load %arg2[%c7_116] : memref<8xi32, #tpu.memory_space<smem>>
    %c3_i32_117 = arith.constant 3 : i32
    %c0_i32_118 = arith.constant 0 : i32
    %156 = tpu.memref_slice %arg6[%155, %c0_i32_118] : memref<32x32xf32, #tpu.memory_space<any>> -> memref<1x32xf32, #tpu.memory_space<any>>
    %c31_i32 = arith.constant 31 : i32
    %c0_i32_119 = arith.constant 0 : i32
    %157 = tpu.memref_slice %arg10[%c31_i32, %c0_i32_119] : memref<32x32xf32, #tpu.memory_space<vmem>> -> memref<1x32xf32, #tpu.memory_space<vmem>>
    %158 = tpu.memref_slice %arg11[%c3_i32_117] : memref<4x!tpu.dma_semaphore, #tpu.memory_space<semaphore_mem>> -> memref<1x!tpu.dma_semaphore, #tpu.memory_space<semaphore_mem>>
    %159 = tpu.memref_squeeze %158 : memref<1x!tpu.dma_semaphore, #tpu.memory_space<semaphore_mem>> -> memref<!tpu.dma_semaphore, #tpu.memory_space<semaphore_mem>>
    tpu.enqueue_dma source(%156 : memref<1x32xf32, #tpu.memory_space<any>>) target(%157 : memref<1x32xf32, #tpu.memory_space<vmem>>) target_semaphore(%159 : memref<!tpu.dma_semaphore, #tpu.memory_space<semaphore_mem>>)
    %c0_120 = arith.constant 0 : index
    %c0_121 = arith.constant 0 : index
    %160 = memref.load %arg8[%c0_120, %c0_121] : memref<1x1xf32, #tpu.memory_space<smem>>
    %cst = arith.constant 1.000000e+00 : f32
    %161 = arith.divf %cst, %160 : f32
    %c0_122 = arith.constant 0 : index
    %c0_123 = arith.constant 0 : index
    %162 = vector.load %arg7[%c0_122, %c0_123] : memref<32x16xf32, #tpu.memory_space<vmem>>, vector<32x16xf32>
    %163 = arith.truncf %162 : vector<32x16xf32> to vector<32x16xbf16>
    %c0_124 = arith.constant 0 : index
    %164 = memref.load %arg1[%c0_124] : memref<8xi32, #tpu.memory_space<smem>>
    %c0_i32_125 = arith.constant 0 : i32
    %c0_i32_126 = arith.constant 0 : i32
    %165 = tpu.memref_slice %arg3[%164, %c0_i32_126] : memref<32x32xf32, #tpu.memory_space<any>> -> memref<1x32xf32, #tpu.memory_space<any>>
    %c0_i32_127 = arith.constant 0 : i32
    %c0_i32_128 = arith.constant 0 : i32
    %166 = tpu.memref_slice %arg10[%c0_i32_127, %c0_i32_128] : memref<32x32xf32, #tpu.memory_space<vmem>> -> memref<1x32xf32, #tpu.memory_space<vmem>>
    %167 = tpu.memref_slice %arg11[%c0_i32_125] : memref<4x!tpu.dma_semaphore, #tpu.memory_space<semaphore_mem>> -> memref<1x!tpu.dma_semaphore, #tpu.memory_space<semaphore_mem>>
    %168 = tpu.memref_squeeze %167 : memref<1x!tpu.dma_semaphore, #tpu.memory_space<semaphore_mem>> -> memref<!tpu.dma_semaphore, #tpu.memory_space<semaphore_mem>>
    tpu.wait_dma2 semaphore(%168 : memref<!tpu.dma_semaphore, #tpu.memory_space<semaphore_mem>>) src(%165 : memref<1x32xf32, #tpu.memory_space<any>>) dst(%166 : memref<1x32xf32, #tpu.memory_space<vmem>>)
    %c1_129 = arith.constant 1 : index
    %169 = memref.load %arg1[%c1_129] : memref<8xi32, #tpu.memory_space<smem>>
    %c0_i32_130 = arith.constant 0 : i32
    %c0_i32_131 = arith.constant 0 : i32
    %170 = tpu.memref_slice %arg3[%169, %c0_i32_131] : memref<32x32xf32, #tpu.memory_space<any>> -> memref<1x32xf32, #tpu.memory_space<any>>
    %c1_i32_132 = arith.constant 1 : i32
    %c0_i32_133 = arith.constant 0 : i32
    %171 = tpu.memref_slice %arg10[%c1_i32_132, %c0_i32_133] : memref<32x32xf32, #tpu.memory_space<vmem>> -> memref<1x32xf32, #tpu.memory_space<vmem>>
    %172 = tpu.memref_slice %arg11[%c0_i32_130] : memref<4x!tpu.dma_semaphore, #tpu.memory_space<semaphore_mem>> -> memref<1x!tpu.dma_semaphore, #tpu.memory_space<semaphore_mem>>
    %173 = tpu.memref_squeeze %172 : memref<1x!tpu.dma_semaphore, #tpu.memory_space<semaphore_mem>> -> memref<!tpu.dma_semaphore, #tpu.memory_space<semaphore_mem>>
    tpu.wait_dma2 semaphore(%173 : memref<!tpu.dma_semaphore, #tpu.memory_space<semaphore_mem>>) src(%170 : memref<1x32xf32, #tpu.memory_space<any>>) dst(%171 : memref<1x32xf32, #tpu.memory_space<vmem>>)
    %c2_134 = arith.constant 2 : index
    %174 = memref.load %arg1[%c2_134] : memref<8xi32, #tpu.memory_space<smem>>
    %c0_i32_135 = arith.constant 0 : i32
    %c0_i32_136 = arith.constant 0 : i32
    %175 = tpu.memref_slice %arg3[%174, %c0_i32_136] : memref<32x32xf32, #tpu.memory_space<any>> -> memref<1x32xf32, #tpu.memory_space<any>>
    %c2_i32_137 = arith.constant 2 : i32
    %c0_i32_138 = arith.constant 0 : i32
    %176 = tpu.memref_slice %arg10[%c2_i32_137, %c0_i32_138] : memref<32x32xf32, #tpu.memory_space<vmem>> -> memref<1x32xf32, #tpu.memory_space<vmem>>
    %177 = tpu.memref_slice %arg11[%c0_i32_135] : memref<4x!tpu.dma_semaphore, #tpu.memory_space<semaphore_mem>> -> memref<1x!tpu.dma_semaphore, #tpu.memory_space<semaphore_mem>>
    %178 = tpu.memref_squeeze %177 : memref<1x!tpu.dma_semaphore, #tpu.memory_space<semaphore_mem>> -> memref<!tpu.dma_semaphore, #tpu.memory_space<semaphore_mem>>
    tpu.wait_dma2 semaphore(%178 : memref<!tpu.dma_semaphore, #tpu.memory_space<semaphore_mem>>) src(%175 : memref<1x32xf32, #tpu.memory_space<any>>) dst(%176 : memref<1x32xf32, #tpu.memory_space<vmem>>)
    %c3_139 = arith.constant 3 : index
    %179 = memref.load %arg1[%c3_139] : memref<8xi32, #tpu.memory_space<smem>>
    %c0_i32_140 = arith.constant 0 : i32
    %c0_i32_141 = arith.constant 0 : i32
    %180 = tpu.memref_slice %arg3[%179, %c0_i32_141] : memref<32x32xf32, #tpu.memory_space<any>> -> memref<1x32xf32, #tpu.memory_space<any>>
    %c3_i32_142 = arith.constant 3 : i32
    %c0_i32_143 = arith.constant 0 : i32
    %181 = tpu.memref_slice %arg10[%c3_i32_142, %c0_i32_143] : memref<32x32xf32, #tpu.memory_space<vmem>> -> memref<1x32xf32, #tpu.memory_space<vmem>>
    %182 = tpu.memref_slice %arg11[%c0_i32_140] : memref<4x!tpu.dma_semaphore, #tpu.memory_space<semaphore_mem>> -> memref<1x!tpu.dma_semaphore, #tpu.memory_space<semaphore_mem>>
    %183 = tpu.memref_squeeze %182 : memref<1x!tpu.dma_semaphore, #tpu.memory_space<semaphore_mem>> -> memref<!tpu.dma_semaphore, #tpu.memory_space<semaphore_mem>>
    tpu.wait_dma2 semaphore(%183 : memref<!tpu.dma_semaphore, #tpu.memory_space<semaphore_mem>>) src(%180 : memref<1x32xf32, #tpu.memory_space<any>>) dst(%181 : memref<1x32xf32, #tpu.memory_space<vmem>>)
    %c4_144 = arith.constant 4 : index
    %184 = memref.load %arg1[%c4_144] : memref<8xi32, #tpu.memory_space<smem>>
    %c0_i32_145 = arith.constant 0 : i32
    %c0_i32_146 = arith.constant 0 : i32
    %185 = tpu.memref_slice %arg3[%184, %c0_i32_146] : memref<32x32xf32, #tpu.memory_space<any>> -> memref<1x32xf32, #tpu.memory_space<any>>
    %c4_i32_147 = arith.constant 4 : i32
    %c0_i32_148 = arith.constant 0 : i32
    %186 = tpu.memref_slice %arg10[%c4_i32_147, %c0_i32_148] : memref<32x32xf32, #tpu.memory_space<vmem>> -> memref<1x32xf32, #tpu.memory_space<vmem>>
    %187 = tpu.memref_slice %arg11[%c0_i32_145] : memref<4x!tpu.dma_semaphore, #tpu.memory_space<semaphore_mem>> -> memref<1x!tpu.dma_semaphore, #tpu.memory_space<semaphore_mem>>
    %188 = tpu.memref_squeeze %187 : memref<1x!tpu.dma_semaphore, #tpu.memory_space<semaphore_mem>> -> memref<!tpu.dma_semaphore, #tpu.memory_space<semaphore_mem>>
    tpu.wait_dma2 semaphore(%188 : memref<!tpu.dma_semaphore, #tpu.memory_space<semaphore_mem>>) src(%185 : memref<1x32xf32, #tpu.memory_space<any>>) dst(%186 : memref<1x32xf32, #tpu.memory_space<vmem>>)
    %c5_149 = arith.constant 5 : index
    %189 = memref.load %arg1[%c5_149] : memref<8xi32, #tpu.memory_space<smem>>
    %c0_i32_150 = arith.constant 0 : i32
    %c0_i32_151 = arith.constant 0 : i32
    %190 = tpu.memref_slice %arg3[%189, %c0_i32_151] : memref<32x32xf32, #tpu.memory_space<any>> -> memref<1x32xf32, #tpu.memory_space<any>>
    %c5_i32_152 = arith.constant 5 : i32
    %c0_i32_153 = arith.constant 0 : i32
    %191 = tpu.memref_slice %arg10[%c5_i32_152, %c0_i32_153] : memref<32x32xf32, #tpu.memory_space<vmem>> -> memref<1x32xf32, #tpu.memory_space<vmem>>
    %192 = tpu.memref_slice %arg11[%c0_i32_150] : memref<4x!tpu.dma_semaphore, #tpu.memory_space<semaphore_mem>> -> memref<1x!tpu.dma_semaphore, #tpu.memory_space<semaphore_mem>>
    %193 = tpu.memref_squeeze %192 : memref<1x!tpu.dma_semaphore, #tpu.memory_space<semaphore_mem>> -> memref<!tpu.dma_semaphore, #tpu.memory_space<semaphore_mem>>
    tpu.wait_dma2 semaphore(%193 : memref<!tpu.dma_semaphore, #tpu.memory_space<semaphore_mem>>) src(%190 : memref<1x32xf32, #tpu.memory_space<any>>) dst(%191 : memref<1x32xf32, #tpu.memory_space<vmem>>)
    %c6_154 = arith.constant 6 : index
    %194 = memref.load %arg1[%c6_154] : memref<8xi32, #tpu.memory_space<smem>>
    %c0_i32_155 = arith.constant 0 : i32
    %c0_i32_156 = arith.constant 0 : i32
    %195 = tpu.memref_slice %arg3[%194, %c0_i32_156] : memref<32x32xf32, #tpu.memory_space<any>> -> memref<1x32xf32, #tpu.memory_space<any>>
    %c6_i32_157 = arith.constant 6 : i32
    %c0_i32_158 = arith.constant 0 : i32
    %196 = tpu.memref_slice %arg10[%c6_i32_157, %c0_i32_158] : memref<32x32xf32, #tpu.memory_space<vmem>> -> memref<1x32xf32, #tpu.memory_space<vmem>>
    %197 = tpu.memref_slice %arg11[%c0_i32_155] : memref<4x!tpu.dma_semaphore, #tpu.memory_space<semaphore_mem>> -> memref<1x!tpu.dma_semaphore, #tpu.memory_space<semaphore_mem>>
    %198 = tpu.memref_squeeze %197 : memref<1x!tpu.dma_semaphore, #tpu.memory_space<semaphore_mem>> -> memref<!tpu.dma_semaphore, #tpu.memory_space<semaphore_mem>>
    tpu.wait_dma2 semaphore(%198 : memref<!tpu.dma_semaphore, #tpu.memory_space<semaphore_mem>>) src(%195 : memref<1x32xf32, #tpu.memory_space<any>>) dst(%196 : memref<1x32xf32, #tpu.memory_space<vmem>>)
    %c7_159 = arith.constant 7 : index
    %199 = memref.load %arg1[%c7_159] : memref<8xi32, #tpu.memory_space<smem>>
    %c0_i32_160 = arith.constant 0 : i32
    %c0_i32_161 = arith.constant 0 : i32
    %200 = tpu.memref_slice %arg3[%199, %c0_i32_161] : memref<32x32xf32, #tpu.memory_space<any>> -> memref<1x32xf32, #tpu.memory_space<any>>
    %c7_i32_162 = arith.constant 7 : i32
    %c0_i32_163 = arith.constant 0 : i32
    %201 = tpu.memref_slice %arg10[%c7_i32_162, %c0_i32_163] : memref<32x32xf32, #tpu.memory_space<vmem>> -> memref<1x32xf32, #tpu.memory_space<vmem>>
    %202 = tpu.memref_slice %arg11[%c0_i32_160] : memref<4x!tpu.dma_semaphore, #tpu.memory_space<semaphore_mem>> -> memref<1x!tpu.dma_semaphore, #tpu.memory_space<semaphore_mem>>
    %203 = tpu.memref_squeeze %202 : memref<1x!tpu.dma_semaphore, #tpu.memory_space<semaphore_mem>> -> memref<!tpu.dma_semaphore, #tpu.memory_space<semaphore_mem>>
    tpu.wait_dma2 semaphore(%203 : memref<!tpu.dma_semaphore, #tpu.memory_space<semaphore_mem>>) src(%200 : memref<1x32xf32, #tpu.memory_space<any>>) dst(%201 : memref<1x32xf32, #tpu.memory_space<vmem>>)
    %c0_164 = arith.constant 0 : index
    %204 = memref.load %arg2[%c0_164] : memref<8xi32, #tpu.memory_space<smem>>
    %c1_i32_165 = arith.constant 1 : i32
    %c0_i32_166 = arith.constant 0 : i32
    %205 = tpu.memref_slice %arg4[%204, %c0_i32_166] : memref<32x32xf32, #tpu.memory_space<any>> -> memref<1x32xf32, #tpu.memory_space<any>>
    %c8_i32_167 = arith.constant 8 : i32
    %c0_i32_168 = arith.constant 0 : i32
    %206 = tpu.memref_slice %arg10[%c8_i32_167, %c0_i32_168] : memref<32x32xf32, #tpu.memory_space<vmem>> -> memref<1x32xf32, #tpu.memory_space<vmem>>
    %207 = tpu.memref_slice %arg11[%c1_i32_165] : memref<4x!tpu.dma_semaphore, #tpu.memory_space<semaphore_mem>> -> memref<1x!tpu.dma_semaphore, #tpu.memory_space<semaphore_mem>>
    %208 = tpu.memref_squeeze %207 : memref<1x!tpu.dma_semaphore, #tpu.memory_space<semaphore_mem>> -> memref<!tpu.dma_semaphore, #tpu.memory_space<semaphore_mem>>
    tpu.wait_dma2 semaphore(%208 : memref<!tpu.dma_semaphore, #tpu.memory_space<semaphore_mem>>) src(%205 : memref<1x32xf32, #tpu.memory_space<any>>) dst(%206 : memref<1x32xf32, #tpu.memory_space<vmem>>)
    %c1_169 = arith.constant 1 : index
    %209 = memref.load %arg2[%c1_169] : memref<8xi32, #tpu.memory_space<smem>>
    %c1_i32_170 = arith.constant 1 : i32
    %c0_i32_171 = arith.constant 0 : i32
    %210 = tpu.memref_slice %arg4[%209, %c0_i32_171] : memref<32x32xf32, #tpu.memory_space<any>> -> memref<1x32xf32, #tpu.memory_space<any>>
    %c9_i32_172 = arith.constant 9 : i32
    %c0_i32_173 = arith.constant 0 : i32
    %211 = tpu.memref_slice %arg10[%c9_i32_172, %c0_i32_173] : memref<32x32xf32, #tpu.memory_space<vmem>> -> memref<1x32xf32, #tpu.memory_space<vmem>>
    %212 = tpu.memref_slice %arg11[%c1_i32_170] : memref<4x!tpu.dma_semaphore, #tpu.memory_space<semaphore_mem>> -> memref<1x!tpu.dma_semaphore, #tpu.memory_space<semaphore_mem>>
    %213 = tpu.memref_squeeze %212 : memref<1x!tpu.dma_semaphore, #tpu.memory_space<semaphore_mem>> -> memref<!tpu.dma_semaphore, #tpu.memory_space<semaphore_mem>>
    tpu.wait_dma2 semaphore(%213 : memref<!tpu.dma_semaphore, #tpu.memory_space<semaphore_mem>>) src(%210 : memref<1x32xf32, #tpu.memory_space<any>>) dst(%211 : memref<1x32xf32, #tpu.memory_space<vmem>>)
    %c2_174 = arith.constant 2 : index
    %214 = memref.load %arg2[%c2_174] : memref<8xi32, #tpu.memory_space<smem>>
    %c1_i32_175 = arith.constant 1 : i32
    %c0_i32_176 = arith.constant 0 : i32
    %215 = tpu.memref_slice %arg4[%214, %c0_i32_176] : memref<32x32xf32, #tpu.memory_space<any>> -> memref<1x32xf32, #tpu.memory_space<any>>
    %c10_i32_177 = arith.constant 10 : i32
    %c0_i32_178 = arith.constant 0 : i32
    %216 = tpu.memref_slice %arg10[%c10_i32_177, %c0_i32_178] : memref<32x32xf32, #tpu.memory_space<vmem>> -> memref<1x32xf32, #tpu.memory_space<vmem>>
    %217 = tpu.memref_slice %arg11[%c1_i32_175] : memref<4x!tpu.dma_semaphore, #tpu.memory_space<semaphore_mem>> -> memref<1x!tpu.dma_semaphore, #tpu.memory_space<semaphore_mem>>
    %218 = tpu.memref_squeeze %217 : memref<1x!tpu.dma_semaphore, #tpu.memory_space<semaphore_mem>> -> memref<!tpu.dma_semaphore, #tpu.memory_space<semaphore_mem>>
    tpu.wait_dma2 semaphore(%218 : memref<!tpu.dma_semaphore, #tpu.memory_space<semaphore_mem>>) src(%215 : memref<1x32xf32, #tpu.memory_space<any>>) dst(%216 : memref<1x32xf32, #tpu.memory_space<vmem>>)
    %c3_179 = arith.constant 3 : index
    %219 = memref.load %arg2[%c3_179] : memref<8xi32, #tpu.memory_space<smem>>
    %c1_i32_180 = arith.constant 1 : i32
    %c0_i32_181 = arith.constant 0 : i32
    %220 = tpu.memref_slice %arg4[%219, %c0_i32_181] : memref<32x32xf32, #tpu.memory_space<any>> -> memref<1x32xf32, #tpu.memory_space<any>>
    %c11_i32_182 = arith.constant 11 : i32
    %c0_i32_183 = arith.constant 0 : i32
    %221 = tpu.memref_slice %arg10[%c11_i32_182, %c0_i32_183] : memref<32x32xf32, #tpu.memory_space<vmem>> -> memref<1x32xf32, #tpu.memory_space<vmem>>
    %222 = tpu.memref_slice %arg11[%c1_i32_180] : memref<4x!tpu.dma_semaphore, #tpu.memory_space<semaphore_mem>> -> memref<1x!tpu.dma_semaphore, #tpu.memory_space<semaphore_mem>>
    %223 = tpu.memref_squeeze %222 : memref<1x!tpu.dma_semaphore, #tpu.memory_space<semaphore_mem>> -> memref<!tpu.dma_semaphore, #tpu.memory_space<semaphore_mem>>
    tpu.wait_dma2 semaphore(%223 : memref<!tpu.dma_semaphore, #tpu.memory_space<semaphore_mem>>) src(%220 : memref<1x32xf32, #tpu.memory_space<any>>) dst(%221 : memref<1x32xf32, #tpu.memory_space<vmem>>)
    %c4_184 = arith.constant 4 : index
    %224 = memref.load %arg2[%c4_184] : memref<8xi32, #tpu.memory_space<smem>>
    %c1_i32_185 = arith.constant 1 : i32
    %c0_i32_186 = arith.constant 0 : i32
    %225 = tpu.memref_slice %arg4[%224, %c0_i32_186] : memref<32x32xf32, #tpu.memory_space<any>> -> memref<1x32xf32, #tpu.memory_space<any>>
    %c12_i32_187 = arith.constant 12 : i32
    %c0_i32_188 = arith.constant 0 : i32
    %226 = tpu.memref_slice %arg10[%c12_i32_187, %c0_i32_188] : memref<32x32xf32, #tpu.memory_space<vmem>> -> memref<1x32xf32, #tpu.memory_space<vmem>>
    %227 = tpu.memref_slice %arg11[%c1_i32_185] : memref<4x!tpu.dma_semaphore, #tpu.memory_space<semaphore_mem>> -> memref<1x!tpu.dma_semaphore, #tpu.memory_space<semaphore_mem>>
    %228 = tpu.memref_squeeze %227 : memref<1x!tpu.dma_semaphore, #tpu.memory_space<semaphore_mem>> -> memref<!tpu.dma_semaphore, #tpu.memory_space<semaphore_mem>>
    tpu.wait_dma2 semaphore(%228 : memref<!tpu.dma_semaphore, #tpu.memory_space<semaphore_mem>>) src(%225 : memref<1x32xf32, #tpu.memory_space<any>>) dst(%226 : memref<1x32xf32, #tpu.memory_space<vmem>>)
    %c5_189 = arith.constant 5 : index
    %229 = memref.load %arg2[%c5_189] : memref<8xi32, #tpu.memory_space<smem>>
    %c1_i32_190 = arith.constant 1 : i32
    %c0_i32_191 = arith.constant 0 : i32
    %230 = tpu.memref_slice %arg4[%229, %c0_i32_191] : memref<32x32xf32, #tpu.memory_space<any>> -> memref<1x32xf32, #tpu.memory_space<any>>
    %c13_i32_192 = arith.constant 13 : i32
    %c0_i32_193 = arith.constant 0 : i32
    %231 = tpu.memref_slice %arg10[%c13_i32_192, %c0_i32_193] : memref<32x32xf32, #tpu.memory_space<vmem>> -> memref<1x32xf32, #tpu.memory_space<vmem>>
    %232 = tpu.memref_slice %arg11[%c1_i32_190] : memref<4x!tpu.dma_semaphore, #tpu.memory_space<semaphore_mem>> -> memref<1x!tpu.dma_semaphore, #tpu.memory_space<semaphore_mem>>
    %233 = tpu.memref_squeeze %232 : memref<1x!tpu.dma_semaphore, #tpu.memory_space<semaphore_mem>> -> memref<!tpu.dma_semaphore, #tpu.memory_space<semaphore_mem>>
    tpu.wait_dma2 semaphore(%233 : memref<!tpu.dma_semaphore, #tpu.memory_space<semaphore_mem>>) src(%230 : memref<1x32xf32, #tpu.memory_space<any>>) dst(%231 : memref<1x32xf32, #tpu.memory_space<vmem>>)
    %c6_194 = arith.constant 6 : index
    %234 = memref.load %arg2[%c6_194] : memref<8xi32, #tpu.memory_space<smem>>
    %c1_i32_195 = arith.constant 1 : i32
    %c0_i32_196 = arith.constant 0 : i32
    %235 = tpu.memref_slice %arg4[%234, %c0_i32_196] : memref<32x32xf32, #tpu.memory_space<any>> -> memref<1x32xf32, #tpu.memory_space<any>>
    %c14_i32_197 = arith.constant 14 : i32
    %c0_i32_198 = arith.constant 0 : i32
    %236 = tpu.memref_slice %arg10[%c14_i32_197, %c0_i32_198] : memref<32x32xf32, #tpu.memory_space<vmem>> -> memref<1x32xf32, #tpu.memory_space<vmem>>
    %237 = tpu.memref_slice %arg11[%c1_i32_195] : memref<4x!tpu.dma_semaphore, #tpu.memory_space<semaphore_mem>> -> memref<1x!tpu.dma_semaphore, #tpu.memory_space<semaphore_mem>>
    %238 = tpu.memref_squeeze %237 : memref<1x!tpu.dma_semaphore, #tpu.memory_space<semaphore_mem>> -> memref<!tpu.dma_semaphore, #tpu.memory_space<semaphore_mem>>
    tpu.wait_dma2 semaphore(%238 : memref<!tpu.dma_semaphore, #tpu.memory_space<semaphore_mem>>) src(%235 : memref<1x32xf32, #tpu.memory_space<any>>) dst(%236 : memref<1x32xf32, #tpu.memory_space<vmem>>)
    %c7_199 = arith.constant 7 : index
    %239 = memref.load %arg2[%c7_199] : memref<8xi32, #tpu.memory_space<smem>>
    %c1_i32_200 = arith.constant 1 : i32
    %c0_i32_201 = arith.constant 0 : i32
    %240 = tpu.memref_slice %arg4[%239, %c0_i32_201] : memref<32x32xf32, #tpu.memory_space<any>> -> memref<1x32xf32, #tpu.memory_space<any>>
    %c15_i32_202 = arith.constant 15 : i32
    %c0_i32_203 = arith.constant 0 : i32
    %241 = tpu.memref_slice %arg10[%c15_i32_202, %c0_i32_203] : memref<32x32xf32, #tpu.memory_space<vmem>> -> memref<1x32xf32, #tpu.memory_space<vmem>>
    %242 = tpu.memref_slice %arg11[%c1_i32_200] : memref<4x!tpu.dma_semaphore, #tpu.memory_space<semaphore_mem>> -> memref<1x!tpu.dma_semaphore, #tpu.memory_space<semaphore_mem>>
    %243 = tpu.memref_squeeze %242 : memref<1x!tpu.dma_semaphore, #tpu.memory_space<semaphore_mem>> -> memref<!tpu.dma_semaphore, #tpu.memory_space<semaphore_mem>>
    tpu.wait_dma2 semaphore(%243 : memref<!tpu.dma_semaphore, #tpu.memory_space<semaphore_mem>>) src(%240 : memref<1x32xf32, #tpu.memory_space<any>>) dst(%241 : memref<1x32xf32, #tpu.memory_space<vmem>>)
    %c0_204 = arith.constant 0 : index
    %244 = memref.load %arg2[%c0_204] : memref<8xi32, #tpu.memory_space<smem>>
    %c2_i32_205 = arith.constant 2 : i32
    %c0_i32_206 = arith.constant 0 : i32
    %245 = tpu.memref_slice %arg5[%244, %c0_i32_206] : memref<32x32xf32, #tpu.memory_space<any>> -> memref<1x32xf32, #tpu.memory_space<any>>
    %c16_i32_207 = arith.constant 16 : i32
    %c0_i32_208 = arith.constant 0 : i32
    %246 = tpu.memref_slice %arg10[%c16_i32_207, %c0_i32_208] : memref<32x32xf32, #tpu.memory_space<vmem>> -> memref<1x32xf32, #tpu.memory_space<vmem>>
    %247 = tpu.memref_slice %arg11[%c2_i32_205] : memref<4x!tpu.dma_semaphore, #tpu.memory_space<semaphore_mem>> -> memref<1x!tpu.dma_semaphore, #tpu.memory_space<semaphore_mem>>
    %248 = tpu.memref_squeeze %247 : memref<1x!tpu.dma_semaphore, #tpu.memory_space<semaphore_mem>> -> memref<!tpu.dma_semaphore, #tpu.memory_space<semaphore_mem>>
    tpu.wait_dma2 semaphore(%248 : memref<!tpu.dma_semaphore, #tpu.memory_space<semaphore_mem>>) src(%245 : memref<1x32xf32, #tpu.memory_space<any>>) dst(%246 : memref<1x32xf32, #tpu.memory_space<vmem>>)
    %c1_209 = arith.constant 1 : index
    %249 = memref.load %arg2[%c1_209] : memref<8xi32, #tpu.memory_space<smem>>
    %c2_i32_210 = arith.constant 2 : i32
    %c0_i32_211 = arith.constant 0 : i32
    %250 = tpu.memref_slice %arg5[%249, %c0_i32_211] : memref<32x32xf32, #tpu.memory_space<any>> -> memref<1x32xf32, #tpu.memory_space<any>>
    %c17_i32_212 = arith.constant 17 : i32
    %c0_i32_213 = arith.constant 0 : i32
    %251 = tpu.memref_slice %arg10[%c17_i32_212, %c0_i32_213] : memref<32x32xf32, #tpu.memory_space<vmem>> -> memref<1x32xf32, #tpu.memory_space<vmem>>
    %252 = tpu.memref_slice %arg11[%c2_i32_210] : memref<4x!tpu.dma_semaphore, #tpu.memory_space<semaphore_mem>> -> memref<1x!tpu.dma_semaphore, #tpu.memory_space<semaphore_mem>>
    %253 = tpu.memref_squeeze %252 : memref<1x!tpu.dma_semaphore, #tpu.memory_space<semaphore_mem>> -> memref<!tpu.dma_semaphore, #tpu.memory_space<semaphore_mem>>
    tpu.wait_dma2 semaphore(%253 : memref<!tpu.dma_semaphore, #tpu.memory_space<semaphore_mem>>) src(%250 : memref<1x32xf32, #tpu.memory_space<any>>) dst(%251 : memref<1x32xf32, #tpu.memory_space<vmem>>)
    %c2_214 = arith.constant 2 : index
    %254 = memref.load %arg2[%c2_214] : memref<8xi32, #tpu.memory_space<smem>>
    %c2_i32_215 = arith.constant 2 : i32
    %c0_i32_216 = arith.constant 0 : i32
    %255 = tpu.memref_slice %arg5[%254, %c0_i32_216] : memref<32x32xf32, #tpu.memory_space<any>> -> memref<1x32xf32, #tpu.memory_space<any>>
    %c18_i32_217 = arith.constant 18 : i32
    %c0_i32_218 = arith.constant 0 : i32
    %256 = tpu.memref_slice %arg10[%c18_i32_217, %c0_i32_218] : memref<32x32xf32, #tpu.memory_space<vmem>> -> memref<1x32xf32, #tpu.memory_space<vmem>>
    %257 = tpu.memref_slice %arg11[%c2_i32_215] : memref<4x!tpu.dma_semaphore, #tpu.memory_space<semaphore_mem>> -> memref<1x!tpu.dma_semaphore, #tpu.memory_space<semaphore_mem>>
    %258 = tpu.memref_squeeze %257 : memref<1x!tpu.dma_semaphore, #tpu.memory_space<semaphore_mem>> -> memref<!tpu.dma_semaphore, #tpu.memory_space<semaphore_mem>>
    tpu.wait_dma2 semaphore(%258 : memref<!tpu.dma_semaphore, #tpu.memory_space<semaphore_mem>>) src(%255 : memref<1x32xf32, #tpu.memory_space<any>>) dst(%256 : memref<1x32xf32, #tpu.memory_space<vmem>>)
    %c3_219 = arith.constant 3 : index
    %259 = memref.load %arg2[%c3_219] : memref<8xi32, #tpu.memory_space<smem>>
    %c2_i32_220 = arith.constant 2 : i32
    %c0_i32_221 = arith.constant 0 : i32
    %260 = tpu.memref_slice %arg5[%259, %c0_i32_221] : memref<32x32xf32, #tpu.memory_space<any>> -> memref<1x32xf32, #tpu.memory_space<any>>
    %c19_i32_222 = arith.constant 19 : i32
    %c0_i32_223 = arith.constant 0 : i32
    %261 = tpu.memref_slice %arg10[%c19_i32_222, %c0_i32_223] : memref<32x32xf32, #tpu.memory_space<vmem>> -> memref<1x32xf32, #tpu.memory_space<vmem>>
    %262 = tpu.memref_slice %arg11[%c2_i32_220] : memref<4x!tpu.dma_semaphore, #tpu.memory_space<semaphore_mem>> -> memref<1x!tpu.dma_semaphore, #tpu.memory_space<semaphore_mem>>
    %263 = tpu.memref_squeeze %262 : memref<1x!tpu.dma_semaphore, #tpu.memory_space<semaphore_mem>> -> memref<!tpu.dma_semaphore, #tpu.memory_space<semaphore_mem>>
    tpu.wait_dma2 semaphore(%263 : memref<!tpu.dma_semaphore, #tpu.memory_space<semaphore_mem>>) src(%260 : memref<1x32xf32, #tpu.memory_space<any>>) dst(%261 : memref<1x32xf32, #tpu.memory_space<vmem>>)
    %c4_224 = arith.constant 4 : index
    %264 = memref.load %arg2[%c4_224] : memref<8xi32, #tpu.memory_space<smem>>
    %c2_i32_225 = arith.constant 2 : i32
    %c0_i32_226 = arith.constant 0 : i32
    %265 = tpu.memref_slice %arg5[%264, %c0_i32_226] : memref<32x32xf32, #tpu.memory_space<any>> -> memref<1x32xf32, #tpu.memory_space<any>>
    %c20_i32_227 = arith.constant 20 : i32
    %c0_i32_228 = arith.constant 0 : i32
    %266 = tpu.memref_slice %arg10[%c20_i32_227, %c0_i32_228] : memref<32x32xf32, #tpu.memory_space<vmem>> -> memref<1x32xf32, #tpu.memory_space<vmem>>
    %267 = tpu.memref_slice %arg11[%c2_i32_225] : memref<4x!tpu.dma_semaphore, #tpu.memory_space<semaphore_mem>> -> memref<1x!tpu.dma_semaphore, #tpu.memory_space<semaphore_mem>>
    %268 = tpu.memref_squeeze %267 : memref<1x!tpu.dma_semaphore, #tpu.memory_space<semaphore_mem>> -> memref<!tpu.dma_semaphore, #tpu.memory_space<semaphore_mem>>
    tpu.wait_dma2 semaphore(%268 : memref<!tpu.dma_semaphore, #tpu.memory_space<semaphore_mem>>) src(%265 : memref<1x32xf32, #tpu.memory_space<any>>) dst(%266 : memref<1x32xf32, #tpu.memory_space<vmem>>)
    %c5_229 = arith.constant 5 : index
    %269 = memref.load %arg2[%c5_229] : memref<8xi32, #tpu.memory_space<smem>>
    %c2_i32_230 = arith.constant 2 : i32
    %c0_i32_231 = arith.constant 0 : i32
    %270 = tpu.memref_slice %arg5[%269, %c0_i32_231] : memref<32x32xf32, #tpu.memory_space<any>> -> memref<1x32xf32, #tpu.memory_space<any>>
    %c21_i32_232 = arith.constant 21 : i32
    %c0_i32_233 = arith.constant 0 : i32
    %271 = tpu.memref_slice %arg10[%c21_i32_232, %c0_i32_233] : memref<32x32xf32, #tpu.memory_space<vmem>> -> memref<1x32xf32, #tpu.memory_space<vmem>>
    %272 = tpu.memref_slice %arg11[%c2_i32_230] : memref<4x!tpu.dma_semaphore, #tpu.memory_space<semaphore_mem>> -> memref<1x!tpu.dma_semaphore, #tpu.memory_space<semaphore_mem>>
    %273 = tpu.memref_squeeze %272 : memref<1x!tpu.dma_semaphore, #tpu.memory_space<semaphore_mem>> -> memref<!tpu.dma_semaphore, #tpu.memory_space<semaphore_mem>>
    tpu.wait_dma2 semaphore(%273 : memref<!tpu.dma_semaphore, #tpu.memory_space<semaphore_mem>>) src(%270 : memref<1x32xf32, #tpu.memory_space<any>>) dst(%271 : memref<1x32xf32, #tpu.memory_space<vmem>>)
    %c6_234 = arith.constant 6 : index
    %274 = memref.load %arg2[%c6_234] : memref<8xi32, #tpu.memory_space<smem>>
    %c2_i32_235 = arith.constant 2 : i32
    %c0_i32_236 = arith.constant 0 : i32
    %275 = tpu.memref_slice %arg5[%274, %c0_i32_236] : memref<32x32xf32, #tpu.memory_space<any>> -> memref<1x32xf32, #tpu.memory_space<any>>
    %c22_i32_237 = arith.constant 22 : i32
    %c0_i32_238 = arith.constant 0 : i32
    %276 = tpu.memref_slice %arg10[%c22_i32_237, %c0_i32_238] : memref<32x32xf32, #tpu.memory_space<vmem>> -> memref<1x32xf32, #tpu.memory_space<vmem>>
    %277 = tpu.memref_slice %arg11[%c2_i32_235] : memref<4x!tpu.dma_semaphore, #tpu.memory_space<semaphore_mem>> -> memref<1x!tpu.dma_semaphore, #tpu.memory_space<semaphore_mem>>
    %278 = tpu.memref_squeeze %277 : memref<1x!tpu.dma_semaphore, #tpu.memory_space<semaphore_mem>> -> memref<!tpu.dma_semaphore, #tpu.memory_space<semaphore_mem>>
    tpu.wait_dma2 semaphore(%278 : memref<!tpu.dma_semaphore, #tpu.memory_space<semaphore_mem>>) src(%275 : memref<1x32xf32, #tpu.memory_space<any>>) dst(%276 : memref<1x32xf32, #tpu.memory_space<vmem>>)
    %c7_239 = arith.constant 7 : index
    %279 = memref.load %arg2[%c7_239] : memref<8xi32, #tpu.memory_space<smem>>
    %c2_i32_240 = arith.constant 2 : i32
    %c0_i32_241 = arith.constant 0 : i32
    %280 = tpu.memref_slice %arg5[%279, %c0_i32_241] : memref<32x32xf32, #tpu.memory_space<any>> -> memref<1x32xf32, #tpu.memory_space<any>>
    %c23_i32_242 = arith.constant 23 : i32
    %c0_i32_243 = arith.constant 0 : i32
    %281 = tpu.memref_slice %arg10[%c23_i32_242, %c0_i32_243] : memref<32x32xf32, #tpu.memory_space<vmem>> -> memref<1x32xf32, #tpu.memory_space<vmem>>
    %282 = tpu.memref_slice %arg11[%c2_i32_240] : memref<4x!tpu.dma_semaphore, #tpu.memory_space<semaphore_mem>> -> memref<1x!tpu.dma_semaphore, #tpu.memory_space<semaphore_mem>>
    %283 = tpu.memref_squeeze %282 : memref<1x!tpu.dma_semaphore, #tpu.memory_space<semaphore_mem>> -> memref<!tpu.dma_semaphore, #tpu.memory_space<semaphore_mem>>
    tpu.wait_dma2 semaphore(%283 : memref<!tpu.dma_semaphore, #tpu.memory_space<semaphore_mem>>) src(%280 : memref<1x32xf32, #tpu.memory_space<any>>) dst(%281 : memref<1x32xf32, #tpu.memory_space<vmem>>)
    %c0_244 = arith.constant 0 : index
    %284 = memref.load %arg2[%c0_244] : memref<8xi32, #tpu.memory_space<smem>>
    %c3_i32_245 = arith.constant 3 : i32
    %c0_i32_246 = arith.constant 0 : i32
    %285 = tpu.memref_slice %arg6[%284, %c0_i32_246] : memref<32x32xf32, #tpu.memory_space<any>> -> memref<1x32xf32, #tpu.memory_space<any>>
    %c24_i32_247 = arith.constant 24 : i32
    %c0_i32_248 = arith.constant 0 : i32
    %286 = tpu.memref_slice %arg10[%c24_i32_247, %c0_i32_248] : memref<32x32xf32, #tpu.memory_space<vmem>> -> memref<1x32xf32, #tpu.memory_space<vmem>>
    %287 = tpu.memref_slice %arg11[%c3_i32_245] : memref<4x!tpu.dma_semaphore, #tpu.memory_space<semaphore_mem>> -> memref<1x!tpu.dma_semaphore, #tpu.memory_space<semaphore_mem>>
    %288 = tpu.memref_squeeze %287 : memref<1x!tpu.dma_semaphore, #tpu.memory_space<semaphore_mem>> -> memref<!tpu.dma_semaphore, #tpu.memory_space<semaphore_mem>>
    tpu.wait_dma2 semaphore(%288 : memref<!tpu.dma_semaphore, #tpu.memory_space<semaphore_mem>>) src(%285 : memref<1x32xf32, #tpu.memory_space<any>>) dst(%286 : memref<1x32xf32, #tpu.memory_space<vmem>>)
    %c1_249 = arith.constant 1 : index
    %289 = memref.load %arg2[%c1_249] : memref<8xi32, #tpu.memory_space<smem>>
    %c3_i32_250 = arith.constant 3 : i32
    %c0_i32_251 = arith.constant 0 : i32
    %290 = tpu.memref_slice %arg6[%289, %c0_i32_251] : memref<32x32xf32, #tpu.memory_space<any>> -> memref<1x32xf32, #tpu.memory_space<any>>
    %c25_i32_252 = arith.constant 25 : i32
    %c0_i32_253 = arith.constant 0 : i32
    %291 = tpu.memref_slice %arg10[%c25_i32_252, %c0_i32_253] : memref<32x32xf32, #tpu.memory_space<vmem>> -> memref<1x32xf32, #tpu.memory_space<vmem>>
    %292 = tpu.memref_slice %arg11[%c3_i32_250] : memref<4x!tpu.dma_semaphore, #tpu.memory_space<semaphore_mem>> -> memref<1x!tpu.dma_semaphore, #tpu.memory_space<semaphore_mem>>
    %293 = tpu.memref_squeeze %292 : memref<1x!tpu.dma_semaphore, #tpu.memory_space<semaphore_mem>> -> memref<!tpu.dma_semaphore, #tpu.memory_space<semaphore_mem>>
    tpu.wait_dma2 semaphore(%293 : memref<!tpu.dma_semaphore, #tpu.memory_space<semaphore_mem>>) src(%290 : memref<1x32xf32, #tpu.memory_space<any>>) dst(%291 : memref<1x32xf32, #tpu.memory_space<vmem>>)
    %c2_254 = arith.constant 2 : index
    %294 = memref.load %arg2[%c2_254] : memref<8xi32, #tpu.memory_space<smem>>
    %c3_i32_255 = arith.constant 3 : i32
    %c0_i32_256 = arith.constant 0 : i32
    %295 = tpu.memref_slice %arg6[%294, %c0_i32_256] : memref<32x32xf32, #tpu.memory_space<any>> -> memref<1x32xf32, #tpu.memory_space<any>>
    %c26_i32_257 = arith.constant 26 : i32
    %c0_i32_258 = arith.constant 0 : i32
    %296 = tpu.memref_slice %arg10[%c26_i32_257, %c0_i32_258] : memref<32x32xf32, #tpu.memory_space<vmem>> -> memref<1x32xf32, #tpu.memory_space<vmem>>
    %297 = tpu.memref_slice %arg11[%c3_i32_255] : memref<4x!tpu.dma_semaphore, #tpu.memory_space<semaphore_mem>> -> memref<1x!tpu.dma_semaphore, #tpu.memory_space<semaphore_mem>>
    %298 = tpu.memref_squeeze %297 : memref<1x!tpu.dma_semaphore, #tpu.memory_space<semaphore_mem>> -> memref<!tpu.dma_semaphore, #tpu.memory_space<semaphore_mem>>
    tpu.wait_dma2 semaphore(%298 : memref<!tpu.dma_semaphore, #tpu.memory_space<semaphore_mem>>) src(%295 : memref<1x32xf32, #tpu.memory_space<any>>) dst(%296 : memref<1x32xf32, #tpu.memory_space<vmem>>)
    %c3_259 = arith.constant 3 : index
    %299 = memref.load %arg2[%c3_259] : memref<8xi32, #tpu.memory_space<smem>>
    %c3_i32_260 = arith.constant 3 : i32
    %c0_i32_261 = arith.constant 0 : i32
    %300 = tpu.memref_slice %arg6[%299, %c0_i32_261] : memref<32x32xf32, #tpu.memory_space<any>> -> memref<1x32xf32, #tpu.memory_space<any>>
    %c27_i32_262 = arith.constant 27 : i32
    %c0_i32_263 = arith.constant 0 : i32
    %301 = tpu.memref_slice %arg10[%c27_i32_262, %c0_i32_263] : memref<32x32xf32, #tpu.memory_space<vmem>> -> memref<1x32xf32, #tpu.memory_space<vmem>>
    %302 = tpu.memref_slice %arg11[%c3_i32_260] : memref<4x!tpu.dma_semaphore, #tpu.memory_space<semaphore_mem>> -> memref<1x!tpu.dma_semaphore, #tpu.memory_space<semaphore_mem>>
    %303 = tpu.memref_squeeze %302 : memref<1x!tpu.dma_semaphore, #tpu.memory_space<semaphore_mem>> -> memref<!tpu.dma_semaphore, #tpu.memory_space<semaphore_mem>>
    tpu.wait_dma2 semaphore(%303 : memref<!tpu.dma_semaphore, #tpu.memory_space<semaphore_mem>>) src(%300 : memref<1x32xf32, #tpu.memory_space<any>>) dst(%301 : memref<1x32xf32, #tpu.memory_space<vmem>>)
    %c4_264 = arith.constant 4 : index
    %304 = memref.load %arg2[%c4_264] : memref<8xi32, #tpu.memory_space<smem>>
    %c3_i32_265 = arith.constant 3 : i32
    %c0_i32_266 = arith.constant 0 : i32
    %305 = tpu.memref_slice %arg6[%304, %c0_i32_266] : memref<32x32xf32, #tpu.memory_space<any>> -> memref<1x32xf32, #tpu.memory_space<any>>
    %c28_i32_267 = arith.constant 28 : i32
    %c0_i32_268 = arith.constant 0 : i32
    %306 = tpu.memref_slice %arg10[%c28_i32_267, %c0_i32_268] : memref<32x32xf32, #tpu.memory_space<vmem>> -> memref<1x32xf32, #tpu.memory_space<vmem>>
    %307 = tpu.memref_slice %arg11[%c3_i32_265] : memref<4x!tpu.dma_semaphore, #tpu.memory_space<semaphore_mem>> -> memref<1x!tpu.dma_semaphore, #tpu.memory_space<semaphore_mem>>
    %308 = tpu.memref_squeeze %307 : memref<1x!tpu.dma_semaphore, #tpu.memory_space<semaphore_mem>> -> memref<!tpu.dma_semaphore, #tpu.memory_space<semaphore_mem>>
    tpu.wait_dma2 semaphore(%308 : memref<!tpu.dma_semaphore, #tpu.memory_space<semaphore_mem>>) src(%305 : memref<1x32xf32, #tpu.memory_space<any>>) dst(%306 : memref<1x32xf32, #tpu.memory_space<vmem>>)
    %c5_269 = arith.constant 5 : index
    %309 = memref.load %arg2[%c5_269] : memref<8xi32, #tpu.memory_space<smem>>
    %c3_i32_270 = arith.constant 3 : i32
    %c0_i32_271 = arith.constant 0 : i32
    %310 = tpu.memref_slice %arg6[%309, %c0_i32_271] : memref<32x32xf32, #tpu.memory_space<any>> -> memref<1x32xf32, #tpu.memory_space<any>>
    %c29_i32_272 = arith.constant 29 : i32
    %c0_i32_273 = arith.constant 0 : i32
    %311 = tpu.memref_slice %arg10[%c29_i32_272, %c0_i32_273] : memref<32x32xf32, #tpu.memory_space<vmem>> -> memref<1x32xf32, #tpu.memory_space<vmem>>
    %312 = tpu.memref_slice %arg11[%c3_i32_270] : memref<4x!tpu.dma_semaphore, #tpu.memory_space<semaphore_mem>> -> memref<1x!tpu.dma_semaphore, #tpu.memory_space<semaphore_mem>>
    %313 = tpu.memref_squeeze %312 : memref<1x!tpu.dma_semaphore, #tpu.memory_space<semaphore_mem>> -> memref<!tpu.dma_semaphore, #tpu.memory_space<semaphore_mem>>
    tpu.wait_dma2 semaphore(%313 : memref<!tpu.dma_semaphore, #tpu.memory_space<semaphore_mem>>) src(%310 : memref<1x32xf32, #tpu.memory_space<any>>) dst(%311 : memref<1x32xf32, #tpu.memory_space<vmem>>)
    %c6_274 = arith.constant 6 : index
    %314 = memref.load %arg2[%c6_274] : memref<8xi32, #tpu.memory_space<smem>>
    %c3_i32_275 = arith.constant 3 : i32
    %c0_i32_276 = arith.constant 0 : i32
    %315 = tpu.memref_slice %arg6[%314, %c0_i32_276] : memref<32x32xf32, #tpu.memory_space<any>> -> memref<1x32xf32, #tpu.memory_space<any>>
    %c30_i32_277 = arith.constant 30 : i32
    %c0_i32_278 = arith.constant 0 : i32
    %316 = tpu.memref_slice %arg10[%c30_i32_277, %c0_i32_278] : memref<32x32xf32, #tpu.memory_space<vmem>> -> memref<1x32xf32, #tpu.memory_space<vmem>>
    %317 = tpu.memref_slice %arg11[%c3_i32_275] : memref<4x!tpu.dma_semaphore, #tpu.memory_space<semaphore_mem>> -> memref<1x!tpu.dma_semaphore, #tpu.memory_space<semaphore_mem>>
    %318 = tpu.memref_squeeze %317 : memref<1x!tpu.dma_semaphore, #tpu.memory_space<semaphore_mem>> -> memref<!tpu.dma_semaphore, #tpu.memory_space<semaphore_mem>>
    tpu.wait_dma2 semaphore(%318 : memref<!tpu.dma_semaphore, #tpu.memory_space<semaphore_mem>>) src(%315 : memref<1x32xf32, #tpu.memory_space<any>>) dst(%316 : memref<1x32xf32, #tpu.memory_space<vmem>>)
    %c7_279 = arith.constant 7 : index
    %319 = memref.load %arg2[%c7_279] : memref<8xi32, #tpu.memory_space<smem>>
    %c3_i32_280 = arith.constant 3 : i32
    %c0_i32_281 = arith.constant 0 : i32
    %320 = tpu.memref_slice %arg6[%319, %c0_i32_281] : memref<32x32xf32, #tpu.memory_space<any>> -> memref<1x32xf32, #tpu.memory_space<any>>
    %c31_i32_282 = arith.constant 31 : i32
    %c0_i32_283 = arith.constant 0 : i32
    %321 = tpu.memref_slice %arg10[%c31_i32_282, %c0_i32_283] : memref<32x32xf32, #tpu.memory_space<vmem>> -> memref<1x32xf32, #tpu.memory_space<vmem>>
    %322 = tpu.memref_slice %arg11[%c3_i32_280] : memref<4x!tpu.dma_semaphore, #tpu.memory_space<semaphore_mem>> -> memref<1x!tpu.dma_semaphore, #tpu.memory_space<semaphore_mem>>
    %323 = tpu.memref_squeeze %322 : memref<1x!tpu.dma_semaphore, #tpu.memory_space<semaphore_mem>> -> memref<!tpu.dma_semaphore, #tpu.memory_space<semaphore_mem>>
    tpu.wait_dma2 semaphore(%323 : memref<!tpu.dma_semaphore, #tpu.memory_space<semaphore_mem>>) src(%320 : memref<1x32xf32, #tpu.memory_space<any>>) dst(%321 : memref<1x32xf32, #tpu.memory_space<vmem>>)
    %c0_284 = arith.constant 0 : index
    %c0_285 = arith.constant 0 : index
    %324 = vector.load %arg10[%c0_284, %c0_285] : memref<32x32xf32, #tpu.memory_space<vmem>>, vector<32x32xf32>
    %325 = arith.mulf %324, %324 : vector<32x32xf32>
    %cst_286 = arith.constant dense<0.000000e+00> : vector<32xf32>
    %326 = vector.multi_reduction <add>, %325, %cst_286 [1] : vector<32x32xf32> to vector<32xf32>
    %327 = vector.shape_cast %326 : vector<32xf32> to vector<32x1xf32>
    %cst_287 = arith.constant 9.99999996E-13 : f32
    %328 = vector.broadcast %cst_287 : f32 to vector<32x1xf32>
    %329 = arith.addf %327, %328 : vector<32x1xf32>
    %330 = math.rsqrt %329 : vector<32x1xf32>
    %331 = vector.broadcast %330 : vector<32x1xf32> to vector<32x32xf32>
    %332 = arith.mulf %324, %331 : vector<32x32xf32>
    %333 = arith.truncf %332 : vector<32x32xf32> to vector<32x32xbf16>
    %cst_288 = arith.constant dense<0.000000e+00> : vector<32x16xf32>
    %334 = tpu.matmul %333, %163, %cst_288 {dimension_numbers = #tpu.dot_dimension_numbers<[1], [0], [0], [1], [0, 0, 1, 1], [], []>} : vector<32x32xbf16>, vector<32x16xbf16>, vector<32x16xf32> -> vector<32x16xf32>
    %335 = vector.shape_cast %334 : vector<32x16xf32> to vector<4x8x16xf32>
    %cst_289 = arith.constant dense<0xFF800000> : vector<4x8xf32>
    %336 = vector.multi_reduction <maximumf>, %335, %cst_289 [2] : vector<4x8x16xf32> to vector<4x8xf32>
    %337 = vector.shape_cast %336 : vector<4x8xf32> to vector<4x8x1xf32>
    %cst_290 = arith.constant dense<0xFF800000> : vector<4x1xf32>
    %338 = vector.multi_reduction <maximumf>, %337, %cst_290 [1] : vector<4x8x1xf32> to vector<4x1xf32>
    %339 = vector.shape_cast %338 : vector<4x1xf32> to vector<4x1x1xf32>
    %340 = vector.broadcast %339 : vector<4x1x1xf32> to vector<4x8x16xf32>
    %341 = arith.subf %335, %340 : vector<4x8x16xf32>
    %cst_291 = arith.constant 2.000000e+01 : f32
    %342 = vector.broadcast %cst_291 : f32 to vector<4x8x16xf32>
    %343 = arith.mulf %341, %342 : vector<4x8x16xf32>
    %344 = math.exp %343 : vector<4x8x16xf32>
    %cst_292 = arith.constant dense<0.000000e+00> : vector<4x8xf32>
    %345 = vector.multi_reduction <add>, %344, %cst_292 [2] : vector<4x8x16xf32> to vector<4x8xf32>
    %346 = vector.shape_cast %345 : vector<4x8xf32> to vector<4x8x1xf32>
    %cst_293 = arith.constant dense<0.000000e+00> : vector<4x1xf32>
    %347 = vector.multi_reduction <add>, %346, %cst_293 [1] : vector<4x8x1xf32> to vector<4x1xf32>
    %348 = vector.shape_cast %347 : vector<4x1xf32> to vector<4x1x1xf32>
    %349 = tpu.reciprocal %348 {approx = true} : vector<4x1x1xf32> -> vector<4x1x1xf32>
    %350 = vector.broadcast %349 : vector<4x1x1xf32> to vector<4x8x16xf32>
    %351 = arith.mulf %344, %350 : vector<4x8x16xf32>
    %cst_294 = arith.constant dense<0.000000e+00> : vector<4x16xf32>
    %352 = vector.multi_reduction <add>, %351, %cst_294 [1] : vector<4x8x16xf32> to vector<4x16xf32>
    %353 = vector.shape_cast %352 : vector<4x16xf32> to vector<4x1x16xf32>
    %354 = tpu.reciprocal %353 {approx = true} : vector<4x1x16xf32> -> vector<4x1x16xf32>
    %cst_295 = arith.constant 6.250000e-02 : f32
    %355 = vector.broadcast %cst_295 : f32 to vector<4x1x16xf32>
    %356 = arith.mulf %354, %355 : vector<4x1x16xf32>
    %357 = vector.broadcast %356 : vector<4x1x16xf32> to vector<4x8x16xf32>
    %358 = arith.mulf %351, %357 : vector<4x8x16xf32>
    %cst_296 = arith.constant dense<0.000000e+00> : vector<4x8xf32>
    %359 = vector.multi_reduction <add>, %358, %cst_296 [2] : vector<4x8x16xf32> to vector<4x8xf32>
    %360 = vector.shape_cast %359 : vector<4x8xf32> to vector<4x8x1xf32>
    %361 = tpu.reciprocal %360 {approx = true} : vector<4x8x1xf32> -> vector<4x8x1xf32>
    %cst_297 = arith.constant 1.250000e-01 : f32
    %362 = vector.broadcast %cst_297 : f32 to vector<4x8x1xf32>
    %363 = arith.mulf %361, %362 : vector<4x8x1xf32>
    %364 = vector.broadcast %363 : vector<4x8x1xf32> to vector<4x8x16xf32>
    %365 = arith.mulf %358, %364 : vector<4x8x16xf32>
    %cst_298 = arith.constant dense<0.000000e+00> : vector<4x16xf32>
    %366 = vector.multi_reduction <add>, %365, %cst_298 [1] : vector<4x8x16xf32> to vector<4x16xf32>
    %367 = vector.shape_cast %366 : vector<4x16xf32> to vector<4x1x16xf32>
    %368 = tpu.reciprocal %367 {approx = true} : vector<4x1x16xf32> -> vector<4x1x16xf32>
    %cst_299 = arith.constant 6.250000e-02 : f32
    %369 = vector.broadcast %cst_299 : f32 to vector<4x1x16xf32>
    %370 = arith.mulf %368, %369 : vector<4x1x16xf32>
    %371 = vector.broadcast %370 : vector<4x1x16xf32> to vector<4x8x16xf32>
    %372 = arith.mulf %365, %371 : vector<4x8x16xf32>
    %cst_300 = arith.constant dense<0.000000e+00> : vector<4x8xf32>
    %373 = vector.multi_reduction <add>, %372, %cst_300 [2] : vector<4x8x16xf32> to vector<4x8xf32>
    %374 = vector.shape_cast %373 : vector<4x8xf32> to vector<4x8x1xf32>
    %375 = tpu.reciprocal %374 {approx = true} : vector<4x8x1xf32> -> vector<4x8x1xf32>
    %cst_301 = arith.constant 1.250000e-01 : f32
    %376 = vector.broadcast %cst_301 : f32 to vector<4x8x1xf32>
    %377 = arith.mulf %375, %376 : vector<4x8x1xf32>
    %378 = vector.broadcast %377 : vector<4x8x1xf32> to vector<4x8x16xf32>
    %379 = arith.mulf %372, %378 : vector<4x8x16xf32>
    %cst_302 = arith.constant dense<0.000000e+00> : vector<4x16xf32>
    %380 = vector.multi_reduction <add>, %379, %cst_302 [1] : vector<4x8x16xf32> to vector<4x16xf32>
    %381 = vector.shape_cast %380 : vector<4x16xf32> to vector<4x1x16xf32>
    %382 = tpu.reciprocal %381 {approx = true} : vector<4x1x16xf32> -> vector<4x1x16xf32>
    %cst_303 = arith.constant 6.250000e-02 : f32
    %383 = vector.broadcast %cst_303 : f32 to vector<4x1x16xf32>
    %384 = arith.mulf %382, %383 : vector<4x1x16xf32>
    %385 = vector.broadcast %384 : vector<4x1x16xf32> to vector<4x8x16xf32>
    %386 = arith.mulf %379, %385 : vector<4x8x16xf32>
    %cst_304 = arith.constant dense<0.000000e+00> : vector<4x8xf32>
    %387 = vector.multi_reduction <add>, %386, %cst_304 [2] : vector<4x8x16xf32> to vector<4x8xf32>
    %388 = vector.shape_cast %387 : vector<4x8xf32> to vector<4x8x1xf32>
    %389 = tpu.reciprocal %388 {approx = true} : vector<4x8x1xf32> -> vector<4x8x1xf32>
    %cst_305 = arith.constant 1.250000e-01 : f32
    %390 = vector.broadcast %cst_305 : f32 to vector<4x8x1xf32>
    %391 = arith.mulf %389, %390 : vector<4x8x1xf32>
    %392 = vector.broadcast %391 : vector<4x8x1xf32> to vector<4x8x16xf32>
    %393 = arith.mulf %386, %392 : vector<4x8x16xf32>
    %cst_306 = arith.constant 8.000000e+00 : f32
    %394 = vector.broadcast %cst_306 : f32 to vector<4x8x16xf32>
    %395 = arith.mulf %393, %394 : vector<4x8x16xf32>
    %396 = vector.broadcast %161 : f32 to vector<4x8x16xf32>
    %397 = arith.mulf %335, %396 : vector<4x8x16xf32>
    %cst_307 = arith.constant dense<0xFF800000> : vector<4x8xf32>
    %398 = vector.multi_reduction <maximumf>, %397, %cst_307 [2] : vector<4x8x16xf32> to vector<4x8xf32>
    %399 = vector.shape_cast %398 : vector<4x8xf32> to vector<4x8x1xf32>
    %400 = vector.broadcast %399 : vector<4x8x1xf32> to vector<4x8x16xf32>
    %401 = arith.subf %397, %400 : vector<4x8x16xf32>
    %402 = math.exp %401 : vector<4x8x16xf32>
    %cst_308 = arith.constant dense<0.000000e+00> : vector<4x8xf32>
    %403 = vector.multi_reduction <add>, %402, %cst_308 [2] : vector<4x8x16xf32> to vector<4x8xf32>
    %404 = vector.shape_cast %403 : vector<4x8xf32> to vector<4x8x1xf32>
    %405 = math.log %404 : vector<4x8x1xf32>
    %406 = vector.broadcast %405 : vector<4x8x1xf32> to vector<4x8x16xf32>
    %407 = arith.subf %401, %406 : vector<4x8x16xf32>
    %408 = vector.extract_strided_slice %395 {offsets = [0, 0, 0], sizes = [1, 8, 16], strides = [1, 1, 1]} : vector<4x8x16xf32> to vector<1x8x16xf32>
    %409 = vector.shape_cast %408 : vector<1x8x16xf32> to vector<8x16xf32>
    %410 = vector.extract_strided_slice %407 {offsets = [1, 0, 0], sizes = [1, 8, 16], strides = [1, 1, 1]} : vector<4x8x16xf32> to vector<1x8x16xf32>
    %411 = vector.shape_cast %410 : vector<1x8x16xf32> to vector<8x16xf32>
    %412 = arith.mulf %409, %411 : vector<8x16xf32>
    %413 = vector.shape_cast %412 : vector<8x16xf32> to vector<1x8x16xf32>
    %cst_309 = arith.constant dense<0.000000e+00> : vector<1xf32>
    %414 = vector.multi_reduction <add>, %413, %cst_309 [1, 2] : vector<1x8x16xf32> to vector<1xf32>
    %415 = vector.shape_cast %414 : vector<1xf32> to vector<1x1x1xf32>
    %416 = vector.extract %415[0, 0, 0] : f32 from vector<1x1x1xf32>
    %417 = vector.extract_strided_slice %395 {offsets = [1, 0, 0], sizes = [1, 8, 16], strides = [1, 1, 1]} : vector<4x8x16xf32> to vector<1x8x16xf32>
    %418 = vector.shape_cast %417 : vector<1x8x16xf32> to vector<8x16xf32>
    %419 = vector.extract_strided_slice %407 {offsets = [0, 0, 0], sizes = [1, 8, 16], strides = [1, 1, 1]} : vector<4x8x16xf32> to vector<1x8x16xf32>
    %420 = vector.shape_cast %419 : vector<1x8x16xf32> to vector<8x16xf32>
    %421 = arith.mulf %418, %420 : vector<8x16xf32>
    %422 = vector.shape_cast %421 : vector<8x16xf32> to vector<1x8x16xf32>
    %cst_310 = arith.constant dense<0.000000e+00> : vector<1xf32>
    %423 = vector.multi_reduction <add>, %422, %cst_310 [1, 2] : vector<1x8x16xf32> to vector<1xf32>
    %424 = vector.shape_cast %423 : vector<1xf32> to vector<1x1x1xf32>
    %425 = vector.extract %424[0, 0, 0] : f32 from vector<1x1x1xf32>
    %426 = arith.addf %416, %425 : f32
    %cst_311 = arith.constant 0.000000e+00 : f32
    %427 = arith.subf %cst_311, %426 : f32
    %cst_312 = arith.constant 1.250000e-01 : f32
    %428 = arith.mulf %427, %cst_312 : f32
    %429 = vector.extract_strided_slice %395 {offsets = [1, 0, 0], sizes = [1, 8, 16], strides = [1, 1, 1]} : vector<4x8x16xf32> to vector<1x8x16xf32>
    %430 = vector.shape_cast %429 : vector<1x8x16xf32> to vector<8x16xf32>
    %431 = vector.extract_strided_slice %395 {offsets = [2, 0, 0], sizes = [1, 8, 16], strides = [1, 1, 1]} : vector<4x8x16xf32> to vector<1x8x16xf32>
    %432 = vector.shape_cast %431 : vector<1x8x16xf32> to vector<8x16xf32>
    %433 = arith.addf %430, %432 : vector<8x16xf32>
    %434 = vector.extract_strided_slice %395 {offsets = [3, 0, 0], sizes = [1, 8, 16], strides = [1, 1, 1]} : vector<4x8x16xf32> to vector<1x8x16xf32>
    %435 = vector.shape_cast %434 : vector<1x8x16xf32> to vector<8x16xf32>
    %436 = arith.addf %433, %435 : vector<8x16xf32>
    %437 = vector.extract_strided_slice %407 {offsets = [1, 0, 0], sizes = [1, 8, 16], strides = [1, 1, 1]} : vector<4x8x16xf32> to vector<1x8x16xf32>
    %438 = vector.shape_cast %437 : vector<1x8x16xf32> to vector<8x16xf32>
    %439 = vector.extract_strided_slice %407 {offsets = [2, 0, 0], sizes = [1, 8, 16], strides = [1, 1, 1]} : vector<4x8x16xf32> to vector<1x8x16xf32>
    %440 = vector.shape_cast %439 : vector<1x8x16xf32> to vector<8x16xf32>
    %441 = arith.addf %438, %440 : vector<8x16xf32>
    %442 = vector.extract_strided_slice %407 {offsets = [3, 0, 0], sizes = [1, 8, 16], strides = [1, 1, 1]} : vector<4x8x16xf32> to vector<1x8x16xf32>
    %443 = vector.shape_cast %442 : vector<1x8x16xf32> to vector<8x16xf32>
    %444 = arith.addf %441, %443 : vector<8x16xf32>
    %445 = arith.mulf %436, %444 : vector<8x16xf32>
    %446 = vector.shape_cast %445 : vector<8x16xf32> to vector<1x8x16xf32>
    %cst_313 = arith.constant dense<0.000000e+00> : vector<1xf32>
    %447 = vector.multi_reduction <add>, %446, %cst_313 [1, 2] : vector<1x8x16xf32> to vector<1xf32>
    %448 = vector.shape_cast %447 : vector<1xf32> to vector<1x1x1xf32>
    %449 = vector.extract %448[0, 0, 0] : f32 from vector<1x1x1xf32>
    %450 = vector.extract_strided_slice %395 {offsets = [1, 0, 0], sizes = [3, 8, 16], strides = [1, 1, 1]} : vector<4x8x16xf32> to vector<3x8x16xf32>
    %451 = vector.extract_strided_slice %407 {offsets = [1, 0, 0], sizes = [3, 8, 16], strides = [1, 1, 1]} : vector<4x8x16xf32> to vector<3x8x16xf32>
    %452 = arith.mulf %450, %451 : vector<3x8x16xf32>
    %453 = vector.shape_cast %452 : vector<3x8x16xf32> to vector<1x3x8x16xf32>
    %cst_314 = arith.constant dense<0.000000e+00> : vector<1xf32>
    %454 = vector.multi_reduction <add>, %453, %cst_314 [1, 2, 3] : vector<1x3x8x16xf32> to vector<1xf32>
    %455 = vector.shape_cast %454 : vector<1xf32> to vector<1x1x1x1xf32>
    %456 = vector.extract %455[0, 0, 0, 0] : f32 from vector<1x1x1x1xf32>
    %457 = arith.subf %449, %456 : f32
    %cst_315 = arith.constant 0.000000e+00 : f32
    %458 = arith.subf %cst_315, %457 : f32
    %cst_316 = arith.constant 1.250000e-01 : f32
    %459 = arith.mulf %458, %cst_316 : f32
    %cst_317 = arith.constant 5.000000e-01 : f32
    %460 = arith.mulf %428, %cst_317 : f32
    %cst_318 = arith.constant 0.166666672 : f32
    %461 = arith.mulf %459, %cst_318 : f32
    %462 = arith.addf %460, %461 : f32
    %c0_319 = arith.constant 0 : index
    %c0_320 = arith.constant 0 : index
    %463 = memref.load %arg9[%c0_319, %c0_320] : memref<1x1xf32, #tpu.memory_space<smem>>
    memref.store %462, %arg9[%c0_319, %c0_320] : memref<1x1xf32, #tpu.memory_space<smem>>
    return
  }
  func.func @transform_4(%arg0: i32, %arg1: memref<8xi32, #tpu.memory_space<smem>>, %arg2: memref<8xi32, #tpu.memory_space<smem>>) -> (i32, i32) {
    %c0_i32 = arith.constant 0 : i32
    %c0_i32_0 = arith.constant 0 : i32
    %c0_i32_1 = arith.constant 0 : i32
    return %c0_i32, %c0_i32_0 : i32, i32
  }
  func.func @transform_5(%arg0: i32, %arg1: memref<8xi32, #tpu.memory_space<smem>>, %arg2: memref<8xi32, #tpu.memory_space<smem>>) -> (i32, i32) {
    %c0_i32 = arith.constant 0 : i32
    %c0_i32_0 = arith.constant 0 : i32
    %c0_i32_1 = arith.constant 0 : i32
    return %c0_i32, %c0_i32_0 : i32, i32
  }
  func.func @transform_6(%arg0: i32, %arg1: memref<8xi32, #tpu.memory_space<smem>>, %arg2: memref<8xi32, #tpu.memory_space<smem>>) -> (i32, i32) {
    %c0_i32 = arith.constant 0 : i32
    %c0_i32_0 = arith.constant 0 : i32
    %c0_i32_1 = arith.constant 0 : i32
    return %c0_i32, %c0_i32_0 : i32, i32
  }
}

</mosaic_0001>

<bundles_post_ra>
// kernel: cla_loss.1
= control target key start
LH: loop header
LB: loop body
LE: loop exit
PB: predicated region body
PF: predicated region fallthrough
CT: control target
= control target key end

     0   :  { %s2235_s11 = smov [#allocation5]   ;;  %s2236_s12 = smov [#allocation6]   ;;  %s2762_s0 = inlined_call_operand.vmem [shape: s32[8], index: 0, kind: input, shape index: {}]   ;;  %s2763_s2 = inlined_call_operand.vmem [shape: f32[32,32], index: 2, kind: input, shape index: {}]   ;;  %s2764_s3 = inlined_call_operand.hbm [shape: f32[32,32], index: 3, kind: input, shape index: {}]   ;;  %s2765_s4 = inlined_call_operand.hbm [shape: f32[32,32], index: 4, kind: input, shape index: {}]   ;;  %s2766_s5 = inlined_call_operand.hbm [shape: f32[32,32], index: 5, kind: input, shape index: {}]   ;;  %s2767_s6 = inlined_call_operand.vmem [shape: f32[32,16], index: 6, kind: input, shape index: {}]   ;;  %s2768_s7 = inlined_call_operand.<no memory space> [shape: f32[1,1], index: 7, kind: input, shape index: {}]   ;;  %s2769_s8 = inlined_call_operand.hbm [shape: f32[1,1], index: 8, kind: output, shape index: {}]   ;;  %s2770_s1 = inlined_call_operand.vmem [shape: s32[8], index: 1, kind: input, shape index: {}]  }
   0x1   :  { %s14_s29 = sshll.u32 %s2762_s0, 4  ;;  %s19_s10 = sshll.u32 %s2770_s1, 4  ;;  %s15_s29 = int_to_ptr.vmem [resolvable:$true] %s14_s29  ;;  %s20_s10 = int_to_ptr.vmem [resolvable:$true] %s19_s10 }
   0x2   :  { %17 = dma.vmem_to_smem %s15_s29, 16, %s2235_s11, [#allocation4] }
   0x3   :  { %22 = dma.vmem_to_smem %s20_s10, 16, %s2236_s12, [#allocation4] }
   0x4   :  { %2223 = dma.done.wait [#allocation4], 32 }
   0x5   :  { %2224 = vsyncadd [#allocation4], 4294967264 }
   0x6   :  { %26 = sfence }
   0x7   :  { %27 = vsyncpa [#allocation9], 0  ;;  %s33_s13 = sld [smem:[#allocation5]] }
   0xd   :  { %s34_s16 = scalar_lea.vmem %s2763_s2, %s33_s13 }
   0xe   :  { %v49_v0 = vld [vmem:[%s34_s16] sm:$0x1] }
   0xf   :  { %50 = vst [vmem:[#allocation2] sm:$0x1] %v49_v0 }
  0x10   :  { %68 = vsyncadd [#allocation3], 16  ;;  %s1448_s0 = sld [smem:[#allocation5 + $0x1]] }
  0x16   :  { %s70_s18 = scalar_lea.vmem %s2763_s2, %s1448_s0 }
  0x17   :  { %v86_v1 = vld [vmem:[%s70_s18] sm:$0x1] }
  0x18   :  { %87 = vst [vmem:[#allocation2 + $0x1] sm:$0x1] %v86_v1 }
  0x19   :  { %105 = vsyncadd [#allocation3], 16  ;;  %s1449_s19 = sld [smem:[#allocation5 + $0x2]] }
  0x1f   :  { %s107_s22 = scalar_lea.vmem %s2763_s2, %s1449_s19 }
  0x20   :  { %v123_v2 = vld [vmem:[%s107_s22] sm:$0x1] }
  0x21   :  { %124 = vst [vmem:[#allocation2 + $0x2] sm:$0x1] %v123_v2 }
  0x22   :  { %142 = vsyncadd [#allocation3], 16  ;;  %s1450_s23 = sld [smem:[#allocation5 + $0x3]] }
  0x28   :  { %s144_s26 = scalar_lea.vmem %s2763_s2, %s1450_s23 }
  0x29   :  { %v160_v3 = vld [vmem:[%s144_s26] sm:$0x1] }
  0x2a   :  { %161 = vst [vmem:[#allocation2 + $0x3] sm:$0x1] %v160_v3 }
  0x2b   :  { %179 = vsyncadd [#allocation3], 16  ;;  %s1451_s27 = sld [smem:[#allocation5 + $0x4]] }
  0x31   :  { %s181_s30 = scalar_lea.vmem %s2763_s2, %s1451_s27 }
  0x32   :  { %v197_v4 = vld [vmem:[%s181_s30] sm:$0x1] }
  0x33   :  { %198 = vst [vmem:[#allocation2 + $0x4] sm:$0x1] %v197_v4 }
  0x34   :  { %216 = vsyncadd [#allocation3], 16  ;;  %s1452_s9 = sld [smem:[#allocation5 + $0x5]] }
  0x3a   :  { %s218_s12 = scalar_lea.vmem %s2763_s2, %s1452_s9 }
  0x3b   :  { %v234_v5 = vld [vmem:[%s218_s12] sm:$0x1] }
  0x3c   :  { %235 = vst [vmem:[#allocation2 + $0x5] sm:$0x1] %v234_v5 }
  0x3d   :  { %253 = vsyncadd [#allocation3], 16  ;;  %s1453_s13 = sld [smem:[#allocation5 + $0x6]] }
  0x43   :  { %s255_s16 = scalar_lea.vmem %s2763_s2, %s1453_s13 }
  0x44   :  { %v271_v6 = vld [vmem:[%s255_s16] sm:$0x1] }
  0x45   :  { %272 = vst [vmem:[#allocation2 + $0x6] sm:$0x1] %v271_v6 }
  0x46   :  { %290 = vsyncadd [#allocation3], 16  ;;  %s1454_s0 = sld [smem:[#allocation5 + $0x7]]  ;;  %v716_v8 = vstv %s2768_s7 }
  0x4c   :  { %s292_s18 = scalar_lea.vmem %s2763_s2, %s1454_s0 }
  0x4d   :  { %v308_v7 = vld [vmem:[%s292_s18] sm:$0x1] }
  0x4e   :  { %309 = vst [vmem:[#allocation2 + $0x7] sm:$0x1] %v308_v7 }
  0x4f   :  { %327 = vsyncadd [#allocation3], 16  ;;  %s2340_s21 = sld [smem:[#allocation6]]  ;;  %1521 = vrcp.f32 %v716_v8  ;;  %s2237_s22 = smov [#allocation2 + $0x8]   ;;  %v728_v11 = vand.u32 2147483648, %v716_v8 }
  0x50   :  { %s2342_s23 = sshll.u32 %s2237_s22, 4  ;;  %s2344_s24 = sld [smem:[#allocation6 + $0x1]]  ;;  %s342_s23 = int_to_ptr.vmem [resolvable:$true] %s2342_s23 }
  0x51   :  { %s2238_s2 = smov [#allocation2 + $0x9]   ;;  %s2349_s26 = sld [smem:[#allocation6 + $0x2]] }
  0x52   :  { %s2347_s25 = sshll.u32 %s2238_s2, 4  ;;  %s2239_s7 = smov [#allocation2 + $0xa]   ;;  %s358_s25 = int_to_ptr.vmem [resolvable:$true] %s2347_s25 }
  0x53   :  { %s2352_s27 = sshll.u32 %s2239_s7, 4  ;;  %s2354_s28 = sld [smem:[#allocation6 + $0x3]]  ;;  %s374_s27 = int_to_ptr.vmem [resolvable:$true] %s2352_s27 }
  0x54   :  { %s2370_s17 = scalar_lea.hbm %s2764_s3, 32 }
  0x55   :  { %s329_s9 = scalar_lea.hbm %s2764_s3, %s2340_s21  ;;  %v1522_v9 = vpop.eup %1521 }
  0x56   :  { %s339_s10 = sshll.u32 %s329_s9, 4  ;;  %s346_s13 = scalar_lea.hbm %s2764_s3, %s2344_s24  ;;  %v718_v10 = vmul.f32 %v1522_v9, %v716_v8  ;;  %s340_s10 = int_to_ptr.hbm [resolvable:$true] %s339_s10 }
  0x57   :  { %s2365_s14 = sshll.u32 %s346_s13, 4  ;;  %s1635_s15 = sshra.s32 %s340_s10, 4  ;;  %s1636_s15 = int_to_ptr.hbm [resolvable:$true] %s1635_s15  ;;  %s356_s14 = int_to_ptr.hbm [resolvable:$true] %s2365_s14 }
  0x58   :  { %s1637_s16 = scalar_lea.hbm %s1636_s15, 1  ;;  %p1640_p1 = scmp.lt.s32.totalorder %s1636_s15, %s2764_s3 }
  0x59   :  { %p1638_p0 = scmp.ne.s32.totalorder %s1636_s15, %s1637_s16  ;;  %p1641_p2 = scmp.lt.s32.totalorder %s2370_s17, %s1637_s16 }
  0x5b   :  { %p1642_p3 = por %p1641_p2, %p1640_p1 }
  0x5d   :  { %p1643_p4 = pnand %p1642_p3, %p1638_p0 }
  0x5f   :  { %1646 = shalt.err (!%p1643_p4)  }
  0x60   :  { %344 = dma.hbm_to_vmem [thread:$0]  %s340_s10, 16, %s342_s23, [#allocation3 + $0x1]  ;;  %v719_v12 = vsub.f32 1.0, %v718_v10  ;;  %vm722_vm0 = vweird.f32 %v716_v8  ;;  %vm723_vm1 = vweird.f32 %v1522_v9  ;;  %v726_v13 = vand.u32 2147483647, %v716_v8 }
  0x61   :  { %s362_s2 = scalar_lea.hbm %s2764_s3, %s2349_s26  ;;  %s1659_s7 = sshra.s32 %s356_s14, 4  ;;  %s1660_s7 = int_to_ptr.hbm [resolvable:$true] %s1659_s7 }
  0x62   :  { %s1661_s29 = scalar_lea.hbm %s1660_s7, 1  ;;  %p1664_p6 = scmp.lt.s32.totalorder %s1660_s7, %s2764_s3 }
  0x63   :  { %p1662_p5 = scmp.ne.s32.totalorder %s1660_s7, %s1661_s29  ;;  %p1665_p7 = scmp.lt.s32.totalorder %s2370_s17, %s1661_s29 }
  0x65   :  { %p1666_p8 = por %p1665_p7, %p1664_p6 }
  0x67   :  { %p1667_p9 = pnand %p1666_p8, %p1662_p5 }
  0x69   :  { %1670 = shalt.err (!%p1667_p9)  }
  0x6a   :  { %360 = dma.hbm_to_vmem [thread:$0]  %s356_s14, 16, %s358_s25, [#allocation3 + $0x1]  ;;  %v720_v14 = vmul.f32 %v1522_v9, %v719_v12  ;;  %vm2393_vm2 = vmor %vm722_vm0, %vm723_vm1  ;;  %v729_v16 = vor.u32 1.1754944e-38, %v728_v11  ;;  %vm2399_vm3 = vcmp.eq.f32.partialorder %v726_v13, 8.507059e+37 }
  0x6b   :  { %s371_s23 = sshll.u32 %s362_s2, 4  ;;  %s378_s12 = scalar_lea.hbm %s2764_s3, %s2354_s28  ;;  %s372_s23 = int_to_ptr.hbm [resolvable:$true] %s371_s23 }
  0x6c   :  { %s2397_s13 = sshll.u32 %s378_s12, 4  ;;  %v721_v17 = vadd.f32 %v1522_v9, %v720_v14  ;;  %s1683_s25 = sshra.s32 %s372_s23, 4  ;;  %s1684_s25 = int_to_ptr.hbm [resolvable:$true] %s1683_s25  ;;  %s388_s13 = int_to_ptr.hbm [resolvable:$true] %s2397_s13 }
  0x6d   :  { %s1685_s14 = scalar_lea.hbm %s1684_s25, 1  ;;  %p1688_p11 = scmp.lt.s32.totalorder %s1684_s25, %s2764_s3 }
  0x6e   :  { %p1686_p10 = scmp.ne.s32.totalorder %s1684_s25, %s1685_s14  ;;  %p1689_p12 = scmp.lt.s32.totalorder %s2370_s17, %s1685_s14 }
  0x70   :  { %p1690_p13 = por %p1689_p12, %p1688_p11 }
  0x72   :  { %p1691_p0 = pnand %p1690_p13, %p1686_p10 }
  0x74   :  { %1694 = shalt.err (!%p1691_p0)  }
  0x75   :  { %376 = dma.hbm_to_vmem [thread:$0]  %s372_s23, 16, %s374_s27, [#allocation3 + $0x1]  ;;  %v725_v19 = vsel %vm2393_vm2, %v1522_v9, %v721_v17 }
  0x76   :  { %s2240_s0 = smov [#allocation2 + $0xb]   ;;  %s2412_s18 = sld [smem:[#allocation6 + $0x4]]  ;;  %v730_v20 = vsel %vm2399_vm3, %v729_v16, %v725_v19 }
  0x77   :  { %s389_s1 = sshll.u32 %s2240_s0, 4  ;;  %1484 = vpush %v730_v20  ;;  %s1707_s19 = sshra.s32 %s388_s13, 4  ;;  %s390_s1 = int_to_ptr.vmem [resolvable:$true] %s389_s1  ;;  %s1708_s19 = int_to_ptr.hbm [resolvable:$true] %s1707_s19 }
  0x78   :  { %s1709_s20 = scalar_lea.hbm %s1708_s19, 1  ;;  %p1712_p2 = scmp.lt.s32.totalorder %s1708_s19, %s2764_s3 }
  0x79   :  { %p1710_p1 = scmp.ne.s32.totalorder %s1708_s19, %s1709_s20  ;;  %p1713_p3 = scmp.lt.s32.totalorder %s2370_s17, %s1709_s20 }
  0x7b   :  { %p1714_p4 = por %p1713_p3, %p1712_p2 }
  0x7d   :  { %p1715_p5 = pnand %p1714_p4, %p1710_p1 }
  0x7f   :  { %1718 = shalt.err (!%p1715_p5)  }
  0x80   :  { %392 = dma.hbm_to_vmem [thread:$0]  %s388_s13, 16, %s390_s1, [#allocation3 + $0x1] }
  0x81   :  { %s2241_s27 = smov [#allocation2 + $0xc]   ;;  %s2420_s29 = sld [smem:[#allocation6 + $0x5]] }
  0x82   :  { %s405_s7 = sshll.u32 %s2241_s27, 4  ;;  %s2242_s30 = smov [#allocation2 + $0xd]   ;;  %s406_s7 = int_to_ptr.vmem [resolvable:$true] %s405_s7 }
  0x83   :  { %s2422_s9 = sshll.u32 %s2242_s30, 4  ;;  %s2424_s23 = sld [smem:[#allocation6 + $0x6]]  ;;  %s422_s9 = int_to_ptr.vmem [resolvable:$true] %s2422_s9 }
  0x84   :  { %s394_s12 = scalar_lea.hbm %s2764_s3, %s2412_s18  ;;  %s2243_s13 = smov [#allocation2 + $0xe]  }
  0x85   :  { %s403_s25 = sshll.u32 %s394_s12, 4  ;;  %s2431_s14 = sshll.u32 %s2243_s13, 4  ;;  %s404_s25 = int_to_ptr.hbm [resolvable:$true] %s403_s25  ;;  %s438_s14 = int_to_ptr.vmem [resolvable:$true] %s2431_s14 }
  0x86   :  { %s1731_s15 = sshra.s32 %s404_s25, 4  ;;  %s1732_s15 = int_to_ptr.hbm [resolvable:$true] %s1731_s15 }
  0x87   :  { %s1733_s16 = scalar_lea.hbm %s1732_s15, 1  ;;  %p1736_p7 = scmp.lt.s32.totalorder %s1732_s15, %s2764_s3 }
  0x88   :  { %p1734_p6 = scmp.ne.s32.totalorder %s1732_s15, %s1733_s16  ;;  %p1737_p8 = scmp.lt.s32.totalorder %s2370_s17, %s1733_s16 }
  0x8a   :  { %p1738_p9 = por %p1737_p8, %p1736_p7 }
  0x8c   :  { %p1739_p10 = pnand %p1738_p9, %p1734_p6 }
  0x8e   :  { %1742 = shalt.err (!%p1739_p10)  }
  0x8f   :  { %408 = dma.hbm_to_vmem [thread:$0]  %s404_s25, 16, %s406_s7, [#allocation3 + $0x1] }
  0x90   :  { %s410_s22 = scalar_lea.hbm %s2764_s3, %s2420_s29  ;;  %s426_s10 = scalar_lea.hbm %s2764_s3, %s2424_s23 }
  0x91   :  { %s419_s2 = sshll.u32 %s410_s22, 4  ;;  %s435_s11 = sshll.u32 %s426_s10, 4  ;;  %s420_s2 = int_to_ptr.hbm [resolvable:$true] %s419_s2  ;;  %s436_s11 = int_to_ptr.hbm [resolvable:$true] %s435_s11 }
  0x92   :  { %s1755_s12 = sshra.s32 %s420_s2, 4  ;;  %s1756_s12 = int_to_ptr.hbm [resolvable:$true] %s1755_s12 }
  0x93   :  { %s1757_s13 = scalar_lea.hbm %s1756_s12, 1  ;;  %p1760_p12 = scmp.lt.s32.totalorder %s1756_s12, %s2764_s3 }
  0x94   :  { %p1758_p11 = scmp.ne.s32.totalorder %s1756_s12, %s1757_s13  ;;  %p1761_p13 = scmp.lt.s32.totalorder %s2370_s17, %s1757_s13 }
  0x96   :  { %p1762_p0 = por %p1761_p13, %p1760_p12 }
  0x98   :  { %p1763_p1 = pnand %p1762_p0, %p1758_p11 }
  0x9a   :  { %1766 = shalt.err (!%p1763_p1)  }
  0x9b   :  { %424 = dma.hbm_to_vmem [thread:$0]  %s420_s2, 16, %s422_s9, [#allocation3 + $0x1] }
  0x9c   :  { %s2452_s15 = sld [smem:[#allocation6 + $0x7]]  ;;  %s1779_s16 = sshra.s32 %s436_s11, 4  ;;  %s1780_s16 = int_to_ptr.hbm [resolvable:$true] %s1779_s16 }
  0x9d   :  { %s1781_s0 = scalar_lea.hbm %s1780_s16, 1  ;;  %p1784_p3 = scmp.lt.s32.totalorder %s1780_s16, %s2764_s3 }
  0x9e   :  { %p1782_p2 = scmp.ne.s32.totalorder %s1780_s16, %s1781_s0  ;;  %p1785_p4 = scmp.lt.s32.totalorder %s2370_s17, %s1781_s0 }
  0xa0   :  { %p1786_p5 = por %p1785_p4, %p1784_p3 }
  0xa2   :  { %p1787_p6 = pnand %p1786_p5, %p1782_p2 }
  0xa4   :  { %1790 = shalt.err (!%p1787_p6)  }
  0xa5   :  { %440 = dma.hbm_to_vmem [thread:$0]  %s436_s11, 16, %s438_s14, [#allocation3 + $0x1] }
  0xa6   :  { %s458_s9 = scalar_lea.hbm %s2765_s4, %s2340_s21  ;;  %s2244_s2 = smov [#allocation2 + $0xf]  }
  0xa7   :  { %s453_s27 = sshll.u32 %s2244_s2, 4  ;;  %s2462_s30 = sshll.u32 %s458_s9, 4  ;;  %s454_s27 = int_to_ptr.vmem [resolvable:$true] %s453_s27  ;;  %s469_s30 = int_to_ptr.hbm [resolvable:$true] %s2462_s30 }
  0xa8   :  { %s475_s13 = scalar_lea.hbm %s2765_s4, %s2344_s24  ;;  %s442_s7 = scalar_lea.hbm %s2764_s3, %s2452_s15 }
  0xa9   :  { %s2245_s25 = smov [#allocation2 + $0x10]   ;;  %s451_s0 = sshll.u32 %s442_s7, 4  ;;  %s452_s0 = int_to_ptr.hbm [resolvable:$true] %s451_s0 }
  0xaa   :  { %s470_s16 = sshll.u32 %s2245_s25, 4  ;;  %s2473_s1 = sshll.u32 %s475_s13, 4  ;;  %s471_s16 = int_to_ptr.vmem [resolvable:$true] %s470_s16  ;;  %s485_s1 = int_to_ptr.hbm [resolvable:$true] %s2473_s1 }
  0xab   :  { %s1803_s19 = sshra.s32 %s452_s0, 4  ;;  %s1804_s19 = int_to_ptr.hbm [resolvable:$true] %s1803_s19 }
  0xac   :  { %s1805_s20 = scalar_lea.hbm %s1804_s19, 1  ;;  %p1808_p8 = scmp.lt.s32.totalorder %s1804_s19, %s2764_s3 }
  0xad   :  { %p1806_p7 = scmp.ne.s32.totalorder %s1804_s19, %s1805_s20  ;;  %p1809_p9 = scmp.lt.s32.totalorder %s2370_s17, %s1805_s20 }
  0xaf   :  { %p1810_p10 = por %p1809_p9, %p1808_p8 }
  0xb1   :  { %p1811_p11 = pnand %p1810_p10, %p1806_p7 }
  0xb3   :  { %1814 = shalt.err (!%p1811_p11)  }
  0xb4   :  { %456 = dma.hbm_to_vmem [thread:$0]  %s452_s0, 16, %s454_s27, [#allocation3 + $0x1] }
  0xb5   :  { %s1827_s2 = sshra.s32 %s469_s30, 4  ;;  %s2484_s14 = scalar_lea.hbm %s2765_s4, 32  ;;  %s1828_s2 = int_to_ptr.hbm [resolvable:$true] %s1827_s2 }
  0xb6   :  { %s1829_s10 = scalar_lea.hbm %s1828_s2, 1  ;;  %p1832_p13 = scmp.lt.s32.totalorder %s1828_s2, %s2765_s4 }
  0xb7   :  { %p1830_p12 = scmp.ne.s32.totalorder %s1828_s2, %s1829_s10  ;;  %p1833_p0 = scmp.lt.s32.totalorder %s2484_s14, %s1829_s10 }
  0xb9   :  { %p1834_p1 = por %p1833_p0, %p1832_p13 }
  0xbb   :  { %p1835_p2 = pnand %p1834_p1, %p1830_p12 }
  0xbd   :  { %1838 = shalt.err (!%p1835_p2)  }
  0xbe   :  { %473 = dma.hbm_to_vmem [thread:$0]  %s469_s30, 16, %s471_s16, [#allocation3 + $0x2] }
  0xbf   :  { %s2246_s3 = smov [#allocation2 + $0x11]   ;;  %s491_s0 = scalar_lea.hbm %s2765_s4, %s2349_s26 }
  0xc0   :  { %s486_s17 = sshll.u32 %s2246_s3, 4  ;;  %s500_s19 = sshll.u32 %s491_s0, 4  ;;  %s487_s17 = int_to_ptr.vmem [resolvable:$true] %s486_s17  ;;  %s501_s19 = int_to_ptr.hbm [resolvable:$true] %s500_s19 }
  0xc1   :  { %s1851_s20 = sshra.s32 %s485_s1, 4  ;;  %s1852_s20 = int_to_ptr.hbm [resolvable:$true] %s1851_s20 }
  0xc2   :  { %s1853_s22 = scalar_lea.hbm %s1852_s20, 1  ;;  %p1856_p4 = scmp.lt.s32.totalorder %s1852_s20, %s2765_s4 }
  0xc3   :  { %p1854_p3 = scmp.ne.s32.totalorder %s1852_s20, %s1853_s22  ;;  %p1857_p5 = scmp.lt.s32.totalorder %s2484_s14, %s1853_s22 }
  0xc5   :  { %p1858_p6 = por %p1857_p5, %p1856_p4 }
  0xc7   :  { %p1859_p7 = pnand %p1858_p6, %p1854_p3 }
  0xc9   :  { %1862 = shalt.err (!%p1859_p7)  }
  0xca   :  { %489 = dma.hbm_to_vmem [thread:$0]  %s485_s1, 16, %s487_s17, [#allocation3 + $0x2] }
  0xcb   :  { %s2247_s30 = smov [#allocation2 + $0x12]   ;;  %s507_s13 = scalar_lea.hbm %s2765_s4, %s2354_s28 }
  0xcc   :  { %s502_s16 = sshll.u32 %s2247_s30, 4  ;;  %s516_s11 = sshll.u32 %s507_s13, 4  ;;  %s503_s16 = int_to_ptr.vmem [resolvable:$true] %s502_s16  ;;  %s517_s11 = int_to_ptr.hbm [resolvable:$true] %s516_s11 }
  0xcd   :  { %s1875_s7 = sshra.s32 %s501_s19, 4  ;;  %s1876_s7 = int_to_ptr.hbm [resolvable:$true] %s1875_s7 }
  0xce   :  { %s1877_s3 = scalar_lea.hbm %s1876_s7, 1  ;;  %p1880_p9 = scmp.lt.s32.totalorder %s1876_s7, %s2765_s4 }
  0xcf   :  { %p1878_p8 = scmp.ne.s32.totalorder %s1876_s7, %s1877_s3  ;;  %p1881_p10 = scmp.lt.s32.totalorder %s2484_s14, %s1877_s3 }
  0xd1   :  { %p1882_p11 = por %p1881_p10, %p1880_p9 }
  0xd3   :  { %p1883_p12 = pnand %p1882_p11, %p1878_p8 }
  0xd5   :  { %1886 = shalt.err (!%p1883_p12)  }
  0xd6   :  { %505 = dma.hbm_to_vmem [thread:$0]  %s501_s19, 16, %s503_s16, [#allocation3 + $0x2] }
  0xd7   :  { %s2248_s1 = smov [#allocation2 + $0x13]   ;;  %s523_s22 = scalar_lea.hbm %s2765_s4, %s2412_s18 }
  0xd8   :  { %s518_s17 = sshll.u32 %s2248_s1, 4  ;;  %s532_s9 = sshll.u32 %s523_s22, 4  ;;  %s519_s17 = int_to_ptr.vmem [resolvable:$true] %s518_s17  ;;  %s533_s9 = int_to_ptr.hbm [resolvable:$true] %s532_s9 }
  0xd9   :  { %s1899_s2 = sshra.s32 %s517_s11, 4  ;;  %s1900_s2 = int_to_ptr.hbm [resolvable:$true] %s1899_s2 }
  0xda   :  { %s1901_s30 = scalar_lea.hbm %s1900_s2, 1  ;;  %p1904_p0 = scmp.lt.s32.totalorder %s1900_s2, %s2765_s4 }
  0xdb   :  { %p1902_p13 = scmp.ne.s32.totalorder %s1900_s2, %s1901_s30  ;;  %p1905_p1 = scmp.lt.s32.totalorder %s2484_s14, %s1901_s30 }
  0xdd   :  { %p1906_p2 = por %p1905_p1, %p1904_p0 }
  0xdf   :  { %p1907_p3 = pnand %p1906_p2, %p1902_p13 }
  0xe1   :  { %1910 = shalt.err (!%p1907_p3)  }
  0xe2   :  { %521 = dma.hbm_to_vmem [thread:$0]  %s517_s11, 16, %s519_s17, [#allocation3 + $0x2] }
  0xe3   :  { %s2249_s19 = smov [#allocation2 + $0x14]   ;;  %s539_s3 = scalar_lea.hbm %s2765_s4, %s2420_s29 }
  0xe4   :  { %s534_s16 = sshll.u32 %s2249_s19, 4  ;;  %s548_s27 = sshll.u32 %s539_s3, 4  ;;  %s535_s16 = int_to_ptr.vmem [resolvable:$true] %s534_s16  ;;  %s549_s27 = int_to_ptr.hbm [resolvable:$true] %s548_s27 }
  0xe5   :  { %s1923_s25 = sshra.s32 %s533_s9, 4  ;;  %s1924_s25 = int_to_ptr.hbm [resolvable:$true] %s1923_s25 }
  0xe6   :  { %s1925_s1 = scalar_lea.hbm %s1924_s25, 1  ;;  %p1928_p5 = scmp.lt.s32.totalorder %s1924_s25, %s2765_s4 }
  0xe7   :  { %p1926_p4 = scmp.ne.s32.totalorder %s1924_s25, %s1925_s1  ;;  %p1929_p6 = scmp.lt.s32.totalorder %s2484_s14, %s1925_s1 }
  0xe9   :  { %p1930_p7 = por %p1929_p6, %p1928_p5 }
  0xeb   :  { %p1931_p8 = pnand %p1930_p7, %p1926_p4 }
  0xed   :  { %1934 = shalt.err (!%p1931_p8)  }
  0xee   :  { %537 = dma.hbm_to_vmem [thread:$0]  %s533_s9, 16, %s535_s16, [#allocation3 + $0x2] }
  0xef   :  { %s2250_s11 = smov [#allocation2 + $0x15]   ;;  %s555_s30 = scalar_lea.hbm %s2765_s4, %s2424_s23 }
  0xf0   :  { %s550_s17 = sshll.u32 %s2250_s11, 4  ;;  %s564_s10 = sshll.u32 %s555_s30, 4  ;;  %s551_s17 = int_to_ptr.vmem [resolvable:$true] %s550_s17  ;;  %s565_s10 = int_to_ptr.hbm [resolvable:$true] %s564_s10 }
  0xf1   :  { %s1947_s12 = sshra.s32 %s549_s27, 4  ;;  %s1948_s12 = int_to_ptr.hbm [resolvable:$true] %s1947_s12 }
  0xf2   :  { %s1949_s19 = scalar_lea.hbm %s1948_s12, 1  ;;  %p1952_p10 = scmp.lt.s32.totalorder %s1948_s12, %s2765_s4 }
  0xf3   :  { %p1950_p9 = scmp.ne.s32.totalorder %s1948_s12, %s1949_s19  ;;  %p1953_p11 = scmp.lt.s32.totalorder %s2484_s14, %s1949_s19 }
  0xf5   :  { %p1954_p12 = por %p1953_p11, %p1952_p10 }
  0xf7   :  { %p1955_p13 = pnand %p1954_p12, %p1950_p9 }
  0xf9   :  { %1958 = shalt.err (!%p1955_p13)  }
  0xfa   :  { %553 = dma.hbm_to_vmem [thread:$0]  %s549_s27, 16, %s551_s17, [#allocation3 + $0x2] }
  0xfb   :  { %s2251_s9 = smov [#allocation2 + $0x16]   ;;  %s571_s1 = scalar_lea.hbm %s2765_s4, %s2452_s15 }
  0xfc   :  { %s566_s16 = sshll.u32 %s2251_s9, 4  ;;  %s2537_s0 = sshll.u32 %s571_s1, 4  ;;  %s567_s16 = int_to_ptr.vmem [resolvable:$true] %s566_s16  ;;  %s581_s0 = int_to_ptr.hbm [resolvable:$true] %s2537_s0 }
  0xfd   :  { %s1971_s20 = sshra.s32 %s565_s10, 4  ;;  %s1972_s20 = int_to_ptr.hbm [resolvable:$true] %s1971_s20 }
  0xfe   :  { %s1973_s11 = scalar_lea.hbm %s1972_s20, 1  ;;  %p1976_p1 = scmp.lt.s32.totalorder %s1972_s20, %s2765_s4 }
  0xff   :  { %p1974_p0 = scmp.ne.s32.totalorder %s1972_s20, %s1973_s11  ;;  %p1977_p2 = scmp.lt.s32.totalorder %s2484_s14, %s1973_s11 }
 0x101   :  { %p1978_p3 = por %p1977_p2, %p1976_p1 }
 0x103   :  { %p1979_p4 = pnand %p1978_p3, %p1974_p0 }
 0x105   :  { %1982 = shalt.err (!%p1979_p4)  }
 0x106   :  { %569 = dma.hbm_to_vmem [thread:$0]  %s565_s10, 16, %s567_s16, [#allocation3 + $0x2]  ;;  %v732_v21 = vld [vmem:[%s2767_s6] sm:$0xff]  ;;  %v733_v22 = vld [vmem:[%s2767_s6 + $0x8] sm:$0xff]  ;;  %v734_v23 = vld [vmem:[%s2767_s6 + $0x10] sm:$0xff] }
 0x107   :  { %s2252_s27 = smov [#allocation2 + $0x17]   ;;  %s587_s19 = scalar_lea.hbm %s2766_s5, %s2340_s21 }
 0x108   :  { %s582_s17 = sshll.u32 %s2252_s27, 4  ;;  %s2548_s13 = sshll.u32 %s587_s19, 4  ;;  %s583_s17 = int_to_ptr.vmem [resolvable:$true] %s582_s17  ;;  %s598_s13 = int_to_ptr.hbm [resolvable:$true] %s2548_s13 }
 0x109   :  { %s1995_s1 = sshra.s32 %s581_s0, 4  ;;  %s1996_s1 = int_to_ptr.hbm [resolvable:$true] %s1995_s1 }
 0x10a   :  { %s1997_s20 = scalar_lea.hbm %s1996_s1, 1  ;;  %p2000_p6 = scmp.lt.s32.totalorder %s1996_s1, %s2765_s4 }
 0x10b   :  { %p1998_p5 = scmp.ne.s32.totalorder %s1996_s1, %s1997_s20  ;;  %p2001_p7 = scmp.lt.s32.totalorder %s2484_s14, %s1997_s20 }
 0x10d   :  { %p2002_p8 = por %p2001_p7, %p2000_p6 }
 0x10f   :  { %p2003_p9 = pnand %p2002_p8, %p1998_p5 }
 0x111   :  { %2006 = shalt.err (!%p2003_p9)  }
 0x112   :  { %585 = dma.hbm_to_vmem [thread:$0]  %s581_s0, 16, %s583_s17, [#allocation3 + $0x2]  ;;  %v735_v24 = vld [vmem:[%s2767_s6 + $0x18] sm:$0xff]  ;;  %v2566_v25 = vpack.c.bf16 %v733_v22, %v732_v21 }
 0x113   :  { %v2569_v26 = vpack.c.bf16 %v735_v24, %v734_v23  ;;  %s2253_s27 = smov [#allocation2 + $0x18]   ;;  %s604_s14 = scalar_lea.hbm %s2766_s5, %s2344_s24 }
 0x114   :  { %s599_s30 = sshll.u32 %s2253_s27, 4  ;;  %s613_s19 = sshll.u32 %s604_s14, 4  ;;  %s600_s30 = int_to_ptr.vmem [resolvable:$true] %s599_s30  ;;  %s614_s19 = int_to_ptr.hbm [resolvable:$true] %s613_s19 }
 0x115   :  { %s2019_s0 = sshra.s32 %s598_s13, 4  ;;  %s2578_s6 = scalar_lea.hbm %s2766_s5, 32  ;;  %s2020_s0 = int_to_ptr.hbm [resolvable:$true] %s2019_s0 }
 0x116   :  { %s2021_s17 = scalar_lea.hbm %s2020_s0, 1  ;;  %p2024_p11 = scmp.lt.s32.totalorder %s2020_s0, %s2766_s5 }
 0x117   :  { %p2022_p10 = scmp.ne.s32.totalorder %s2020_s0, %s2021_s17  ;;  %p2025_p12 = scmp.lt.s32.totalorder %s2578_s6, %s2021_s17 }
 0x119   :  { %p2026_p13 = por %p2025_p12, %p2024_p11 }
 0x11b   :  { %p2027_p0 = pnand %p2026_p13, %p2022_p10 }
 0x11d   :  { %2030 = shalt.err (!%p2027_p0)  }
 0x11e   :  { %602 = dma.hbm_to_vmem [thread:$0]  %s598_s13, 16, %s600_s30, [#allocation3 + $0x3] }
 0x11f   :  { %s2254_s24 = smov [#allocation2 + $0x19]   ;;  %s620_s20 = scalar_lea.hbm %s2766_s5, %s2349_s26 }
 0x120   :  { %s615_s10 = sshll.u32 %s2254_s24, 4  ;;  %s629_s21 = sshll.u32 %s620_s20, 4  ;;  %s616_s10 = int_to_ptr.vmem [resolvable:$true] %s615_s10  ;;  %s630_s21 = int_to_ptr.hbm [resolvable:$true] %s629_s21 }
 0x121   :  { %s2043_s11 = sshra.s32 %s614_s19, 4  ;;  %s2044_s11 = int_to_ptr.hbm [resolvable:$true] %s2043_s11 }
 0x122   :  { %s2045_s22 = scalar_lea.hbm %s2044_s11, 1  ;;  %p2048_p2 = scmp.lt.s32.totalorder %s2044_s11, %s2766_s5 }
 0x123   :  { %p2046_p1 = scmp.ne.s32.totalorder %s2044_s11, %s2045_s22  ;;  %p2049_p3 = scmp.lt.s32.totalorder %s2578_s6, %s2045_s22 }
 0x125   :  { %p2050_p4 = por %p2049_p3, %p2048_p2 }
 0x127   :  { %p2051_p5 = pnand %p2050_p4, %p2046_p1 }
 0x129   :  { %2054 = shalt.err (!%p2051_p5)  }
 0x12a   :  { %618 = dma.hbm_to_vmem [thread:$0]  %s614_s19, 16, %s616_s10, [#allocation3 + $0x3] }
 0x12b   :  { %s2255_s13 = smov [#allocation2 + $0x1a]   ;;  %s636_s4 = scalar_lea.hbm %s2766_s5, %s2354_s28 }
 0x12c   :  { %s631_s26 = sshll.u32 %s2255_s13, 4  ;;  %s645_s14 = sshll.u32 %s636_s4, 4  ;;  %s632_s26 = int_to_ptr.vmem [resolvable:$true] %s631_s26  ;;  %s646_s14 = int_to_ptr.hbm [resolvable:$true] %s645_s14 }
 0x12d   :  { %s2067_s0 = sshra.s32 %s630_s21, 4  ;;  %s2068_s0 = int_to_ptr.hbm [resolvable:$true] %s2067_s0 }
 0x12e   :  { %s2069_s17 = scalar_lea.hbm %s2068_s0, 1  ;;  %p2072_p7 = scmp.lt.s32.totalorder %s2068_s0, %s2766_s5 }
 0x12f   :  { %p2070_p6 = scmp.ne.s32.totalorder %s2068_s0, %s2069_s17  ;;  %p2073_p8 = scmp.lt.s32.totalorder %s2578_s6, %s2069_s17 }
 0x131   :  { %p2074_p9 = por %p2073_p8, %p2072_p7 }
 0x133   :  { %p2075_p10 = pnand %p2074_p9, %p2070_p6 }
 0x135   :  { %2078 = shalt.err (!%p2075_p10)  }
 0x136   :  { %634 = dma.hbm_to_vmem [thread:$0]  %s630_s21, 16, %s632_s26, [#allocation3 + $0x3] }
 0x137   :  { %s2256_s19 = smov [#allocation2 + $0x1b]   ;;  %s652_s24 = scalar_lea.hbm %s2766_s5, %s2412_s18 }
 0x138   :  { %s647_s28 = sshll.u32 %s2256_s19, 4  ;;  %s661_s10 = sshll.u32 %s652_s24, 4  ;;  %s648_s28 = int_to_ptr.vmem [resolvable:$true] %s647_s28  ;;  %s662_s10 = int_to_ptr.hbm [resolvable:$true] %s661_s10 }
 0x139   :  { %s2091_s16 = sshra.s32 %s646_s14, 4  ;;  %s2092_s16 = int_to_ptr.hbm [resolvable:$true] %s2091_s16 }
 0x13a   :  { %s2093_s1 = scalar_lea.hbm %s2092_s16, 1  ;;  %p2096_p12 = scmp.lt.s32.totalorder %s2092_s16, %s2766_s5 }
 0x13b   :  { %p2094_p11 = scmp.ne.s32.totalorder %s2092_s16, %s2093_s1  ;;  %p2097_p13 = scmp.lt.s32.totalorder %s2578_s6, %s2093_s1 }
 0x13d   :  { %p2098_p0 = por %p2097_p13, %p2096_p12 }
 0x13f   :  { %p2099_p1 = pnand %p2098_p0, %p2094_p11 }
 0x141   :  { %2102 = shalt.err (!%p2099_p1)  }
 0x142   :  { %650 = dma.hbm_to_vmem [thread:$0]  %s646_s14, 16, %s648_s28, [#allocation3 + $0x3] }
 0x143   :  { %s2257_s21 = smov [#allocation2 + $0x1c]   ;;  %s668_s27 = scalar_lea.hbm %s2766_s5, %s2420_s29 }
 0x144   :  { %s663_s18 = sshll.u32 %s2257_s21, 4  ;;  %s677_s13 = sshll.u32 %s668_s27, 4  ;;  %s664_s18 = int_to_ptr.vmem [resolvable:$true] %s663_s18  ;;  %s678_s13 = int_to_ptr.hbm [resolvable:$true] %s677_s13 }
 0x145   :  { %s2115_s26 = sshra.s32 %s662_s10, 4  ;;  %s2116_s26 = int_to_ptr.hbm [resolvable:$true] %s2115_s26 }
 0x146   :  { %s2117_s30 = scalar_lea.hbm %s2116_s26, 1  ;;  %p2120_p3 = scmp.lt.s32.totalorder %s2116_s26, %s2766_s5 }
 0x147   :  { %p2118_p2 = scmp.ne.s32.totalorder %s2116_s26, %s2117_s30  ;;  %p2121_p4 = scmp.lt.s32.totalorder %s2578_s6, %s2117_s30 }
 0x149   :  { %p2122_p5 = por %p2121_p4, %p2120_p3 }
 0x14b   :  { %p2123_p6 = pnand %p2122_p5, %p2118_p2 }
 0x14d   :  { %2126 = shalt.err (!%p2123_p6)  }
 0x14e   :  { %666 = dma.hbm_to_vmem [thread:$0]  %s662_s10, 16, %s664_s18, [#allocation3 + $0x3] }
 0x14f   :  { %s2258_s14 = smov [#allocation2 + $0x1d]   ;;  %s684_s7 = scalar_lea.hbm %s2766_s5, %s2424_s23 }
 0x150   :  { %s679_s29 = sshll.u32 %s2258_s14, 4  ;;  %s693_s9 = sshll.u32 %s684_s7, 4  ;;  %s680_s29 = int_to_ptr.vmem [resolvable:$true] %s679_s29  ;;  %s694_s9 = int_to_ptr.hbm [resolvable:$true] %s693_s9 }
 0x151   :  { %s2139_s19 = sshra.s32 %s678_s13, 4  ;;  %s2140_s19 = int_to_ptr.hbm [resolvable:$true] %s2139_s19 }
 0x152   :  { %s2141_s28 = scalar_lea.hbm %s2140_s19, 1  ;;  %p2144_p8 = scmp.lt.s32.totalorder %s2140_s19, %s2766_s5 }
 0x153   :  { %p2142_p7 = scmp.ne.s32.totalorder %s2140_s19, %s2141_s28  ;;  %p2145_p9 = scmp.lt.s32.totalorder %s2578_s6, %s2141_s28 }
 0x155   :  { %p2146_p10 = por %p2145_p9, %p2144_p8 }
 0x157   :  { %p2147_p11 = pnand %p2146_p10, %p2142_p7 }
 0x159   :  { %2150 = shalt.err (!%p2147_p11)  }
 0x15a   :  { %682 = dma.hbm_to_vmem [thread:$0]  %s678_s13, 16, %s680_s29, [#allocation3 + $0x3] }
 0x15b   :  { %s2259_s24 = smov [#allocation2 + $0x1e]   ;;  %s700_s1 = scalar_lea.hbm %s2766_s5, %s2452_s15 }
 0x15c   :  { %s695_s23 = sshll.u32 %s2259_s24, 4  ;;  %s709_s20 = sshll.u32 %s700_s1, 4  ;;  %s696_s23 = int_to_ptr.vmem [resolvable:$true] %s695_s23  ;;  %s710_s20 = int_to_ptr.hbm [resolvable:$true] %s709_s20 }
 0x15d   :  { %s2163_s11 = sshra.s32 %s694_s9, 4  ;;  %s2164_s11 = int_to_ptr.hbm [resolvable:$true] %s2163_s11 }
 0x15e   :  { %s2165_s21 = scalar_lea.hbm %s2164_s11, 1  ;;  %p2168_p13 = scmp.lt.s32.totalorder %s2164_s11, %s2766_s5 }
 0x15f   :  { %p2166_p12 = scmp.ne.s32.totalorder %s2164_s11, %s2165_s21  ;;  %p2169_p0 = scmp.lt.s32.totalorder %s2578_s6, %s2165_s21 }
 0x161   :  { %p2170_p1 = por %p2169_p0, %p2168_p13 }
 0x163   :  { %p2171_p2 = pnand %p2170_p1, %p2166_p12 }
 0x165   :  { %2174 = shalt.err (!%p2171_p2)  }
 0x166   :  { %698 = dma.hbm_to_vmem [thread:$0]  %s694_s9, 16, %s696_s23, [#allocation3 + $0x3] }
 0x167   :  { %s2260_s2 = smov [#allocation2 + $0x1f]   ;;  %s2632_s15 = spop %1484 }
 0x168   :  { %s711_s27 = sshll.u32 %s2260_s2, 4  ;;  %s2187_s13 = sshra.s32 %s710_s20, 4  ;;  %s712_s27 = int_to_ptr.vmem [resolvable:$true] %s711_s27  ;;  %s2188_s13 = int_to_ptr.hbm [resolvable:$true] %s2187_s13 }
 0x169   :  { %s2189_s26 = scalar_lea.hbm %s2188_s13, 1  ;;  %p2192_p4 = scmp.lt.s32.totalorder %s2188_s13, %s2766_s5 }
 0x16a   :  { %p2190_p3 = scmp.ne.s32.totalorder %s2188_s13, %s2189_s26  ;;  %p2193_p5 = scmp.lt.s32.totalorder %s2578_s6, %s2189_s26 }
 0x16c   :  { %p2194_p6 = por %p2193_p5, %p2192_p4 }
 0x16e   :  { %p2195_p7 = pnand %p2194_p6, %p2190_p3 }
 0x170   :  { %2198 = shalt.err (!%p2195_p7)  }
 0x171   :  { %714 = dma.hbm_to_vmem [thread:$0]  %s710_s20, 16, %s712_s27, [#allocation3 + $0x3] }
 0x172   :  { %2225 = dma.done.wait [#allocation3], 128 }
 0x173   :  { %2226 = vsyncadd [#allocation3], 4294967168 }
 0x174   :  { %2227 = dma.done.wait [#allocation3 + $0x1], 128 }
 0x175   :  { %2228 = vsyncadd [#allocation3 + $0x1], 4294967168 }
 0x176   :  { %2229 = dma.done.wait [#allocation3 + $0x2], 128 }
 0x177   :  { %2230 = vsyncadd [#allocation3 + $0x2], 4294967168 }
 0x178   :  { %2231 = dma.done.wait [#allocation3 + $0x3], 128 }
 0x179   :  { %2232 = vsyncadd [#allocation3 + $0x3], 4294967168  ;;  %918 = vmatpush.bf16.msra.mxu0 %v2569_v26  ;;  %1482 = vmatpush.bf16.msra.mxu1 %v2569_v26  ;;  %v2642_v27 = vld [vmem:[#allocation2 + $0x10] sm:$0xff]  ;;  %vm843_vm4 = vcmask 261120   ;;  %v2644_v28 = vld [vmem:[#allocation2] sm:$0xff]  ;;  %vm931_vm1 = vcmask 130048  }
 0x17a   :  { %v841_v29 = vmul.f32 %v2642_v27, %v2642_v27  ;;  %v839_v30 = vmul.f32 %v2644_v28, %v2644_v28  ;;  %v2650_v31 = vld [vmem:[#allocation2 + $0x18] sm:$0xff]  ;;  %v2652_v32 = vld [vmem:[#allocation2 + $0x8] sm:$0xff]  ;;  %s1347_s25 = sshll.u32 %s2769_s8, 4  ;;  %s2261_s16 = smov [#allocation8]   ;;  %s1348_s25 = int_to_ptr.hbm [resolvable:$true] %s1347_s25 }
 0x17b   :  { %v842_v35 = vmul.f32 %v2650_v31, %v2650_v31  ;;  %v840_v36 = vmul.f32 %v2652_v32, %v2652_v32 }
 0x17c   :  { %v850_v33 = vsel %vm843_vm4, %v841_v29, 0.0  ;;  %v844_v34 = vsel %vm843_vm4, %v839_v30, 0.0 }
 0x17d   :  { %919 = vmatpush.bf16.msra.mxu0 %v2566_v25  ;;  %1483 = vmatpush.bf16.msra.mxu1 %v2566_v25  ;;  %v853_v37 = vsel %vm843_vm4, %v842_v35, 0.0  ;;  %v847_v38 = vsel %vm843_vm4, %v840_v36, 0.0 }
 0x17e   :  { %851 = vadd.xlane.f32.xlu1 %v850_v33  ;;  %845 = vadd.xlane.f32.xlu0 %v844_v34 }
 0x186   :  { %854 = vadd.xlane.f32.xlu1 %v853_v37  ;;  %848 = vadd.xlane.f32.xlu0 %v847_v38 }
 0x1f1   :  { %v852_v39 = vpop.xlane.xlu1 %851  ;;  %v846_v40 = vpop.xlane.xlu0 %845 }
 0x1f2   :  { %v858_v41 = vadd.f32 1e-12, %v852_v39  ;;  %v856_v42 = vadd.f32 1e-12, %v846_v40 }
 0x1f4   :  { %1523 = vrsqrt.f32 %v858_v41  ;;  %vm886_vm7 = vweird.f32 %v858_v41  ;;  %vm866_vm10 = vweird.f32 %v856_v42 }
 0x1f5   :  { %1525 = vrsqrt.f32 %v856_v42 }
 0x1f9   :  { %v855_v43 = vpop.xlane.xlu1 %854  ;;  %v849_v44 = vpop.xlane.xlu0 %848 }
 0x1fa   :  { %v1524_v45 = vpop.eup %1523  ;;  %v859_v46 = vadd.f32 1e-12, %v855_v43  ;;  %v857_v47 = vadd.f32 1e-12, %v849_v44 }
 0x1fb   :  { %v1526_v48 = vpop.eup %1525  ;;  %v881_v49 = vmul.f32 %v1524_v45, %v858_v41  ;;  %vm887_vm5 = vweird.f32 %v1524_v45 }
 0x1fc   :  { %v861_v50 = vmul.f32 %v1526_v48, %v856_v42  ;;  %1527 = vrsqrt.f32 %v859_v46  ;;  %vm867_vm6 = vweird.f32 %v1526_v48  ;;  %vm888_vm9 = vmor %vm886_vm7, %vm887_vm5  ;;  %vm896_vm13 = vweird.f32 %v859_v46 }
 0x1fd   :  { %v882_v51 = vmul.f32 %v1524_v45, %v881_v49  ;;  %1529 = vrsqrt.f32 %v857_v47  ;;  %vm868_vm12 = vmor %vm866_vm10, %vm867_vm6  ;;  %vm876_vm15 = vweird.f32 %v857_v47 }
 0x1fe   :  { %v862_v52 = vmul.f32 %v1526_v48, %v861_v50 }
 0x1ff   :  { %v883_v53 = vmul.f32 0.5, %v882_v51 }
 0x200   :  { %v863_v54 = vmul.f32 0.5, %v862_v52 }
 0x201   :  { %v884_v57 = vsub.f32 1.5, %v883_v53 }
 0x202   :  { %v1528_v55 = vpop.eup %1527  ;;  %v864_v59 = vsub.f32 1.5, %v863_v54 }
 0x203   :  { %v1530_v56 = vpop.eup %1529  ;;  %v891_v58 = vmul.f32 %v1528_v55, %v859_v46  ;;  %v885_v63 = vmul.f32 %v1524_v45, %v884_v57  ;;  %vm897_vm8 = vweird.f32 %v1528_v55 }
 0x204   :  { %v871_v60 = vmul.f32 %v1530_v56, %v857_v47  ;;  %v865_v1 = vmul.f32 %v1526_v48, %v864_v59  ;;  %vm877_vm11 = vweird.f32 %v1530_v56  ;;  %vm898_vm14 = vmor %vm896_vm13, %vm897_vm8 }
 0x205   :  { %v892_v61 = vmul.f32 %v1528_v55, %v891_v58  ;;  %v889_v6 = vsel %vm888_vm9, %v1524_v45, %v885_v63  ;;  %vm878_vm0 = vmor %vm876_vm15, %vm877_vm11 }
 0x206   :  { %v872_v62 = vmul.f32 %v1530_v56, %v871_v60  ;;  %v869_v8 = vsel %vm868_vm12, %v1526_v48, %v865_v1  ;;  %v902_v11 = vmul.f32 %v889_v6, %v2642_v27 }
 0x207   :  { %v893_v0 = vmul.f32 0.5, %v892_v61  ;;  %v900_v13 = vmul.f32 %v869_v8, %v2644_v28 }
 0x208   :  { %v873_v2 = vmul.f32 0.5, %v872_v62 }
 0x209   :  { %v894_v3 = vsub.f32 1.5, %v893_v0 }
 0x20a   :  { %v874_v4 = vsub.f32 1.5, %v873_v2 }
 0x20b   :  { %v895_v5 = vmul.f32 %v1528_v55, %v894_v3 }
 0x20c   :  { %v875_v7 = vmul.f32 %v1530_v56, %v874_v4 }
 0x20d   :  { %v899_v9 = vsel %vm898_vm14, %v1528_v55, %v895_v5 }
 0x20e   :  { %v879_v10 = vsel %vm878_vm0, %v1530_v56, %v875_v7  ;;  %v903_v12 = vmul.f32 %v899_v9, %v2650_v31 }
 0x20f   :  { %v901_v14 = vmul.f32 %v879_v10, %v2652_v32 }
 0x210   :  { %v905_v15 = vpack.c.bf16 %v903_v12, %v902_v11 }
 0x211   :  { %v904_v16 = vpack.c.bf16 %v901_v14, %v900_v13 }
 0x212   :  { %1477 = vmatmul.msk.bf16.vlgmr.msra.gmra.mxu1 %vm843_vm4, %v905_v15 }
 0x213   :  { %1476 = vmatmul.msk.bf16.vlgmr.msra.gmra.mxu0 %vm843_vm4, %v904_v16 }
 0x28f   :  { %v2668_v17 = vpop.f32.mrf.mxu1 }
 0x290   :  { %v2670_v18 = vpop.f32.mrf.mxu0  ;;  %v938_v24 = vsel %vm931_vm1, %v2668_v17, -inf }
 0x291   :  { %v932_v19 = vsel %vm931_vm1, %v2670_v18, -inf }
 0x292   :  { %933 = vmax.xlane.f32.xlu1 %v932_v19 }
 0x297   :  { %v2674_v20 = vpop.f32.mrf.mxu1 }
 0x298   :  { %v2676_v21 = vpop.f32.mrf.mxu0  ;;  %v941_v22 = vsel %vm931_vm1, %v2674_v20, -inf }
 0x299   :  { %942 = vmax.xlane.f32.xlu0 %v941_v22  ;;  %v935_v23 = vsel %vm931_vm1, %v2676_v21, -inf }
 0x29a   :  { %936 = vmax.xlane.f32.xlu2 %v935_v23 }
 0x2a2   :  { %939 = vmax.xlane.f32.xlu2 %v938_v24 }
 0x305   :  { %v934_v25 = vpop.xlane.xlu1 %933 }
 0x306   :  { %v944_v26 = vrot.slane %v934_v25, 4 }
 0x308   :  { %v945_v27 = vmax.f32 %v934_v25, %v944_v26 }
 0x30a   :  { %v946_v28 = vrot.slane %v945_v27, 2 }
 0x30c   :  { %v943_v29 = vpop.xlane.xlu0 %942  ;;  %v947_v32 = vmax.f32 %v945_v27, %v946_v28 }
 0x30d   :  { %v937_v30 = vpop.xlane.xlu2 %936  ;;  %v962_v31 = vrot.slane %v943_v29, 4 }
 0x30e   :  { %v950_v33 = vrot.slane %v937_v30, 4  ;;  %v948_v37 = vrot.slane %v947_v32, 1 }
 0x30f   :  { %v963_v34 = vmax.f32 %v943_v29, %v962_v31 }
 0x310   :  { %v951_v35 = vmax.f32 %v937_v30, %v950_v33  ;;  %v949_v43 = vmax.f32 %v947_v32, %v948_v37 }
 0x311   :  { %v964_v36 = vrot.slane %v963_v34, 2 }
 0x312   :  { %v952_v38 = vrot.slane %v951_v35, 2  ;;  %v968_v50 = vsub.f32 %v2670_v18, %v949_v43 }
 0x313   :  { %v965_v39 = vmax.f32 %v963_v34, %v964_v36 }
 0x314   :  { %v953_v40 = vmax.f32 %v951_v35, %v952_v38  ;;  %v972_v57 = vmul.f32 20.0, %v968_v50 }
 0x315   :  { %v966_v41 = vrot.slane %v965_v39, 1  ;;  %v940_v42 = vpop.xlane.xlu2 %939 }
 0x316   :  { %v954_v44 = vrot.slane %v953_v40, 1  ;;  %v956_v45 = vrot.slane %v940_v42, 4  ;;  %v976_v62 = vmul.f32 1.442695, %v972_v57 }
 0x317   :  { %v967_v46 = vmax.f32 %v965_v39, %v966_v41 }
 0x318   :  { %v955_v47 = vmax.f32 %v953_v40, %v954_v44  ;;  %v957_v48 = vmax.f32 %v940_v42, %v956_v45 }
 0x319   :  { %v971_v49 = vsub.f32 %v2674_v20, %v967_v46 }
 0x31a   :  { %v969_v51 = vsub.f32 %v2676_v21, %v955_v47  ;;  %v958_v52 = vrot.slane %v957_v48, 2 }
 0x31b   :  { %v975_v53 = vmul.f32 20.0, %v971_v49 }
 0x31c   :  { %v973_v54 = vmul.f32 20.0, %v969_v51  ;;  %v959_v55 = vmax.f32 %v957_v48, %v958_v52 }
 0x31d   :  { %v982_v56 = vmul.f32 1.442695, %v975_v53 }
 0x31e   :  { %v960_v58 = vrot.slane %v959_v55, 1  ;;  %v978_v59 = vmul.f32 1.442695, %v973_v54 }
 0x31f   :  { %1531 = vpow2.f32 %v982_v56 }
 0x320   :  { %v961_v60 = vmax.f32 %v959_v55, %v960_v58  ;;  %1533 = vpow2.f32 %v978_v59 }
 0x321   :  { %1535 = vpow2.f32 %v976_v62 }
 0x322   :  { %v970_v61 = vsub.f32 %v2668_v17, %v961_v60 }
 0x324   :  { %v974_v63 = vmul.f32 20.0, %v970_v61 }
 0x325   :  { %v1532_v0 = vpop.eup %1531 }
 0x326   :  { %v1534_v1 = vpop.eup %1533  ;;  %v993_v2 = vsel %vm931_vm1, %v1532_v0, 0.0  ;;  %v980_v3 = vmul.f32 1.442695, %v974_v63 }
 0x327   :  { %v987_v4 = vsel %vm931_vm1, %v1534_v1, 0.0  ;;  %994 = vadd.xlane.f32.xlu1 %v993_v2  ;;  %v1536_v5 = vpop.eup %1535 }
 0x328   :  { %988 = vadd.xlane.f32.xlu2 %v987_v4  ;;  %1537 = vpow2.f32 %v980_v3  ;;  %v984_v7 = vsel %vm931_vm1, %v1536_v5, 0.0 }
 0x32e   :  { %v1538_v6 = vpop.eup %1537 }
 0x32f   :  { %v990_v8 = vsel %vm931_vm1, %v1538_v6, 0.0 }
 0x330   :  { %985 = vadd.xlane.f32.xlu2 %v984_v7  ;;  %991 = vadd.xlane.f32.xlu0 %v990_v8 }
 0x39a   :  { %v995_v9 = vpop.xlane.xlu1 %994 }
 0x39b   :  { %v989_v10 = vpop.xlane.xlu2 %988  ;;  %v1014_v11 = vrot.slane %v995_v9, 4 }
 0x39c   :  { %v1002_v12 = vrot.slane %v989_v10, 4 }
 0x39d   :  { %v1015_v13 = vadd.f32 %v1014_v11, %v995_v9 }
 0x39e   :  { %v1003_v14 = vadd.f32 %v1002_v12, %v989_v10 }
 0x39f   :  { %v1016_v15 = vrot.slane %v1015_v13, 2 }
 0x3a0   :  { %v1004_v16 = vrot.slane %v1003_v14, 2 }
 0x3a1   :  { %v1017_v19 = vadd.f32 %v1016_v15, %v1015_v13 }
 0x3a2   :  { %v1005_v22 = vadd.f32 %v1004_v16, %v1003_v14 }
 0x3a3   :  { %v1018_v23 = vrot.slane %v1017_v19, 1  ;;  %v986_v24 = vpop.xlane.xlu2 %985  ;;  %v992_v25 = vpop.xlane.xlu0 %991 }
 0x3a4   :  { %v1006_v26 = vrot.slane %v1005_v22, 1  ;;  %v996_v27 = vrot.slane %v986_v24, 4  ;;  %v1008_v28 = vrot.slane %v992_v25, 4 }
 0x3a5   :  { %v1019_v29 = vadd.f32 %v1018_v23, %v1017_v19 }
 0x3a6   :  { %v1007_v30 = vadd.f32 %v1006_v26, %v1005_v22  ;;  %v997_v31 = vadd.f32 %v996_v27, %v986_v24  ;;  %v1009_v32 = vadd.f32 %v1008_v28, %v992_v25 }
 0x3a7   :  { %1539 = vrcp.f32 %v1019_v29 }
 0x3a8   :  { %1541 = vrcp.f32 %v1007_v30  ;;  %v998_v33 = vrot.slane %v997_v31, 2  ;;  %v1010_v34 = vrot.slane %v1009_v32, 2 }
 0x3aa   :  { %v999_v35 = vadd.f32 %v998_v33, %v997_v31  ;;  %v1011_v36 = vadd.f32 %v1010_v34, %v1009_v32 }
 0x3ac   :  { %v1000_v37 = vrot.slane %v999_v35, 1  ;;  %v1012_v38 = vrot.slane %v1011_v36, 1 }
 0x3ad   :  { %v1540_v39 = vpop.eup %1539 }
 0x3ae   :  { %v1542_v40 = vpop.eup %1541  ;;  %v1001_v41 = vadd.f32 %v1000_v37, %v999_v35  ;;  %v1013_v42 = vadd.f32 %v1012_v38, %v1011_v36  ;;  %v1027_v43 = vmul.f32 %v1540_v39, %v1532_v0 }
 0x3af   :  { %v1025_v44 = vmul.f32 %v1542_v40, %v1534_v1 }
 0x3b0   :  { %1543 = vrcp.f32 %v1001_v41  ;;  %v1049_v45 = vsel %vm931_vm1, %v1027_v43, 0.0 }
 0x3b1   :  { %1545 = vrcp.f32 %v1013_v42  ;;  %v1035_v46 = vsel %vm931_vm1, %v1025_v44, 0.0  ;;  %v1050_v47 = vrot.slane %v1049_v45, 4 }
 0x3b2   :  { %v1036_v48 = vrot.slane %v1035_v46, 4 }
 0x3b3   :  { %v1051_v49 = vadd.f32 %v1050_v47, %v1049_v45 }
 0x3b4   :  { %v1037_v50 = vadd.f32 %v1036_v48, %v1035_v46 }
 0x3b5   :  { %v1052_v51 = vrot.slane %v1051_v49, 2 }
 0x3b6   :  { %v1544_v52 = vpop.eup %1543  ;;  %v1038_v53 = vrot.slane %v1037_v50, 2 }
 0x3b7   :  { %v1546_v54 = vpop.eup %1545  ;;  %v1053_v55 = vadd.f32 %v1052_v51, %v1051_v49  ;;  %v1024_v56 = vmul.f32 %v1544_v52, %v1536_v5 }
 0x3b8   :  { %v1039_v57 = vadd.f32 %v1038_v53, %v1037_v50  ;;  %v1026_v58 = vmul.f32 %v1546_v54, %v1538_v6 }
 0x3b9   :  { %v1054_v59 = vrot.slane %v1053_v55, 1  ;;  %v1028_v60 = vsel %vm931_vm1, %v1024_v56, 0.0 }
 0x3ba   :  { %v1040_v61 = vrot.slane %v1039_v57, 1  ;;  %v1029_v62 = vrot.slane %v1028_v60, 4  ;;  %v1042_v63 = vsel %vm931_vm1, %v1026_v58, 0.0 }
 0x3bb   :  { %v1055_v0 = vadd.f32 %v1054_v59, %v1053_v55  ;;  %v1043_v1 = vrot.slane %v1042_v63, 4 }
 0x3bc   :  { %v1041_v2 = vadd.f32 %v1040_v61, %v1039_v57  ;;  %v1030_v3 = vadd.f32 %v1029_v62, %v1028_v60 }
 0x3bd   :  { %1547 = vrcp.f32 %v1055_v0  ;;  %v1044_v4 = vadd.f32 %v1043_v1, %v1042_v63 }
 0x3be   :  { %1549 = vrcp.f32 %v1041_v2  ;;  %v1031_v7 = vrot.slane %v1030_v3, 2 }
 0x3bf   :  { %v1045_v8 = vrot.slane %v1044_v4, 2 }
 0x3c0   :  { %v1032_v9 = vadd.f32 %v1031_v7, %v1030_v3 }
 0x3c1   :  { %v1046_v5 = vadd.f32 %v1045_v8, %v1044_v4 }
 0x3c2   :  { %v1033_v10 = vrot.slane %v1032_v9, 1 }
 0x3c3   :  { %v1548_v6 = vpop.eup %1547  ;;  %v1047_v11 = vrot.slane %v1046_v5, 1 }
 0x3c4   :  { %v1550_v12 = vpop.eup %1549  ;;  %v1063_v13 = vmul.f32 0.0625, %v1548_v6  ;;  %v1034_v14 = vadd.f32 %v1033_v10, %v1032_v9 }
 0x3c5   :  { %v1061_v15 = vmul.f32 0.0625, %v1550_v12  ;;  %v1048_v16 = vadd.f32 %v1047_v11, %v1046_v5 }
 0x3c6   :  { %v1067_v19 = vmul.f32 %v1063_v13, %v1027_v43  ;;  %1551 = vrcp.f32 %v1034_v14 }
 0x3c7   :  { %v1065_v22 = vmul.f32 %v1061_v15, %v1025_v44  ;;  %1553 = vrcp.f32 %v1048_v16 }
 0x3c8   :  { %v1077_v23 = vsel %vm931_vm1, %v1067_v19, 0.0 }
 0x3c9   :  { %v1071_v24 = vsel %vm931_vm1, %v1065_v22, 0.0  ;;  %1078 = vadd.xlane.f32.xlu2 %v1077_v23 }
 0x3ca   :  { %1072 = vadd.xlane.f32.xlu0 %v1071_v24  ;;  %v1224_v24 = vstv %s2632_s15 }
 0x3cc   :  { %v1552_v25 = vpop.eup %1551 }
 0x3cd   :  { %v1554_v26 = vpop.eup %1553  ;;  %v1060_v27 = vmul.f32 0.0625, %v1552_v25 }
 0x3ce   :  { %v1062_v28 = vmul.f32 0.0625, %v1554_v26 }
 0x3cf   :  { %v1064_v29 = vmul.f32 %v1060_v27, %v1024_v56  ;;  %v1227_v27 = vmul.f32 %v1224_v24, %v2668_v17 }
 0x3d0   :  { %v1066_v30 = vmul.f32 %v1062_v28, %v1026_v58 }
 0x3d1   :  { %v1068_v31 = vsel %vm931_vm1, %v1064_v29, 0.0 }
 0x3d2   :  { %1069 = vadd.xlane.f32.xlu0 %v1068_v31  ;;  %v1074_v32 = vsel %vm931_vm1, %v1066_v30, 0.0 }
 0x3d3   :  { %1075 = vadd.xlane.f32.xlu1 %v1074_v32  ;;  %v1235_v32 = vsel %vm931_vm1, %v1227_v27, -inf }
 0x43c   :  { %v1079_v33 = vpop.xlane.xlu2 %1078 }
 0x43d   :  { %1555 = vrcp.f32 %v1079_v33  ;;  %v1073_v34 = vpop.xlane.xlu0 %1072 }
 0x43e   :  { %1557 = vrcp.f32 %v1073_v34 }
 0x443   :  { %v1556_v35 = vpop.eup %1555 }
 0x444   :  { %v1558_v36 = vpop.eup %1557  ;;  %v1087_v37 = vmul.f32 0.125, %v1556_v35 }
 0x445   :  { %v1085_v38 = vmul.f32 0.125, %v1558_v36  ;;  %v1070_v39 = vpop.xlane.xlu0 %1069  ;;  %v2712_v36 = vmul.f32 %v1224_v24, %v2674_v20 }
 0x446   :  { %v1091_v40 = vmul.f32 %v1087_v37, %v1067_v19  ;;  %v1076_v41 = vpop.xlane.xlu1 %1075  ;;  %1559 = vrcp.f32 %v1070_v39  ;;  %v1226_v37 = vmul.f32 %v1224_v24, %v2676_v21  ;;  %v2719_v39 = vmul.f32 %v1224_v24, %v2670_v18 }
 0x447   :  { %v1089_v42 = vmul.f32 %v1085_v38, %v1065_v22  ;;  %1561 = vrcp.f32 %v1076_v41  ;;  %v1238_v17 = vsel %vm931_vm1, %v2712_v36, -inf }
 0x448   :  { %v1113_v43 = vsel %vm931_vm1, %v1091_v40, 0.0  ;;  %v1232_v38 = vsel %vm931_vm1, %v1226_v37, -inf }
 0x449   :  { %v1114_v44 = vrot.slane %v1113_v43, 4  ;;  %v1099_v45 = vsel %vm931_vm1, %v1089_v42, 0.0 }
 0x44a   :  { %v1100_v46 = vrot.slane %v1099_v45, 4 }
 0x44b   :  { %v1115_v47 = vadd.f32 %v1114_v44, %v1113_v43 }
 0x44c   :  { %v1560_v48 = vpop.eup %1559  ;;  %v1101_v49 = vadd.f32 %v1100_v46, %v1099_v45 }
 0x44d   :  { %v1562_v50 = vpop.eup %1561  ;;  %v1116_v51 = vrot.slane %v1115_v47, 2  ;;  %v1084_v52 = vmul.f32 0.125, %v1560_v48 }
 0x44e   :  { %v1102_v53 = vrot.slane %v1101_v49, 2  ;;  %v1086_v54 = vmul.f32 0.125, %v1562_v50 }
 0x44f   :  { %v1088_v55 = vmul.f32 %v1084_v52, %v1064_v29  ;;  %v1117_v56 = vadd.f32 %v1116_v51, %v1115_v47 }
 0x450   :  { %v1090_v57 = vmul.f32 %v1086_v54, %v1066_v30  ;;  %v1103_v58 = vadd.f32 %v1102_v53, %v1101_v49 }
 0x451   :  { %v1092_v59 = vsel %vm931_vm1, %v1088_v55, 0.0  ;;  %v1118_v60 = vrot.slane %v1117_v56, 1 }
 0x452   :  { %v1106_v61 = vsel %vm931_vm1, %v1090_v57, 0.0  ;;  %v1093_v62 = vrot.slane %v1092_v59, 4  ;;  %v1104_v63 = vrot.slane %v1103_v58, 1 }
 0x453   :  { %v1107_v0 = vrot.slane %v1106_v61, 4  ;;  %v1119_v1 = vadd.f32 %v1118_v60, %v1117_v56 }
 0x454   :  { %v1094_v2 = vadd.f32 %v1093_v62, %v1092_v59  ;;  %v1105_v3 = vadd.f32 %v1104_v63, %v1103_v58 }
 0x455   :  { %v1108_v4 = vadd.f32 %v1107_v0, %v1106_v61  ;;  %1563 = vrcp.f32 %v1119_v1 }
 0x456   :  { %v1095_v7 = vrot.slane %v1094_v2, 2  ;;  %1565 = vrcp.f32 %v1105_v3 }
 0x457   :  { %v1109_v8 = vrot.slane %v1108_v4, 2 }
 0x458   :  { %v1096_v9 = vadd.f32 %v1095_v7, %v1094_v2 }
 0x459   :  { %v1110_v5 = vadd.f32 %v1109_v8, %v1108_v4 }
 0x45a   :  { %v1097_v10 = vrot.slane %v1096_v9, 1 }
 0x45b   :  { %v1564_v6 = vpop.eup %1563  ;;  %v1111_v11 = vrot.slane %v1110_v5, 1 }
 0x45c   :  { %v1566_v12 = vpop.eup %1565  ;;  %v1127_v13 = vmul.f32 0.0625, %v1564_v6  ;;  %v1098_v14 = vadd.f32 %v1097_v10, %v1096_v9 }
 0x45d   :  { %v1125_v15 = vmul.f32 0.0625, %v1566_v12  ;;  %v1112_v16 = vadd.f32 %v1111_v11, %v1110_v5 }
 0x45e   :  { %v1131_v19 = vmul.f32 %v1127_v13, %v1091_v40  ;;  %1567 = vrcp.f32 %v1098_v14  ;;  %v1229_v40 = vsel %vm931_vm1, %v2719_v39, -inf }
 0x45f   :  { %v1129_v22 = vmul.f32 %v1125_v15, %v1089_v42  ;;  %1569 = vrcp.f32 %v1112_v16 }
 0x460   :  { %v1141_v23 = vsel %vm931_vm1, %v1131_v19, 0.0 }
 0x461   :  { %1142 = vadd.xlane.f32.xlu0 %v1141_v23  ;;  %v1135_v25 = vsel %vm931_vm1, %v1129_v22, 0.0 }
 0x462   :  { %1136 = vadd.xlane.f32.xlu1 %v1135_v25 }
 0x464   :  { %v1568_v26 = vpop.eup %1567 }
 0x465   :  { %v1570_v28 = vpop.eup %1569  ;;  %v1124_v29 = vmul.f32 0.0625, %v1568_v26 }
 0x466   :  { %v1126_v30 = vmul.f32 0.0625, %v1570_v28 }
 0x467   :  { %v1128_v31 = vmul.f32 %v1124_v29, %v1088_v55 }
 0x468   :  { %v1130_v33 = vmul.f32 %v1126_v30, %v1090_v57 }
 0x469   :  { %1236 = vmax.xlane.f32.xlu0 %v1235_v32  ;;  %v1132_v34 = vsel %vm931_vm1, %v1128_v31, 0.0 }
 0x46a   :  { %v1138_v35 = vsel %vm931_vm1, %v1130_v33, 0.0  ;;  %1133 = vadd.xlane.f32.xlu1 %v1132_v34 }
 0x46b   :  { %1139 = vadd.xlane.f32.xlu2 %v1138_v35 }
 0x472   :  { %1239 = vmax.xlane.f32.xlu1 %v1238_v17 }
 0x473   :  { %1233 = vmax.xlane.f32.xlu2 %v1232_v38 }
 0x47b   :  { %1230 = vmax.xlane.f32.xlu2 %v1229_v40 }
 0x4d4   :  { %v1143_v41 = vpop.xlane.xlu0 %1142 }
 0x4d5   :  { %v1137_v42 = vpop.xlane.xlu1 %1136  ;;  %1571 = vrcp.f32 %v1143_v41 }
 0x4d6   :  { %1573 = vrcp.f32 %v1137_v42 }
 0x4db   :  { %v1572_v20 = vpop.eup %1571 }
 0x4dc   :  { %v1574_v21 = vpop.eup %1573  ;;  %v1151_v43 = vmul.f32 0.125, %v1572_v20  ;;  %v1237_v44 = vpop.xlane.xlu0 %1236 }
 0x4dd   :  { %v1149_v45 = vmul.f32 0.125, %v1574_v21  ;;  %v1134_v46 = vpop.xlane.xlu1 %1133  ;;  %v2723_v47 = vsub.f32 %v1227_v27, %v1237_v44 }
 0x4de   :  { %v1155_v48 = vmul.f32 %v1151_v43, %v1131_v19  ;;  %v1140_v49 = vpop.xlane.xlu2 %1139  ;;  %1575 = vrcp.f32 %v1134_v46 }
 0x4df   :  { %v1153_v18 = vmul.f32 %v1149_v45, %v1129_v22  ;;  %1577 = vrcp.f32 %v1140_v49  ;;  %v1249_v50 = vmul.f32 1.442695, %v2723_v47 }
 0x4e0   :  { %v1177_v51 = vsel %vm931_vm1, %v1155_v48, 0.0 }
 0x4e1   :  { %v1163_v52 = vsel %vm931_vm1, %v1153_v18, 0.0  ;;  %v1178_v53 = vrot.slane %v1177_v51, 4  ;;  %1579 = vpow2.f32 %v1249_v50 }
 0x4e2   :  { %v1164_v54 = vrot.slane %v1163_v52, 4 }
 0x4e3   :  { %v1179_v55 = vadd.f32 %v1178_v53, %v1177_v51 }
 0x4e4   :  { %v1576_v56 = vpop.eup %1575  ;;  %v1165_v57 = vadd.f32 %v1164_v54, %v1163_v52 }
 0x4e5   :  { %v1578_v58 = vpop.eup %1577  ;;  %v1180_v59 = vrot.slane %v1179_v55, 2  ;;  %v1148_v60 = vmul.f32 0.125, %v1576_v56  ;;  %v1240_v23 = vpop.xlane.xlu1 %1239 }
 0x4e6   :  { %v1166_v61 = vrot.slane %v1165_v57, 2  ;;  %v1150_v62 = vmul.f32 0.125, %v1578_v58  ;;  %v1234_v63 = vpop.xlane.xlu2 %1233  ;;  %v2735_v27 = vsub.f32 %v2712_v36, %v1240_v23 }
 0x4e7   :  { %v1580_v0 = vpop.eup %1579  ;;  %v1152_v1 = vmul.f32 %v1148_v60, %v1128_v31  ;;  %v2728_v2 = vsub.f32 %v1226_v37, %v1234_v63  ;;  %v1181_v3 = vadd.f32 %v1180_v59, %v1179_v55 }
 0x4e8   :  { %v1154_v4 = vmul.f32 %v1150_v62, %v1130_v33  ;;  %v1259_v7 = vsel %vm931_vm1, %v1580_v0, 0.0  ;;  %v1167_v8 = vadd.f32 %v1166_v61, %v1165_v57  ;;  %v1251_v37 = vmul.f32 1.442695, %v2735_v27 }
 0x4e9   :  { %v1156_v9 = vsel %vm931_vm1, %v1152_v1, 0.0  ;;  %v1247_v5 = vmul.f32 1.442695, %v2728_v2  ;;  %1260 = vadd.xlane.f32.xlu1 %v1259_v7  ;;  %v1182_v10 = vrot.slane %v1181_v3, 1 }
 0x4ea   :  { %v1170_v6 = vsel %vm931_vm1, %v1154_v4, 0.0  ;;  %v1157_v11 = vrot.slane %v1156_v9, 4  ;;  %v1168_v12 = vrot.slane %v1167_v8, 1 }
 0x4eb   :  { %v1171_v13 = vrot.slane %v1170_v6, 4  ;;  %1581 = vpow2.f32 %v1247_v5  ;;  %v1183_v14 = vadd.f32 %v1182_v10, %v1181_v3 }
 0x4ec   :  { %v1158_v15 = vadd.f32 %v1157_v11, %v1156_v9  ;;  %v1169_v16 = vadd.f32 %v1168_v12, %v1167_v8 }
 0x4ed   :  { %v1172_v19 = vadd.f32 %v1171_v13, %v1170_v6  ;;  %1583 = vrcp.f32 %v1183_v14 }
 0x4ee   :  { %v1159_v22 = vrot.slane %v1158_v15, 2  ;;  %1585 = vrcp.f32 %v1169_v16  ;;  %v1231_v40 = vpop.xlane.xlu2 %1230 }
 0x4ef   :  { %v1173_v24 = vrot.slane %v1172_v19, 2  ;;  %v2741_v20 = vsub.f32 %v2719_v39, %v1231_v40 }
 0x4f0   :  { %v1160_v25 = vadd.f32 %v1159_v22, %v1158_v15 }
 0x4f1   :  { %v1582_v26 = vpop.eup %1581  ;;  %v1174_v28 = vadd.f32 %v1173_v24, %v1172_v19  ;;  %v1245_v45 = vmul.f32 1.442695, %v2741_v20 }
 0x4f2   :  { %v1256_v29 = vsel %vm931_vm1, %v1582_v26, 0.0  ;;  %v1161_v30 = vrot.slane %v1160_v25, 1 }
 0x4f3   :  { %v1584_v31 = vpop.eup %1583  ;;  %1257 = vadd.xlane.f32.xlu0 %v1256_v29  ;;  %v1175_v32 = vrot.slane %v1174_v28, 1 }
 0x4f4   :  { %v1586_v33 = vpop.eup %1585  ;;  %v1191_v34 = vmul.f32 0.0625, %v1584_v31  ;;  %v1162_v35 = vadd.f32 %v1161_v30, %v1160_v25 }
 0x4f5   :  { %v1189_v17 = vmul.f32 0.0625, %v1586_v33  ;;  %v1176_v38 = vadd.f32 %v1175_v32, %v1174_v28 }
 0x4f6   :  { %v1195_v41 = vmul.f32 %v1191_v34, %v1155_v48  ;;  %1587 = vrcp.f32 %v1162_v35 }
 0x4f7   :  { %v1193_v42 = vmul.f32 %v1189_v17, %v1153_v18  ;;  %1589 = vrcp.f32 %v1176_v38 }
 0x4f8   :  { %v1205_v36 = vsel %vm931_vm1, %v1195_v41, 0.0  ;;  %1591 = vpow2.f32 %v1251_v37 }
 0x4f9   :  { %v1199_v21 = vsel %vm931_vm1, %v1193_v42, 0.0  ;;  %1206 = vadd.xlane.f32.xlu2 %v1205_v36  ;;  %1593 = vpow2.f32 %v1245_v45 }
 0x4fb   :  { %1200 = vadd.xlane.f32.xlu0 %v1199_v21 }
 0x4fc   :  { %v1588_v43 = vpop.eup %1587 }
 0x4fd   :  { %v1590_v44 = vpop.eup %1589  ;;  %v1188_v46 = vmul.f32 0.0625, %v1588_v43 }
 0x4fe   :  { %v1190_v49 = vmul.f32 0.0625, %v1590_v44  ;;  %v1592_v48 = vpop.eup %1591 }
 0x4ff   :  { %v1192_v50 = vmul.f32 %v1188_v46, %v1152_v1  ;;  %v1262_v52 = vsel %vm931_vm1, %v1592_v48, 0.0  ;;  %v1594_v53 = vpop.eup %1593 }
 0x500   :  { %v1194_v18 = vmul.f32 %v1190_v49, %v1154_v4  ;;  %v1253_v54 = vsel %vm931_vm1, %v1594_v53, 0.0 }
 0x501   :  { %v1196_v51 = vsel %vm931_vm1, %v1192_v50, 0.0 }
 0x502   :  { %1197 = vadd.xlane.f32.xlu2 %v1196_v51  ;;  %v1202_v39 = vsel %vm931_vm1, %v1194_v18, 0.0 }
 0x503   :  { %1263 = vadd.xlane.f32.xlu0 %v1262_v52  ;;  %1203 = vadd.xlane.f32.xlu1 %v1202_v39 }
 0x50b   :  { %1254 = vadd.xlane.f32.xlu1 %v1253_v54 }
 0x55c   :  { %v1261_v57 = vpop.xlane.xlu1 %1260 }
 0x566   :  { %v1258_v55 = vpop.xlane.xlu0 %1257 }
 0x56c   :  { %v1207_v56 = vpop.xlane.xlu2 %1206 }
 0x56e   :  { %v1201_v58 = vpop.xlane.xlu0 %1200 }
 0x56f   :  { %1595 = vrcp.f32 %v1201_v58 }
 0x570   :  { %1597 = vlog2.f32 %v1258_v55 }
 0x571   :  { %1599 = vrcp.f32 %v1207_v56 }
 0x572   :  { %1601 = vlog2.f32 %v1261_v57 }
 0x575   :  { %v1596_v59 = vpop.eup %1595  ;;  %v1198_v60 = vpop.xlane.xlu2 %1197 }
 0x576   :  { %1603 = vrcp.f32 %v1198_v60  ;;  %v1204_v61 = vpop.xlane.xlu1 %1203  ;;  %v1264_v62 = vpop.xlane.xlu0 %1263  ;;  %v1213_v63 = vmul.f32 0.125, %v1596_v59 }
 0x577   :  { %1605 = vrcp.f32 %v1204_v61  ;;  %v1598_v0 = vpop.eup %1597 }
 0x578   :  { %1607 = vlog2.f32 %v1264_v62  ;;  %v1600_v1 = vpop.eup %1599  ;;  %v1217_v4 = vmul.f32 %v1213_v63, %v1193_v42  ;;  %v1268_v8 = vmul.f32 0.6931472, %v1598_v0 }
 0x579   :  { %v1602_v3 = vpop.eup %1601  ;;  %v1215_v9 = vmul.f32 0.125, %v1600_v1 }
 0x57a   :  { %v1270_v11 = vmul.f32 0.6931472, %v1602_v3  ;;  %v1221_v14 = vmul.f32 8.0, %v1217_v4  ;;  %v1274_v19 = vsub.f32 %v2728_v2, %v1268_v8 }
 0x57b   :  { %v1219_v22 = vmul.f32 %v1215_v9, %v1195_v41 }
 0x57c   :  { %v1604_v7 = vpop.eup %1603  ;;  %v1275_v25 = vsub.f32 %v2723_v47, %v1270_v11  ;;  %v1317_v30 = vmul.f32 %v1274_v19, %v1221_v14 }
 0x57d   :  { %v1606_v5 = vpop.eup %1605  ;;  %v1212_v10 = vmul.f32 0.125, %v1604_v7  ;;  %v1223_v31 = vmul.f32 8.0, %v1219_v22 }
 0x57e   :  { %v1608_v6 = vpop.eup %1607  ;;  %v1214_v12 = vmul.f32 0.125, %v1606_v5  ;;  %v1255_v13 = vpop.xlane.xlu1 %1254  ;;  %v1304_v33 = vadd.f32 %v1275_v25, %v1274_v19  ;;  %v1320_v47 = vsel %vm931_vm1, %v1317_v30, 0.0 }
 0x57f   :  { %v1216_v15 = vmul.f32 %v1212_v10, %v1192_v50  ;;  %v1272_v16 = vmul.f32 0.6931472, %v1608_v6  ;;  %1609 = vlog2.f32 %v1255_v13 }
 0x580   :  { %v1218_v23 = vmul.f32 %v1214_v12, %v1194_v18 }
 0x581   :  { %v1220_v24 = vmul.f32 8.0, %v1216_v15  ;;  %v1276_v28 = vsub.f32 %v2735_v27, %v1272_v16 }
 0x582   :  { %v1222_v26 = vmul.f32 8.0, %v1218_v23 }
 0x583   :  { %v1277_v29 = vmul.f32 %v1274_v19, %v1220_v24  ;;  %v1305_v38 = vadd.f32 %v1304_v33, %v1276_v28  ;;  %v1319_v41 = vmul.f32 %v1276_v28, %v1223_v31 }
 0x584   :  { %v1302_v32 = vadd.f32 %v1222_v26, %v1221_v14  ;;  %v1318_v34 = vmul.f32 %v1275_v25, %v1222_v26 }
 0x585   :  { %v1610_v35 = vpop.eup %1609  ;;  %v1278_v37 = vsel %vm931_vm1, %v1277_v29, 0.0  ;;  %v1323_v44 = vsel %vm931_vm1, %v1319_v41, 0.0 }
 0x586   :  { %v1266_v17 = vmul.f32 0.6931472, %v1610_v35  ;;  %1279 = vadd.xlane.f32.xlu2 %v1278_v37  ;;  %v1303_v2 = vadd.f32 %v1302_v32, %v1223_v31  ;;  %v1321_v40 = vsel %vm931_vm1, %v1318_v34, 0.0 }
 0x587   :  { %v1322_v36 = vadd.f32 %v1321_v40, %v1320_v47 }
 0x588   :  { %v1273_v27 = vsub.f32 %v2741_v20, %v1266_v17  ;;  %v1306_v42 = vmul.f32 %v1305_v38, %v1303_v2 }
 0x589   :  { %v1324_v46 = vadd.f32 %v1323_v44, %v1322_v36 }
 0x58a   :  { %v1307_v21 = vsel %vm931_vm1, %v1306_v42, 0.0  ;;  %v1288_v43 = vmul.f32 %v1273_v27, %v1221_v14 }
 0x58b   :  { %1308 = vadd.xlane.f32.xlu1 %v1307_v21 }
 0x58c   :  { %v1289_v45 = vsel %vm931_vm1, %v1288_v43, 0.0 }
 0x58d   :  { %1290 = vadd.xlane.f32.xlu0 %v1289_v45 }
 0x58e   :  { %1325 = vadd.xlane.f32.xlu2 %v1324_v46 }
 0x5f9   :  { %v1280_v49 = vpop.xlane.xlu2 %1279 }
 0x5fa   :  { %v1281_v48 = vrot.slane %v1280_v49, 4 }
 0x5fc   :  { %v1282_v50 = vadd.f32 %v1281_v48, %v1280_v49 }
 0x5fe   :  { %v1283_v18 = vrot.slane %v1282_v50, 2  ;;  %v1309_v51 = vpop.xlane.xlu1 %1308 }
 0x5ff   :  { %v1310_v52 = vrot.slane %v1309_v51, 4 }
 0x600   :  { %v1291_v20 = vpop.xlane.xlu0 %1290  ;;  %v1284_v39 = vadd.f32 %v1283_v18, %v1282_v50 }
 0x601   :  { %v1311_v53 = vadd.f32 %v1310_v52, %v1309_v51  ;;  %v1292_v54 = vrot.slane %v1291_v20, 4  ;;  %v1326_v55 = vpop.xlane.xlu2 %1325 }
 0x602   :  { %v1327_v56 = vrot.slane %v1326_v55, 4  ;;  %v1285_v57 = vrot.slane %v1284_v39, 1 }
 0x603   :  { %v1312_v58 = vrot.slane %v1311_v53, 2  ;;  %v1293_v59 = vadd.f32 %v1292_v54, %v1291_v20 }
 0x604   :  { %v1328_v60 = vadd.f32 %v1327_v56, %v1326_v55  ;;  %v1286_v61 = vadd.f32 %v1285_v57, %v1284_v39 }
 0x605   :  { %v1313_v62 = vadd.f32 %v1312_v58, %v1311_v53  ;;  %v1294_v63 = vrot.slane %v1293_v59, 2 }
 0x606   :  { %v1329_v0 = vrot.slane %v1328_v60, 2  ;;  %1486 = vpush %v1286_v61 }
 0x607   :  { %v1295_v1 = vadd.f32 %v1294_v63, %v1293_v59  ;;  %v1314_v4 = vrot.slane %v1313_v62, 1 }
 0x608   :  { %v1330_v3 = vadd.f32 %v1329_v0, %v1328_v60 }
 0x609   :  { %v1296_v7 = vrot.slane %v1295_v1, 1  ;;  %v1315_v5 = vadd.f32 %v1314_v4, %v1313_v62 }
 0x60a   :  { %v1331_v8 = vrot.slane %v1330_v3, 1 }
 0x60b   :  { %v1297_v9 = vadd.f32 %v1296_v7, %v1295_v1 }
 0x60c   :  { %v1332_v10 = vadd.f32 %v1331_v8, %v1330_v3 }
 0x60d   :  { %1488 = vpush %v1297_v9 }
 0x60e   :  { %1490 = vpush %v1315_v5 }
 0x60f   :  { %1492 = vpush %v1332_v10 }
 0x637   :  { %s1487_s5 = spop %1486 }
 0x63e   :  { %s1489_s6 = spop %1488 }
 0x63f   :  { %s1299_s4 = sadd.f32 %s1489_s6, %s1487_s5  ;;  %s1491_s14 = spop %1490 }
 0x640   :  { %s1493_s29 = spop %1492 }
 0x641   :  { %s1300_s0 = ssub.f32 0.0, %s1299_s4 }
 0x642   :  { %s1334_s17 = ssub.f32 %s1491_s14, %s1493_s29 }
 0x643   :  { %s1301_s7 = smul.f32 0.125, %s1300_s0 }
 0x644   :  { %s1335_s9 = ssub.f32 0.0, %s1334_s17 }
 0x645   :  { %s1337_s24 = smul.f32 0.5, %s1301_s7 }
 0x646   :  { %s1336_s19 = smul.f32 0.125, %s1335_s9 }
 0x648   :  { %s1338_s23 = smul.f32 0.16666667, %s1336_s19 }
 0x64a   :  { %s1339_s10 = sadd.f32 %s1338_s23, %s1337_s24 }
 0x64c   :  { %1341 = sst [smem:[#allocation8]] %s1339_s10 }
 0x64d   :  { %1350 = dma.smem_to_hbm %s2261_s16, 16, %s1348_s25, [#allocation9]  }
 0x64e   :  { %2233 = dma.done.wait [#allocation9], 16  }
 0x64f   :  { %2234 = vsyncadd [#allocation9], 4294967280 }
 0x650   :  { %1355 = sfence }
 0x651   :  { %1356 = vsyncpa [#allocation9], 1 }
 0x652   :  { %1357 = vsyncmov [#allocation3] }
 0x655   :  { %s1358_s1 = vpop.sfrf %1357 }
 0x656   :  { %p1478_p8 = scmp.ne.s32.totalorder %s1358_s1, 0 }
 0x658   :  { %1362 = shalt.err (%p1478_p8)  }
 0x659   :  { %1364 = vsyncmov [#allocation3 + $0x1] }
 0x65c   :  { %s1365_s20 = vpop.sfrf %1364 }
 0x65d   :  { %p1479_p9 = scmp.ne.s32.totalorder %s1365_s20, 0 }
 0x65f   :  { %1369 = shalt.err (%p1479_p9)  }
 0x660   :  { %1371 = vsyncmov [#allocation3 + $0x2] }
 0x663   :  { %s1372_s8 = vpop.sfrf %1371 }
 0x664   :  { %p1480_p10 = scmp.ne.s32.totalorder %s1372_s8, 0 }
 0x666   :  { %1376 = shalt.err (%p1480_p10)  }
 0x667   :  { %1378 = vsyncmov [#allocation3 + $0x3] }
 0x66a   :  { %s1379_s11 = vpop.sfrf %1378 }
 0x66b   :  { %p1481_p11 = scmp.ne.s32.totalorder %s1379_s11, 0 }
 0x66d   :  { %1383 = shalt.err (%p1481_p11)  }

</bundles_post_ra>
